<compile_context>
chip_gen: v6e
topology: v6e:2x2x1
jax: 0.10.0
libtpu: 0.0.40
codegen_flags: <defaults>
</compile_context>

<pallas_src>
import functools
import math

import jax
import jax.numpy as jnp
from jax.experimental import pallas as pl
from jax.experimental.pallas import tpu as pltpu

_EPS = 1e-5     # nn.InstanceNorm2d defaults: eps=1e-5, affine=False, biased variance
_LANE = 128     # TPU lane width
_SUB = 8        # TPU sublane width


def _round_up(x, m):
    return (x + m - 1) // m * m


# ---------------------------------------------------------------------------
# Pallas kernel: one full LinearBottleneck for one batch element
# ---------------------------------------------------------------------------
def _bottleneck_kernel(x_ref, w1_ref, wd_ref, w2_ref, o_ref, pad_ref, *,
                       H, W, Hout, Wout, stride, use_shortcut, row_tile):
    """
    x_ref  : (1, H*W, Cin)           f32   real (unpadded) input channels
    w1_ref : (Cin, Ch_p)             bf16  1x1 expansion weight  (w[ci, co])
    wd_ref : (9, Ch_p)               f32   depthwise 3x3 weight, taps row-major
    w2_ref : (Ch_p, Cout)            bf16  1x1 projection weight
    o_ref  : (1, Hout*Wout, Cout)    f32   real (unpadded) output channels
    pad_ref: VMEM scratch (H+2, Wpad, Ch_p) f32 -- spatially padded expansion output,
             interior at rows [1, H], cols [8, 8+W) (sublane-aligned interior write).
    """
    cp = pad_ref.shape[-1]
    wpad = pad_ref.shape[1]
    L = 8                               # interior column offset (sublane aligned)
    hw = H * W

    # ---- zero only the halo border (interior is fully overwritten below) ----------
    pad_ref[0] = jnp.zeros((wpad, cp), jnp.float32)
    pad_ref[H + 1] = jnp.zeros((wpad, cp), jnp.float32)
    pad_ref[pl.ds(1, H), pl.ds(0, L), :] = jnp.zeros((H, L, cp), jnp.float32)
    pad_ref[pl.ds(1, H), pl.ds(L + W, wpad - L - W), :] = (
        jnp.zeros((H, wpad - L - W, cp), jnp.float32))

    # ---- 1x1 expansion (MXU, bf16 x bf16 -> f32), streamed into pad_ref -----------
    # Two-phase InstanceNorm: accumulate per-channel sum / sumsq while streaming, then
    # normalize + ReLU in place (the full f32 expansion activation is never a live value).
    x_full = x_ref[0]                                           # (HW, Cin) f32, small
    w1 = w1_ref[...]
    s1 = jnp.zeros((1, cp), jnp.float32)
    s2 = jnp.zeros((1, cp), jnp.float32)
    for r0 in range(0, H, row_tile):
        tr = min(row_tile, H - r0)
        xt = x_full[r0 * W:(r0 + tr) * W, :]                    # (tr*W, Cin)
        yt = jnp.dot(xt.astype(w1.dtype), w1,
                     preferred_element_type=jnp.float32)        # (tr*W, cp)
        s1 = s1 + jnp.sum(yt, axis=0, keepdims=True)
        s2 = s2 + jnp.sum(yt * yt, axis=0, keepdims=True)
        pad_ref[pl.ds(1 + r0, tr), pl.ds(L, W), :] = yt.reshape(tr, W, cp)

    mean = s1 / hw
    var = jnp.maximum(s2 / hw - mean * mean, 0.0)
    scale = jax.lax.rsqrt(var + _EPS).reshape(1, 1, cp)
    shift = (-mean).reshape(1, 1, cp) * scale
    for r0 in range(0, H, row_tile):                            # in-place IN + ReLU
        tr = min(row_tile, H - r0)
        t = pad_ref[pl.ds(1 + r0, tr), pl.ds(L, W), :]
        pad_ref[pl.ds(1 + r0, tr), pl.ds(L, W), :] = jnp.maximum(t * scale + shift, 0.0)

    # ---- depthwise 3x3 (pad=1, stride) + InstanceNorm + ReLU (VPU, f32) ------------
    wd = wd_ref[...]                                            # (9, cp) f32
    acc = jnp.zeros((Hout, Wout, cp), jnp.float32)
    for k in range(9):
        dh, dw = divmod(k, 3)
        if stride == 1:
            tap = pad_ref[pl.ds(dh, Hout), pl.ds(L - 1 + dw, Wout), :]
        else:
            tap = pad_ref[pl.ds(dh, Hout, stride), pl.ds(L - 1 + dw, Wout, stride), :]
        acc = acc + tap * wd[k]
    m2 = jnp.mean(acc, axis=(0, 1), keepdims=True)
    v2 = jnp.maximum(jnp.mean(acc * acc, axis=(0, 1), keepdims=True) - m2 * m2, 0.0)
    z = jnp.maximum((acc - m2) * jax.lax.rsqrt(v2 + _EPS), 0.0)

    # ---- 1x1 projection (MXU) + InstanceNorm (+ residual, added after IN) ----------
    out = jnp.dot(z.reshape(Hout * Wout, cp).astype(w2_ref.dtype), w2_ref[...],
                  preferred_element_type=jnp.float32)           # (HWo, Cout) f32
    m3 = jnp.mean(out, axis=0, keepdims=True)
    v3 = jnp.maximum(jnp.mean(out * out, axis=0, keepdims=True) - m3 * m3, 0.0)
    out = (out - m3) * jax.lax.rsqrt(v3 + _EPS)
    if use_shortcut:                                            # stride == 1 and Cin == Cout
        out = out + x_full                                      # x tile is resident -> free
    o_ref[0] = out.astype(o_ref.dtype)


# ---------------------------------------------------------------------------
# Channels-last core wrapper: (B, H*W, Cin) -> (B, Hout*Wout, Cout)
# ---------------------------------------------------------------------------
def linear_bottleneck_cl(x_cl, params, *, H, W, stride):
    w1, wd, w2 = params["w1"], params["wd"], params["w2"]
    B, hw, Cin = x_cl.shape
    Ch, Cout = w1.shape[1], w2.shape[1]
    assert hw == H * W and w1.shape[0] == Cin and wd.shape == (3, 3, Ch) and w2.shape[0] == Ch
    Hout = (H - 1) // stride + 1            # kernel=3, pad=1
    Wout = (W - 1) // stride + 1
    use_shortcut = (stride == 1 and Cin == Cout)

    ch_p = _round_up(Ch, _LANE)             # hidden channels lane-padded (weights only)
    wpad = _round_up(8 + W + 1, _SUB)       # sublane-aligned padded scratch width
    row_tile = max(1, min(H, 128 // max(W, 1)))

    # Only the (tiny) weights are padded; activations keep their real channel counts.
    w1p = jnp.pad(w1, ((0, 0), (0, ch_p - Ch))).astype(jnp.bfloat16)
    wdp = jnp.pad(wd.reshape(9, Ch), ((0, 0), (0, ch_p - Ch)))          # f32 (VPU path)
    w2p = jnp.pad(w2, ((0, ch_p - Ch), (0, 0))).astype(jnp.bfloat16)

    flops = 2 * B * (H * W * Cin * ch_p + 9 * Hout * Wout * ch_p
                     + Hout * Wout * ch_p * Cout)
    bytes_accessed = (4 * (x_cl.size + wdp.size + B * Hout * Wout * Cout)
                      + 2 * (w1p.size + w2p.size))
    vmem_need = (2 * 4 * H * W * Cin                     # x block (double-buffered)
                 + 2 * 4 * Hout * Wout * Cout            # out block
                 + 2 * (2 * w1p.size + 2 * w2p.size + 4 * wdp.size)
                 + 4 * (H + 2) * wpad * ch_p             # padded scratch
                 + 4 * (Hout * Wout + row_tile * W) * ch_p * 2)   # live-value headroom
    try:  # per-generation VMEM capacity (64 MiB on v7x, 128 MiB on v5e/v6e)
        cap = int(getattr(pltpu.get_tpu_info(), "vmem_capacity_bytes", 64 << 20))
    except Exception:
        cap = 64 << 20
    vmem_limit = int(min(max(2 * int(vmem_need), 32 << 20), int(0.85 * cap)))

    out = pl.pallas_call(
        functools.partial(_bottleneck_kernel, H=H, W=W, Hout=Hout, Wout=Wout,
                          stride=stride, use_shortcut=use_shortcut, row_tile=row_tile),
        out_shape=jax.ShapeDtypeStruct((B, Hout * Wout, Cout), jnp.float32),
        grid=(B,),
        in_specs=[
            pl.BlockSpec((1, H * W, Cin), lambda b: (b, 0, 0)),
            pl.BlockSpec((Cin, ch_p), lambda b: (0, 0)),
            pl.BlockSpec((9, ch_p), lambda b: (0, 0)),
            pl.BlockSpec((ch_p, Cout), lambda b: (0, 0)),
        ],
        out_specs=pl.BlockSpec((1, Hout * Wout, Cout), lambda b: (b, 0, 0)),
        scratch_shapes=[pltpu.VMEM((H + 2, wpad, ch_p), jnp.float32)],
        compiler_params=pltpu.CompilerParams(
            dimension_semantics=("parallel",),            # batch across TCs (megacore)
            vmem_limit_bytes=vmem_limit,
        ),
        cost_estimate=pl.CostEstimate(flops=int(flops),
                                      transcendentals=int(B * (2 * ch_p + Cout)),
                                      bytes_accessed=int(bytes_accessed)),
    )(x_cl, w1p, wdp, w2p)
    return out


# ---------------------------------------------------------------------------
# NCHW entry wrapper (single block).  For stacked blocks, chain the
# channels-last core and convert only at model entry/exit (see __main__).
# ---------------------------------------------------------------------------
def linear_bottleneck(x_nchw, params, *, stride):
    B, Cin, H, W = x_nchw.shape
    Cout = params["w2"].shape[1]
    Hout = (H - 1) // stride + 1
    Wout = (W - 1) // stride + 1
    x_cl = jnp.transpose(x_nchw, (0, 2, 3, 1)).reshape(B, H * W, Cin)
    out = linear_bottleneck_cl(x_cl, params, H=H, W=W, stride=stride)
    return jnp.transpose(out.reshape(B, Hout, Wout, Cout), (0, 3, 1, 2))


# ---------------------------------------------------------------------------
# Pure-JAX reference with identical numerics (bf16 MXU operands, f32 stats)
# ---------------------------------------------------------------------------
def _reference_bottleneck(x_nchw, params, *, stride):
    w1, wd, w2 = params["w1"], params["wd"], params["w2"]
    B, Cin, H, W = x_nchw.shape
    Cout = w2.shape[1]
    xb = jnp.transpose(x_nchw, (0, 2, 3, 1))

    def inorm(y):
        m = jnp.mean(y, axis=(1, 2), keepdims=True)
        v = jnp.mean(jnp.square(y - m), axis=(1, 2), keepdims=True)
        return (y - m) * jax.lax.rsqrt(v + _EPS)

    y = jnp.einsum("bhwi,io->bhwo", xb.astype(jnp.bfloat16), w1.astype(jnp.bfloat16),
                   preferred_element_type=jnp.float32)
    y = jnp.maximum(inorm(y), 0.0)

    Hout = (H - 1) // stride + 1
    Wout = (W - 1) // stride + 1
    yp = jnp.pad(y, ((0, 0), (1, 1), (1, 1), (0, 0)))
    acc = jnp.zeros((B, Hout, Wout, y.shape[-1]), jnp.float32)
    for dh in range(3):
        for dw in range(3):
            tap = jax.lax.slice(yp, (0, dh, dw, 0),
                                (B, dh + stride * (Hout - 1) + 1,
                                 dw + stride * (Wout - 1) + 1, y.shape[-1]),
                                (1, stride, stride, 1))
            acc = acc + tap * wd[dh, dw]
    z = jnp.maximum(inorm(acc), 0.0)

    out = jnp.einsum("bhwi,io->bhwo", z.astype(jnp.bfloat16), w2.astype(jnp.bfloat16),
                     preferred_element_type=jnp.float32)
    out = inorm(out)
    if stride == 1 and Cin == Cout:
        out = out + xb
    return jnp.transpose(out, (0, 3, 1, 2))


# ---------------------------------------------------------------------------
# Deterministic synthetic parameters (shapes follow the PyTorch __init__)
# ---------------------------------------------------------------------------
def init_params(key, in_channels, out_channels, t):
    k1, k2, k3 = jax.random.split(key, 3)
    hidden = in_channels * t
    return {
        # 1x1 conv stored channels-last: w[ci, co] == torch_weight[co, ci, 0, 0]
        "w1": jax.random.normal(k1, (in_channels, hidden), jnp.float32) / math.sqrt(in_channels),
        # depthwise 3x3: wd[kh, kw, c] == torch_weight[c, 0, kh, kw]
        "wd": jax.random.normal(k2, (3, 3, hidden), jnp.float32) / 3.0,
        "w2": jax.random.normal(k3, (hidden, out_channels), jnp.float32) / math.sqrt(hidden),
    }


# ---------------------------------------------------------------------------
if __name__ == "__main__":
    B, H, W = 2, 16, 16
    IN_C, OUT_C, T = 16, 24, 6
    H2, W2 = H // 2, W // 2

    kx, k1, k2 = jax.random.split(jax.random.PRNGKey(0), 3)
    x = jax.random.normal(kx, (B, IN_C, H, W), jnp.float32)           # NCHW, like PyTorch

    # Block 1: default MobileNetV2 bottleneck (stride=2, no shortcut).
    # Block 2: stride=1 with in_channels == out_channels -> residual shortcut path.
    p1 = init_params(k1, IN_C, OUT_C, T)
    p2 = init_params(k2, OUT_C, OUT_C, T)

    @jax.jit
    def two_blocks(x_nchw, p1, p2):
        # Layout conversion only at model entry/exit; activations stay (B, H*W, C)
        # channels-last between the chained bottleneck blocks (no per-block transpose).
        xb = jnp.transpose(x_nchw, (0, 2, 3, 1)).reshape(B, H * W, IN_C)
        y1 = linear_bottleneck_cl(xb, p1, H=H, W=W, stride=2)
        y2 = linear_bottleneck_cl(y1, p2, H=H2, W=W2, stride=1)
        return (jnp.transpose(y1.reshape(B, H2, W2, OUT_C), (0, 3, 1, 2)),
                jnp.transpose(y2.reshape(B, H2, W2, OUT_C), (0, 3, 1, 2)))

    y1, y2 = two_blocks(x, p1, p2)
    jax.block_until_ready(y2)

    assert y1.shape == (B, OUT_C, H2, W2), y1.shape
    assert y2.shape == (B, OUT_C, H2, W2), y2.shape
    assert bool(jnp.all(jnp.isfinite(y2)))

    # Correctness vs. a pure-JAX reference with the same (bf16-MXU / f32-stats) numerics.
    r1 = _reference_bottleneck(x, p1, stride=2)
    r2 = _reference_bottleneck(y1, p2, stride=1)
    err = max(float(jnp.max(jnp.abs(y1 - r1))), float(jnp.max(jnp.abs(y2 - r2))))
    assert err < 5e-3, f"max abs err {err}"

    print("KERNEL_OK")
</pallas_src>

<mosaic_0001>
module attributes {stable_mosaic.version = 11 : i64} {
  func.func @_bottleneck_kernel(%arg0: i32, %arg1: memref<1x256x16xf32, #tpu.memory_space<vmem>>, %arg2: memref<16x128xbf16, #tpu.memory_space<vmem>>, %arg3: memref<9x128xf32, #tpu.memory_space<vmem>>, %arg4: memref<128x24xbf16, #tpu.memory_space<vmem>>, %arg5: memref<1x64x24xf32, #tpu.memory_space<vmem>>, %arg6: memref<18x32x128xf32, #tpu.memory_space<vmem>>) attributes {dimension_semantics = [#tpu.dimension_semantics<parallel>], iteration_bounds = array<i64: 2>, scalar_prefetch = 0 : i64, scratch_operands = 1 : i64, tpu.core_type = #tpu.core_type<tc>, window_params = [{transform_indices = @transform_0, window_bounds = array<i64: 1, 256, 16>}, {pipeline_mode = #tpu.pipeline_mode<synchronous>, transform_indices = @transform_1, window_bounds = array<i64: 16, 128>}, {pipeline_mode = #tpu.pipeline_mode<synchronous>, transform_indices = @transform_2, window_bounds = array<i64: 9, 128>}, {pipeline_mode = #tpu.pipeline_mode<synchronous>, transform_indices = @transform_3, window_bounds = array<i64: 128, 24>}, {transform_indices = @transform_4, window_bounds = array<i64: 1, 64, 24>}]} {
    %cst = arith.constant 0.000000e+00 : f32
    %0 = vector.broadcast %cst : f32 to vector<32x128xf32>
    %c0 = arith.constant 0 : index
    %c0_0 = arith.constant 0 : index
    %c0_1 = arith.constant 0 : index
    %1 = vector.load %arg6[%c0, %c0_0, %c0_1] : memref<18x32x128xf32, #tpu.memory_space<vmem>>, vector<1x32x128xf32>
    %2 = vector.shape_cast %1 : vector<1x32x128xf32> to vector<32x128xf32>
    %3 = vector.shape_cast %0 : vector<32x128xf32> to vector<1x32x128xf32>
    tpu.vector_store %arg6[%c0, %c0_0, %c0_1], %3 {strides = array<i32>} : memref<18x32x128xf32, #tpu.memory_space<vmem>>, vector<1x32x128xf32>,
    %cst_2 = arith.constant 0.000000e+00 : f32
    %4 = vector.broadcast %cst_2 : f32 to vector<32x128xf32>
    %c17 = arith.constant 17 : index
    %c0_3 = arith.constant 0 : index
    %c0_4 = arith.constant 0 : index
    %5 = vector.load %arg6[%c17, %c0_3, %c0_4] : memref<18x32x128xf32, #tpu.memory_space<vmem>>, vector<1x32x128xf32>
    %6 = vector.shape_cast %5 : vector<1x32x128xf32> to vector<32x128xf32>
    %7 = vector.shape_cast %4 : vector<32x128xf32> to vector<1x32x128xf32>
    tpu.vector_store %arg6[%c17, %c0_3, %c0_4], %7 {strides = array<i32>} : memref<18x32x128xf32, #tpu.memory_space<vmem>>, vector<1x32x128xf32>,
    %cst_5 = arith.constant 0.000000e+00 : f32
    %8 = vector.broadcast %cst_5 : f32 to vector<16x8x128xf32>
    %c1 = arith.constant 1 : index
    %c0_6 = arith.constant 0 : index
    %c0_7 = arith.constant 0 : index
    %9 = vector.load %arg6[%c1, %c0_6, %c0_7] : memref<18x32x128xf32, #tpu.memory_space<vmem>>, vector<16x8x128xf32>
    tpu.vector_store %arg6[%c1, %c0_6, %c0_7], %8 {strides = array<i32>} : memref<18x32x128xf32, #tpu.memory_space<vmem>>, vector<16x8x128xf32>,
    %cst_8 = arith.constant 0.000000e+00 : f32
    %10 = vector.broadcast %cst_8 : f32 to vector<16x8x128xf32>
    %c1_9 = arith.constant 1 : index
    %c24 = arith.constant 24 : index
    %c0_10 = arith.constant 0 : index
    %11 = vector.load %arg6[%c1_9, %c24, %c0_10] : memref<18x32x128xf32, #tpu.memory_space<vmem>>, vector<16x8x128xf32>
    tpu.vector_store %arg6[%c1_9, %c24, %c0_10], %10 {strides = array<i32>} : memref<18x32x128xf32, #tpu.memory_space<vmem>>, vector<16x8x128xf32>,
    %c0_11 = arith.constant 0 : index
    %c0_12 = arith.constant 0 : index
    %c0_13 = arith.constant 0 : index
    %12 = vector.load %arg1[%c0_11, %c0_12, %c0_13] : memref<1x256x16xf32, #tpu.memory_space<vmem>>, vector<1x256x16xf32>
    %13 = vector.shape_cast %12 : vector<1x256x16xf32> to vector<256x16xf32>
    %c0_14 = arith.constant 0 : index
    %c0_15 = arith.constant 0 : index
    %14 = vector.load %arg2[%c0_14, %c0_15] : memref<16x128xbf16, #tpu.memory_space<vmem>>, vector<16x128xbf16>
    %cst_16 = arith.constant 0.000000e+00 : f32
    %15 = vector.broadcast %cst_16 : f32 to vector<1x128xf32>
    %cst_17 = arith.constant 0.000000e+00 : f32
    %16 = vector.broadcast %cst_17 : f32 to vector<1x128xf32>
    %17 = vector.extract_strided_slice %13 {offsets = [0, 0], sizes = [128, 16], strides = [1, 1]} : vector<256x16xf32> to vector<128x16xf32>
    %18 = arith.truncf %17 : vector<128x16xf32> to vector<128x16xbf16>
    %cst_18 = arith.constant dense<0.000000e+00> : vector<128x128xf32>
    %19 = tpu.matmul %18, %14, %cst_18 {dimension_numbers = #tpu.dot_dimension_numbers<[1], [0], [0], [1], [0, 0, 1, 1], [], []>} : vector<128x16xbf16>, vector<16x128xbf16>, vector<128x128xf32> -> vector<128x128xf32>
    %cst_19 = arith.constant dense<0.000000e+00> : vector<128xf32>
    %20 = vector.multi_reduction <add>, %19, %cst_19 [0] : vector<128x128xf32> to vector<128xf32>
    %21 = vector.shape_cast %20 : vector<128xf32> to vector<1x128xf32>
    %22 = arith.addf %15, %21 : vector<1x128xf32>
    %23 = arith.mulf %19, %19 : vector<128x128xf32>
    %cst_20 = arith.constant dense<0.000000e+00> : vector<128xf32>
    %24 = vector.multi_reduction <add>, %23, %cst_20 [0] : vector<128x128xf32> to vector<128xf32>
    %25 = vector.shape_cast %24 : vector<128xf32> to vector<1x128xf32>
    %26 = arith.addf %16, %25 : vector<1x128xf32>
    %27 = vector.shape_cast %19 : vector<128x128xf32> to vector<8x16x128xf32>
    %c1_21 = arith.constant 1 : index
    %c8 = arith.constant 8 : index
    %c0_22 = arith.constant 0 : index
    %28 = vector.load %arg6[%c1_21, %c8, %c0_22] : memref<18x32x128xf32, #tpu.memory_space<vmem>>, vector<8x16x128xf32>
    tpu.vector_store %arg6[%c1_21, %c8, %c0_22], %27 {strides = array<i32>} : memref<18x32x128xf32, #tpu.memory_space<vmem>>, vector<8x16x128xf32>,
    %29 = vector.extract_strided_slice %13 {offsets = [128, 0], sizes = [128, 16], strides = [1, 1]} : vector<256x16xf32> to vector<128x16xf32>
    %30 = arith.truncf %29 : vector<128x16xf32> to vector<128x16xbf16>
    %cst_23 = arith.constant dense<0.000000e+00> : vector<128x128xf32>
    %31 = tpu.matmul %30, %14, %cst_23 {dimension_numbers = #tpu.dot_dimension_numbers<[1], [0], [0], [1], [0, 0, 1, 1], [], []>} : vector<128x16xbf16>, vector<16x128xbf16>, vector<128x128xf32> -> vector<128x128xf32>
    %cst_24 = arith.constant dense<0.000000e+00> : vector<128xf32>
    %32 = vector.multi_reduction <add>, %31, %cst_24 [0] : vector<128x128xf32> to vector<128xf32>
    %33 = vector.shape_cast %32 : vector<128xf32> to vector<1x128xf32>
    %34 = arith.addf %22, %33 : vector<1x128xf32>
    %35 = arith.mulf %31, %31 : vector<128x128xf32>
    %cst_25 = arith.constant dense<0.000000e+00> : vector<128xf32>
    %36 = vector.multi_reduction <add>, %35, %cst_25 [0] : vector<128x128xf32> to vector<128xf32>
    %37 = vector.shape_cast %36 : vector<128xf32> to vector<1x128xf32>
    %38 = arith.addf %26, %37 : vector<1x128xf32>
    %39 = vector.shape_cast %31 : vector<128x128xf32> to vector<8x16x128xf32>
    %c9 = arith.constant 9 : index
    %c8_26 = arith.constant 8 : index
    %c0_27 = arith.constant 0 : index
    %40 = vector.load %arg6[%c9, %c8_26, %c0_27] : memref<18x32x128xf32, #tpu.memory_space<vmem>>, vector<8x16x128xf32>
    tpu.vector_store %arg6[%c9, %c8_26, %c0_27], %39 {strides = array<i32>} : memref<18x32x128xf32, #tpu.memory_space<vmem>>, vector<8x16x128xf32>,
    %cst_28 = arith.constant 2.560000e+02 : f32
    %41 = vector.broadcast %cst_28 : f32 to vector<1x128xf32>
    %42 = arith.divf %34, %41 : vector<1x128xf32>
    %cst_29 = arith.constant 2.560000e+02 : f32
    %43 = vector.broadcast %cst_29 : f32 to vector<1x128xf32>
    %44 = arith.divf %38, %43 : vector<1x128xf32>
    %45 = arith.mulf %42, %42 : vector<1x128xf32>
    %46 = arith.subf %44, %45 : vector<1x128xf32>
    %cst_30 = arith.constant 0.000000e+00 : f32
    %47 = vector.broadcast %cst_30 : f32 to vector<1x128xf32>
    %48 = arith.maximumf %46, %47 : vector<1x128xf32>
    %cst_31 = arith.constant 9.99999974E-6 : f32
    %49 = vector.broadcast %cst_31 : f32 to vector<1x128xf32>
    %50 = arith.addf %48, %49 : vector<1x128xf32>
    %51 = math.rsqrt %50 : vector<1x128xf32>
    %52 = vector.shape_cast %51 : vector<1x128xf32> to vector<1x1x128xf32>
    %cst_32 = arith.constant 0.000000e+00 : f32
    %53 = vector.broadcast %cst_32 : f32 to vector<1x128xf32>
    %54 = arith.subf %53, %42 : vector<1x128xf32>
    %55 = vector.shape_cast %54 : vector<1x128xf32> to vector<1x1x128xf32>
    %56 = arith.mulf %55, %52 : vector<1x1x128xf32>
    %c1_33 = arith.constant 1 : index
    %c8_34 = arith.constant 8 : index
    %c0_35 = arith.constant 0 : index
    %57 = vector.load %arg6[%c1_33, %c8_34, %c0_35] : memref<18x32x128xf32, #tpu.memory_space<vmem>>, vector<8x16x128xf32>
    %58 = vector.broadcast %52 : vector<1x1x128xf32> to vector<8x16x128xf32>
    %59 = arith.mulf %57, %58 : vector<8x16x128xf32>
    %60 = vector.broadcast %56 : vector<1x1x128xf32> to vector<8x16x128xf32>
    %61 = arith.addf %59, %60 : vector<8x16x128xf32>
    %cst_36 = arith.constant 0.000000e+00 : f32
    %62 = vector.broadcast %cst_36 : f32 to vector<8x16x128xf32>
    %63 = arith.maximumf %61, %62 : vector<8x16x128xf32>
    %c1_37 = arith.constant 1 : index
    %c8_38 = arith.constant 8 : index
    %c0_39 = arith.constant 0 : index
    %64 = vector.load %arg6[%c1_37, %c8_38, %c0_39] : memref<18x32x128xf32, #tpu.memory_space<vmem>>, vector<8x16x128xf32>
    tpu.vector_store %arg6[%c1_37, %c8_38, %c0_39], %63 {strides = array<i32>} : memref<18x32x128xf32, #tpu.memory_space<vmem>>, vector<8x16x128xf32>,
    %c9_40 = arith.constant 9 : index
    %c8_41 = arith.constant 8 : index
    %c0_42 = arith.constant 0 : index
    %65 = vector.load %arg6[%c9_40, %c8_41, %c0_42] : memref<18x32x128xf32, #tpu.memory_space<vmem>>, vector<8x16x128xf32>
    %66 = vector.broadcast %52 : vector<1x1x128xf32> to vector<8x16x128xf32>
    %67 = arith.mulf %65, %66 : vector<8x16x128xf32>
    %68 = vector.broadcast %56 : vector<1x1x128xf32> to vector<8x16x128xf32>
    %69 = arith.addf %67, %68 : vector<8x16x128xf32>
    %cst_43 = arith.constant 0.000000e+00 : f32
    %70 = vector.broadcast %cst_43 : f32 to vector<8x16x128xf32>
    %71 = arith.maximumf %69, %70 : vector<8x16x128xf32>
    %c9_44 = arith.constant 9 : index
    %c8_45 = arith.constant 8 : index
    %c0_46 = arith.constant 0 : index
    %72 = vector.load %arg6[%c9_44, %c8_45, %c0_46] : memref<18x32x128xf32, #tpu.memory_space<vmem>>, vector<8x16x128xf32>
    tpu.vector_store %arg6[%c9_44, %c8_45, %c0_46], %71 {strides = array<i32>} : memref<18x32x128xf32, #tpu.memory_space<vmem>>, vector<8x16x128xf32>,
    %c0_47 = arith.constant 0 : index
    %c0_48 = arith.constant 0 : index
    %73 = vector.load %arg3[%c0_47, %c0_48] : memref<9x128xf32, #tpu.memory_space<vmem>>, vector<9x128xf32>
    %cst_49 = arith.constant 0.000000e+00 : f32
    %74 = vector.broadcast %cst_49 : f32 to vector<8x8x128xf32>
    %c0_50 = arith.constant 0 : index
    %c7 = arith.constant 7 : index
    %c0_51 = arith.constant 0 : index
    %75 = tpu.strided_load %arg6[%c0_50, %c7, %c0_51] {strides = array<i32: 2, 2, 1>} : memref<18x32x128xf32, #tpu.memory_space<vmem>>, vector<8x8x128xf32>
    %76 = vector.extract_strided_slice %73 {offsets = [0, 0], sizes = [1, 128], strides = [1, 1]} : vector<9x128xf32> to vector<1x128xf32>
    %77 = vector.shape_cast %76 : vector<1x128xf32> to vector<128xf32>
    %78 = vector.shape_cast %77 : vector<128xf32> to vector<1x1x128xf32>
    %79 = vector.broadcast %78 : vector<1x1x128xf32> to vector<8x8x128xf32>
    %80 = arith.mulf %75, %79 : vector<8x8x128xf32>
    %81 = arith.addf %74, %80 : vector<8x8x128xf32>
    %c0_52 = arith.constant 0 : index
    %c8_53 = arith.constant 8 : index
    %c0_54 = arith.constant 0 : index
    %82 = tpu.strided_load %arg6[%c0_52, %c8_53, %c0_54] {strides = array<i32: 2, 2, 1>} : memref<18x32x128xf32, #tpu.memory_space<vmem>>, vector<8x8x128xf32>
    %83 = vector.extract_strided_slice %73 {offsets = [1, 0], sizes = [1, 128], strides = [1, 1]} : vector<9x128xf32> to vector<1x128xf32>
    %84 = vector.shape_cast %83 : vector<1x128xf32> to vector<128xf32>
    %85 = vector.shape_cast %84 : vector<128xf32> to vector<1x1x128xf32>
    %86 = vector.broadcast %85 : vector<1x1x128xf32> to vector<8x8x128xf32>
    %87 = arith.mulf %82, %86 : vector<8x8x128xf32>
    %88 = arith.addf %81, %87 : vector<8x8x128xf32>
    %c0_55 = arith.constant 0 : index
    %c9_56 = arith.constant 9 : index
    %c0_57 = arith.constant 0 : index
    %89 = tpu.strided_load %arg6[%c0_55, %c9_56, %c0_57] {strides = array<i32: 2, 2, 1>} : memref<18x32x128xf32, #tpu.memory_space<vmem>>, vector<8x8x128xf32>
    %90 = vector.extract_strided_slice %73 {offsets = [2, 0], sizes = [1, 128], strides = [1, 1]} : vector<9x128xf32> to vector<1x128xf32>
    %91 = vector.shape_cast %90 : vector<1x128xf32> to vector<128xf32>
    %92 = vector.shape_cast %91 : vector<128xf32> to vector<1x1x128xf32>
    %93 = vector.broadcast %92 : vector<1x1x128xf32> to vector<8x8x128xf32>
    %94 = arith.mulf %89, %93 : vector<8x8x128xf32>
    %95 = arith.addf %88, %94 : vector<8x8x128xf32>
    %c1_58 = arith.constant 1 : index
    %c7_59 = arith.constant 7 : index
    %c0_60 = arith.constant 0 : index
    %96 = tpu.strided_load %arg6[%c1_58, %c7_59, %c0_60] {strides = array<i32: 2, 2, 1>} : memref<18x32x128xf32, #tpu.memory_space<vmem>>, vector<8x8x128xf32>
    %97 = vector.extract_strided_slice %73 {offsets = [3, 0], sizes = [1, 128], strides = [1, 1]} : vector<9x128xf32> to vector<1x128xf32>
    %98 = vector.shape_cast %97 : vector<1x128xf32> to vector<128xf32>
    %99 = vector.shape_cast %98 : vector<128xf32> to vector<1x1x128xf32>
    %100 = vector.broadcast %99 : vector<1x1x128xf32> to vector<8x8x128xf32>
    %101 = arith.mulf %96, %100 : vector<8x8x128xf32>
    %102 = arith.addf %95, %101 : vector<8x8x128xf32>
    %c1_61 = arith.constant 1 : index
    %c8_62 = arith.constant 8 : index
    %c0_63 = arith.constant 0 : index
    %103 = tpu.strided_load %arg6[%c1_61, %c8_62, %c0_63] {strides = array<i32: 2, 2, 1>} : memref<18x32x128xf32, #tpu.memory_space<vmem>>, vector<8x8x128xf32>
    %104 = vector.extract_strided_slice %73 {offsets = [4, 0], sizes = [1, 128], strides = [1, 1]} : vector<9x128xf32> to vector<1x128xf32>
    %105 = vector.shape_cast %104 : vector<1x128xf32> to vector<128xf32>
    %106 = vector.shape_cast %105 : vector<128xf32> to vector<1x1x128xf32>
    %107 = vector.broadcast %106 : vector<1x1x128xf32> to vector<8x8x128xf32>
    %108 = arith.mulf %103, %107 : vector<8x8x128xf32>
    %109 = arith.addf %102, %108 : vector<8x8x128xf32>
    %c1_64 = arith.constant 1 : index
    %c9_65 = arith.constant 9 : index
    %c0_66 = arith.constant 0 : index
    %110 = tpu.strided_load %arg6[%c1_64, %c9_65, %c0_66] {strides = array<i32: 2, 2, 1>} : memref<18x32x128xf32, #tpu.memory_space<vmem>>, vector<8x8x128xf32>
    %111 = vector.extract_strided_slice %73 {offsets = [5, 0], sizes = [1, 128], strides = [1, 1]} : vector<9x128xf32> to vector<1x128xf32>
    %112 = vector.shape_cast %111 : vector<1x128xf32> to vector<128xf32>
    %113 = vector.shape_cast %112 : vector<128xf32> to vector<1x1x128xf32>
    %114 = vector.broadcast %113 : vector<1x1x128xf32> to vector<8x8x128xf32>
    %115 = arith.mulf %110, %114 : vector<8x8x128xf32>
    %116 = arith.addf %109, %115 : vector<8x8x128xf32>
    %c2 = arith.constant 2 : index
    %c7_67 = arith.constant 7 : index
    %c0_68 = arith.constant 0 : index
    %117 = tpu.strided_load %arg6[%c2, %c7_67, %c0_68] {strides = array<i32: 2, 2, 1>} : memref<18x32x128xf32, #tpu.memory_space<vmem>>, vector<8x8x128xf32>
    %118 = vector.extract_strided_slice %73 {offsets = [6, 0], sizes = [1, 128], strides = [1, 1]} : vector<9x128xf32> to vector<1x128xf32>
    %119 = vector.shape_cast %118 : vector<1x128xf32> to vector<128xf32>
    %120 = vector.shape_cast %119 : vector<128xf32> to vector<1x1x128xf32>
    %121 = vector.broadcast %120 : vector<1x1x128xf32> to vector<8x8x128xf32>
    %122 = arith.mulf %117, %121 : vector<8x8x128xf32>
    %123 = arith.addf %116, %122 : vector<8x8x128xf32>
    %c2_69 = arith.constant 2 : index
    %c8_70 = arith.constant 8 : index
    %c0_71 = arith.constant 0 : index
    %124 = tpu.strided_load %arg6[%c2_69, %c8_70, %c0_71] {strides = array<i32: 2, 2, 1>} : memref<18x32x128xf32, #tpu.memory_space<vmem>>, vector<8x8x128xf32>
    %125 = vector.extract_strided_slice %73 {offsets = [7, 0], sizes = [1, 128], strides = [1, 1]} : vector<9x128xf32> to vector<1x128xf32>
    %126 = vector.shape_cast %125 : vector<1x128xf32> to vector<128xf32>
    %127 = vector.shape_cast %126 : vector<128xf32> to vector<1x1x128xf32>
    %128 = vector.broadcast %127 : vector<1x1x128xf32> to vector<8x8x128xf32>
    %129 = arith.mulf %124, %128 : vector<8x8x128xf32>
    %130 = arith.addf %123, %129 : vector<8x8x128xf32>
    %c2_72 = arith.constant 2 : index
    %c9_73 = arith.constant 9 : index
    %c0_74 = arith.constant 0 : index
    %131 = tpu.strided_load %arg6[%c2_72, %c9_73, %c0_74] {strides = array<i32: 2, 2, 1>} : memref<18x32x128xf32, #tpu.memory_space<vmem>>, vector<8x8x128xf32>
    %132 = vector.extract_strided_slice %73 {offsets = [8, 0], sizes = [1, 128], strides = [1, 1]} : vector<9x128xf32> to vector<1x128xf32>
    %133 = vector.shape_cast %132 : vector<1x128xf32> to vector<128xf32>
    %134 = vector.shape_cast %133 : vector<128xf32> to vector<1x1x128xf32>
    %135 = vector.broadcast %134 : vector<1x1x128xf32> to vector<8x8x128xf32>
    %136 = arith.mulf %131, %135 : vector<8x8x128xf32>
    %137 = arith.addf %130, %136 : vector<8x8x128xf32>
    %cst_75 = arith.constant dense<0.000000e+00> : vector<128xf32>
    %138 = vector.multi_reduction <add>, %137, %cst_75 [0, 1] : vector<8x8x128xf32> to vector<128xf32>
    %139 = vector.shape_cast %138 : vector<128xf32> to vector<1x1x128xf32>
    %cst_76 = arith.constant 6.400000e+01 : f32
    %140 = vector.broadcast %cst_76 : f32 to vector<1x1x128xf32>
    %141 = arith.divf %139, %140 : vector<1x1x128xf32>
    %142 = arith.mulf %137, %137 : vector<8x8x128xf32>
    %cst_77 = arith.constant dense<0.000000e+00> : vector<128xf32>
    %143 = vector.multi_reduction <add>, %142, %cst_77 [0, 1] : vector<8x8x128xf32> to vector<128xf32>
    %144 = vector.shape_cast %143 : vector<128xf32> to vector<1x1x128xf32>
    %cst_78 = arith.constant 6.400000e+01 : f32
    %145 = vector.broadcast %cst_78 : f32 to vector<1x1x128xf32>
    %146 = arith.divf %144, %145 : vector<1x1x128xf32>
    %147 = arith.mulf %141, %141 : vector<1x1x128xf32>
    %148 = arith.subf %146, %147 : vector<1x1x128xf32>
    %cst_79 = arith.constant 0.000000e+00 : f32
    %149 = vector.broadcast %cst_79 : f32 to vector<1x1x128xf32>
    %150 = arith.maximumf %148, %149 : vector<1x1x128xf32>
    %151 = vector.broadcast %141 : vector<1x1x128xf32> to vector<8x8x128xf32>
    %152 = arith.subf %137, %151 : vector<8x8x128xf32>
    %cst_80 = arith.constant 9.99999974E-6 : f32
    %153 = vector.broadcast %cst_80 : f32 to vector<1x1x128xf32>
    %154 = arith.addf %150, %153 : vector<1x1x128xf32>
    %155 = math.rsqrt %154 : vector<1x1x128xf32>
    %156 = vector.broadcast %155 : vector<1x1x128xf32> to vector<8x8x128xf32>
    %157 = arith.mulf %152, %156 : vector<8x8x128xf32>
    %cst_81 = arith.constant 0.000000e+00 : f32
    %158 = vector.broadcast %cst_81 : f32 to vector<8x8x128xf32>
    %159 = arith.maximumf %157, %158 : vector<8x8x128xf32>
    %160 = vector.shape_cast %159 : vector<8x8x128xf32> to vector<64x128xf32>
    %161 = arith.truncf %160 : vector<64x128xf32> to vector<64x128xbf16>
    %c0_82 = arith.constant 0 : index
    %c0_83 = arith.constant 0 : index
    %162 = vector.load %arg4[%c0_82, %c0_83] : memref<128x24xbf16, #tpu.memory_space<vmem>>, vector<128x24xbf16>
    %cst_84 = arith.constant dense<0.000000e+00> : vector<64x24xf32>
    %163 = tpu.matmul %161, %162, %cst_84 {dimension_numbers = #tpu.dot_dimension_numbers<[1], [0], [0], [1], [0, 0, 1, 1], [], []>} : vector<64x128xbf16>, vector<128x24xbf16>, vector<64x24xf32> -> vector<64x24xf32>
    %cst_85 = arith.constant dense<0.000000e+00> : vector<24xf32>
    %164 = vector.multi_reduction <add>, %163, %cst_85 [0] : vector<64x24xf32> to vector<24xf32>
    %165 = vector.shape_cast %164 : vector<24xf32> to vector<1x24xf32>
    %cst_86 = arith.constant 6.400000e+01 : f32
    %166 = vector.broadcast %cst_86 : f32 to vector<1x24xf32>
    %167 = arith.divf %165, %166 : vector<1x24xf32>
    %168 = arith.mulf %163, %163 : vector<64x24xf32>
    %cst_87 = arith.constant dense<0.000000e+00> : vector<24xf32>
    %169 = vector.multi_reduction <add>, %168, %cst_87 [0] : vector<64x24xf32> to vector<24xf32>
    %170 = vector.shape_cast %169 : vector<24xf32> to vector<1x24xf32>
    %cst_88 = arith.constant 6.400000e+01 : f32
    %171 = vector.broadcast %cst_88 : f32 to vector<1x24xf32>
    %172 = arith.divf %170, %171 : vector<1x24xf32>
    %173 = arith.mulf %167, %167 : vector<1x24xf32>
    %174 = arith.subf %172, %173 : vector<1x24xf32>
    %cst_89 = arith.constant 0.000000e+00 : f32
    %175 = vector.broadcast %cst_89 : f32 to vector<1x24xf32>
    %176 = arith.maximumf %174, %175 : vector<1x24xf32>
    %177 = vector.broadcast %167 : vector<1x24xf32> to vector<64x24xf32>
    %178 = arith.subf %163, %177 : vector<64x24xf32>
    %cst_90 = arith.constant 9.99999974E-6 : f32
    %179 = vector.broadcast %cst_90 : f32 to vector<1x24xf32>
    %180 = arith.addf %176, %179 : vector<1x24xf32>
    %181 = math.rsqrt %180 : vector<1x24xf32>
    %182 = vector.broadcast %181 : vector<1x24xf32> to vector<64x24xf32>
    %183 = arith.mulf %178, %182 : vector<64x24xf32>
    %c0_91 = arith.constant 0 : index
    %c0_92 = arith.constant 0 : index
    %c0_93 = arith.constant 0 : index
    %184 = vector.load %arg5[%c0_91, %c0_92, %c0_93] : memref<1x64x24xf32, #tpu.memory_space<vmem>>, vector<1x64x24xf32>
    %185 = vector.shape_cast %184 : vector<1x64x24xf32> to vector<64x24xf32>
    %186 = vector.shape_cast %183 : vector<64x24xf32> to vector<1x64x24xf32>
    tpu.vector_store %arg5[%c0_91, %c0_92, %c0_93], %186 {strides = array<i32>} : memref<1x64x24xf32, #tpu.memory_space<vmem>>, vector<1x64x24xf32>,
    return
  }
  func.func @transform_0(%arg0: i32) -> (i32, i32, i32) {
    %c0_i32 = arith.constant 0 : i32
    %c0_i32_0 = arith.constant 0 : i32
    %c0_i32_1 = arith.constant 0 : i32
    return %arg0, %c0_i32, %c0_i32_0 : i32, i32, i32
  }
  func.func @transform_1(%arg0: i32) -> (i32, i32) {
    %c0_i32 = arith.constant 0 : i32
    %c0_i32_0 = arith.constant 0 : i32
    %c0_i32_1 = arith.constant 0 : i32
    return %c0_i32, %c0_i32_0 : i32, i32
  }
  func.func @transform_2(%arg0: i32) -> (i32, i32) {
    %c0_i32 = arith.constant 0 : i32
    %c0_i32_0 = arith.constant 0 : i32
    %c0_i32_1 = arith.constant 0 : i32
    return %c0_i32, %c0_i32_0 : i32, i32
  }
  func.func @transform_3(%arg0: i32) -> (i32, i32) {
    %c0_i32 = arith.constant 0 : i32
    %c0_i32_0 = arith.constant 0 : i32
    %c0_i32_1 = arith.constant 0 : i32
    return %c0_i32, %c0_i32_0 : i32, i32
  }
  func.func @transform_4(%arg0: i32) -> (i32, i32, i32) {
    %c0_i32 = arith.constant 0 : i32
    %c0_i32_0 = arith.constant 0 : i32
    %c0_i32_1 = arith.constant 0 : i32
    return %arg0, %c0_i32, %c0_i32_0 : i32, i32, i32
  }
}

module attributes {stable_mosaic.version = 11 : i64} {
  func.func @_bottleneck_kernel(%arg0: i32, %arg1: memref<1x64x24xf32, #tpu.memory_space<vmem>>, %arg2: memref<24x256xbf16, #tpu.memory_space<vmem>>, %arg3: memref<9x256xf32, #tpu.memory_space<vmem>>, %arg4: memref<256x24xbf16, #tpu.memory_space<vmem>>, %arg5: memref<1x64x24xf32, #tpu.memory_space<vmem>>, %arg6: memref<10x24x256xf32, #tpu.memory_space<vmem>>) attributes {dimension_semantics = [#tpu.dimension_semantics<parallel>], iteration_bounds = array<i64: 2>, scalar_prefetch = 0 : i64, scratch_operands = 1 : i64, tpu.core_type = #tpu.core_type<tc>, window_params = [{transform_indices = @transform_0, window_bounds = array<i64: 1, 64, 24>}, {pipeline_mode = #tpu.pipeline_mode<synchronous>, transform_indices = @transform_1, window_bounds = array<i64: 24, 256>}, {pipeline_mode = #tpu.pipeline_mode<synchronous>, transform_indices = @transform_2, window_bounds = array<i64: 9, 256>}, {pipeline_mode = #tpu.pipeline_mode<synchronous>, transform_indices = @transform_3, window_bounds = array<i64: 256, 24>}, {transform_indices = @transform_4, window_bounds = array<i64: 1, 64, 24>}]} {
    %cst = arith.constant 0.000000e+00 : f32
    %0 = vector.broadcast %cst : f32 to vector<24x256xf32>
    %c0 = arith.constant 0 : index
    %c0_0 = arith.constant 0 : index
    %c0_1 = arith.constant 0 : index
    %1 = vector.load %arg6[%c0, %c0_0, %c0_1] : memref<10x24x256xf32, #tpu.memory_space<vmem>>, vector<1x24x256xf32>
    %2 = vector.shape_cast %1 : vector<1x24x256xf32> to vector<24x256xf32>
    %3 = vector.shape_cast %0 : vector<24x256xf32> to vector<1x24x256xf32>
    tpu.vector_store %arg6[%c0, %c0_0, %c0_1], %3 {strides = array<i32>} : memref<10x24x256xf32, #tpu.memory_space<vmem>>, vector<1x24x256xf32>,
    %cst_2 = arith.constant 0.000000e+00 : f32
    %4 = vector.broadcast %cst_2 : f32 to vector<24x256xf32>
    %c9 = arith.constant 9 : index
    %c0_3 = arith.constant 0 : index
    %c0_4 = arith.constant 0 : index
    %5 = vector.load %arg6[%c9, %c0_3, %c0_4] : memref<10x24x256xf32, #tpu.memory_space<vmem>>, vector<1x24x256xf32>
    %6 = vector.shape_cast %5 : vector<1x24x256xf32> to vector<24x256xf32>
    %7 = vector.shape_cast %4 : vector<24x256xf32> to vector<1x24x256xf32>
    tpu.vector_store %arg6[%c9, %c0_3, %c0_4], %7 {strides = array<i32>} : memref<10x24x256xf32, #tpu.memory_space<vmem>>, vector<1x24x256xf32>,
    %cst_5 = arith.constant 0.000000e+00 : f32
    %8 = vector.broadcast %cst_5 : f32 to vector<8x8x256xf32>
    %c1 = arith.constant 1 : index
    %c0_6 = arith.constant 0 : index
    %c0_7 = arith.constant 0 : index
    %9 = vector.load %arg6[%c1, %c0_6, %c0_7] : memref<10x24x256xf32, #tpu.memory_space<vmem>>, vector<8x8x256xf32>
    tpu.vector_store %arg6[%c1, %c0_6, %c0_7], %8 {strides = array<i32>} : memref<10x24x256xf32, #tpu.memory_space<vmem>>, vector<8x8x256xf32>,
    %cst_8 = arith.constant 0.000000e+00 : f32
    %10 = vector.broadcast %cst_8 : f32 to vector<8x8x256xf32>
    %c1_9 = arith.constant 1 : index
    %c16 = arith.constant 16 : index
    %c0_10 = arith.constant 0 : index
    %11 = vector.load %arg6[%c1_9, %c16, %c0_10] : memref<10x24x256xf32, #tpu.memory_space<vmem>>, vector<8x8x256xf32>
    tpu.vector_store %arg6[%c1_9, %c16, %c0_10], %10 {strides = array<i32>} : memref<10x24x256xf32, #tpu.memory_space<vmem>>, vector<8x8x256xf32>,
    %c0_11 = arith.constant 0 : index
    %c0_12 = arith.constant 0 : index
    %c0_13 = arith.constant 0 : index
    %12 = vector.load %arg1[%c0_11, %c0_12, %c0_13] : memref<1x64x24xf32, #tpu.memory_space<vmem>>, vector<1x64x24xf32>
    %13 = vector.shape_cast %12 : vector<1x64x24xf32> to vector<64x24xf32>
    %c0_14 = arith.constant 0 : index
    %c0_15 = arith.constant 0 : index
    %14 = vector.load %arg2[%c0_14, %c0_15] : memref<24x256xbf16, #tpu.memory_space<vmem>>, vector<24x256xbf16>
    %cst_16 = arith.constant 0.000000e+00 : f32
    %15 = vector.broadcast %cst_16 : f32 to vector<1x256xf32>
    %cst_17 = arith.constant 0.000000e+00 : f32
    %16 = vector.broadcast %cst_17 : f32 to vector<1x256xf32>
    %17 = arith.truncf %13 : vector<64x24xf32> to vector<64x24xbf16>
    %cst_18 = arith.constant dense<0.000000e+00> : vector<64x256xf32>
    %18 = tpu.matmul %17, %14, %cst_18 {dimension_numbers = #tpu.dot_dimension_numbers<[1], [0], [0], [1], [0, 0, 1, 1], [], []>} : vector<64x24xbf16>, vector<24x256xbf16>, vector<64x256xf32> -> vector<64x256xf32>
    %cst_19 = arith.constant dense<0.000000e+00> : vector<256xf32>
    %19 = vector.multi_reduction <add>, %18, %cst_19 [0] : vector<64x256xf32> to vector<256xf32>
    %20 = vector.shape_cast %19 : vector<256xf32> to vector<1x256xf32>
    %21 = arith.addf %15, %20 : vector<1x256xf32>
    %22 = arith.mulf %18, %18 : vector<64x256xf32>
    %cst_20 = arith.constant dense<0.000000e+00> : vector<256xf32>
    %23 = vector.multi_reduction <add>, %22, %cst_20 [0] : vector<64x256xf32> to vector<256xf32>
    %24 = vector.shape_cast %23 : vector<256xf32> to vector<1x256xf32>
    %25 = arith.addf %16, %24 : vector<1x256xf32>
    %26 = vector.shape_cast %18 : vector<64x256xf32> to vector<8x8x256xf32>
    %c1_21 = arith.constant 1 : index
    %c8 = arith.constant 8 : index
    %c0_22 = arith.constant 0 : index
    %27 = vector.load %arg6[%c1_21, %c8, %c0_22] : memref<10x24x256xf32, #tpu.memory_space<vmem>>, vector<8x8x256xf32>
    tpu.vector_store %arg6[%c1_21, %c8, %c0_22], %26 {strides = array<i32>} : memref<10x24x256xf32, #tpu.memory_space<vmem>>, vector<8x8x256xf32>,
    %cst_23 = arith.constant 6.400000e+01 : f32
    %28 = vector.broadcast %cst_23 : f32 to vector<1x256xf32>
    %29 = arith.divf %21, %28 : vector<1x256xf32>
    %cst_24 = arith.constant 6.400000e+01 : f32
    %30 = vector.broadcast %cst_24 : f32 to vector<1x256xf32>
    %31 = arith.divf %25, %30 : vector<1x256xf32>
    %32 = arith.mulf %29, %29 : vector<1x256xf32>
    %33 = arith.subf %31, %32 : vector<1x256xf32>
    %cst_25 = arith.constant 0.000000e+00 : f32
    %34 = vector.broadcast %cst_25 : f32 to vector<1x256xf32>
    %35 = arith.maximumf %33, %34 : vector<1x256xf32>
    %cst_26 = arith.constant 9.99999974E-6 : f32
    %36 = vector.broadcast %cst_26 : f32 to vector<1x256xf32>
    %37 = arith.addf %35, %36 : vector<1x256xf32>
    %38 = math.rsqrt %37 : vector<1x256xf32>
    %39 = vector.shape_cast %38 : vector<1x256xf32> to vector<1x1x256xf32>
    %cst_27 = arith.constant 0.000000e+00 : f32
    %40 = vector.broadcast %cst_27 : f32 to vector<1x256xf32>
    %41 = arith.subf %40, %29 : vector<1x256xf32>
    %42 = vector.shape_cast %41 : vector<1x256xf32> to vector<1x1x256xf32>
    %43 = arith.mulf %42, %39 : vector<1x1x256xf32>
    %c1_28 = arith.constant 1 : index
    %c8_29 = arith.constant 8 : index
    %c0_30 = arith.constant 0 : index
    %44 = vector.load %arg6[%c1_28, %c8_29, %c0_30] : memref<10x24x256xf32, #tpu.memory_space<vmem>>, vector<8x8x256xf32>
    %45 = vector.broadcast %39 : vector<1x1x256xf32> to vector<8x8x256xf32>
    %46 = arith.mulf %44, %45 : vector<8x8x256xf32>
    %47 = vector.broadcast %43 : vector<1x1x256xf32> to vector<8x8x256xf32>
    %48 = arith.addf %46, %47 : vector<8x8x256xf32>
    %cst_31 = arith.constant 0.000000e+00 : f32
    %49 = vector.broadcast %cst_31 : f32 to vector<8x8x256xf32>
    %50 = arith.maximumf %48, %49 : vector<8x8x256xf32>
    %c1_32 = arith.constant 1 : index
    %c8_33 = arith.constant 8 : index
    %c0_34 = arith.constant 0 : index
    %51 = vector.load %arg6[%c1_32, %c8_33, %c0_34] : memref<10x24x256xf32, #tpu.memory_space<vmem>>, vector<8x8x256xf32>
    tpu.vector_store %arg6[%c1_32, %c8_33, %c0_34], %50 {strides = array<i32>} : memref<10x24x256xf32, #tpu.memory_space<vmem>>, vector<8x8x256xf32>,
    %c0_35 = arith.constant 0 : index
    %c0_36 = arith.constant 0 : index
    %52 = vector.load %arg3[%c0_35, %c0_36] : memref<9x256xf32, #tpu.memory_space<vmem>>, vector<9x256xf32>
    %cst_37 = arith.constant 0.000000e+00 : f32
    %53 = vector.broadcast %cst_37 : f32 to vector<8x8x256xf32>
    %c0_38 = arith.constant 0 : index
    %c7 = arith.constant 7 : index
    %c0_39 = arith.constant 0 : index
    %54 = vector.load %arg6[%c0_38, %c7, %c0_39] : memref<10x24x256xf32, #tpu.memory_space<vmem>>, vector<8x8x256xf32>
    %55 = vector.extract_strided_slice %52 {offsets = [0, 0], sizes = [1, 256], strides = [1, 1]} : vector<9x256xf32> to vector<1x256xf32>
    %56 = vector.shape_cast %55 : vector<1x256xf32> to vector<256xf32>
    %57 = vector.shape_cast %56 : vector<256xf32> to vector<1x1x256xf32>
    %58 = vector.broadcast %57 : vector<1x1x256xf32> to vector<8x8x256xf32>
    %59 = arith.mulf %54, %58 : vector<8x8x256xf32>
    %60 = arith.addf %53, %59 : vector<8x8x256xf32>
    %c0_40 = arith.constant 0 : index
    %c8_41 = arith.constant 8 : index
    %c0_42 = arith.constant 0 : index
    %61 = vector.load %arg6[%c0_40, %c8_41, %c0_42] : memref<10x24x256xf32, #tpu.memory_space<vmem>>, vector<8x8x256xf32>
    %62 = vector.extract_strided_slice %52 {offsets = [1, 0], sizes = [1, 256], strides = [1, 1]} : vector<9x256xf32> to vector<1x256xf32>
    %63 = vector.shape_cast %62 : vector<1x256xf32> to vector<256xf32>
    %64 = vector.shape_cast %63 : vector<256xf32> to vector<1x1x256xf32>
    %65 = vector.broadcast %64 : vector<1x1x256xf32> to vector<8x8x256xf32>
    %66 = arith.mulf %61, %65 : vector<8x8x256xf32>
    %67 = arith.addf %60, %66 : vector<8x8x256xf32>
    %c0_43 = arith.constant 0 : index
    %c9_44 = arith.constant 9 : index
    %c0_45 = arith.constant 0 : index
    %68 = vector.load %arg6[%c0_43, %c9_44, %c0_45] : memref<10x24x256xf32, #tpu.memory_space<vmem>>, vector<8x8x256xf32>
    %69 = vector.extract_strided_slice %52 {offsets = [2, 0], sizes = [1, 256], strides = [1, 1]} : vector<9x256xf32> to vector<1x256xf32>
    %70 = vector.shape_cast %69 : vector<1x256xf32> to vector<256xf32>
    %71 = vector.shape_cast %70 : vector<256xf32> to vector<1x1x256xf32>
    %72 = vector.broadcast %71 : vector<1x1x256xf32> to vector<8x8x256xf32>
    %73 = arith.mulf %68, %72 : vector<8x8x256xf32>
    %74 = arith.addf %67, %73 : vector<8x8x256xf32>
    %c1_46 = arith.constant 1 : index
    %c7_47 = arith.constant 7 : index
    %c0_48 = arith.constant 0 : index
    %75 = vector.load %arg6[%c1_46, %c7_47, %c0_48] : memref<10x24x256xf32, #tpu.memory_space<vmem>>, vector<8x8x256xf32>
    %76 = vector.extract_strided_slice %52 {offsets = [3, 0], sizes = [1, 256], strides = [1, 1]} : vector<9x256xf32> to vector<1x256xf32>
    %77 = vector.shape_cast %76 : vector<1x256xf32> to vector<256xf32>
    %78 = vector.shape_cast %77 : vector<256xf32> to vector<1x1x256xf32>
    %79 = vector.broadcast %78 : vector<1x1x256xf32> to vector<8x8x256xf32>
    %80 = arith.mulf %75, %79 : vector<8x8x256xf32>
    %81 = arith.addf %74, %80 : vector<8x8x256xf32>
    %c1_49 = arith.constant 1 : index
    %c8_50 = arith.constant 8 : index
    %c0_51 = arith.constant 0 : index
    %82 = vector.load %arg6[%c1_49, %c8_50, %c0_51] : memref<10x24x256xf32, #tpu.memory_space<vmem>>, vector<8x8x256xf32>
    %83 = vector.extract_strided_slice %52 {offsets = [4, 0], sizes = [1, 256], strides = [1, 1]} : vector<9x256xf32> to vector<1x256xf32>
    %84 = vector.shape_cast %83 : vector<1x256xf32> to vector<256xf32>
    %85 = vector.shape_cast %84 : vector<256xf32> to vector<1x1x256xf32>
    %86 = vector.broadcast %85 : vector<1x1x256xf32> to vector<8x8x256xf32>
    %87 = arith.mulf %82, %86 : vector<8x8x256xf32>
    %88 = arith.addf %81, %87 : vector<8x8x256xf32>
    %c1_52 = arith.constant 1 : index
    %c9_53 = arith.constant 9 : index
    %c0_54 = arith.constant 0 : index
    %89 = vector.load %arg6[%c1_52, %c9_53, %c0_54] : memref<10x24x256xf32, #tpu.memory_space<vmem>>, vector<8x8x256xf32>
    %90 = vector.extract_strided_slice %52 {offsets = [5, 0], sizes = [1, 256], strides = [1, 1]} : vector<9x256xf32> to vector<1x256xf32>
    %91 = vector.shape_cast %90 : vector<1x256xf32> to vector<256xf32>
    %92 = vector.shape_cast %91 : vector<256xf32> to vector<1x1x256xf32>
    %93 = vector.broadcast %92 : vector<1x1x256xf32> to vector<8x8x256xf32>
    %94 = arith.mulf %89, %93 : vector<8x8x256xf32>
    %95 = arith.addf %88, %94 : vector<8x8x256xf32>
    %c2 = arith.constant 2 : index
    %c7_55 = arith.constant 7 : index
    %c0_56 = arith.constant 0 : index
    %96 = vector.load %arg6[%c2, %c7_55, %c0_56] : memref<10x24x256xf32, #tpu.memory_space<vmem>>, vector<8x8x256xf32>
    %97 = vector.extract_strided_slice %52 {offsets = [6, 0], sizes = [1, 256], strides = [1, 1]} : vector<9x256xf32> to vector<1x256xf32>
    %98 = vector.shape_cast %97 : vector<1x256xf32> to vector<256xf32>
    %99 = vector.shape_cast %98 : vector<256xf32> to vector<1x1x256xf32>
    %100 = vector.broadcast %99 : vector<1x1x256xf32> to vector<8x8x256xf32>
    %101 = arith.mulf %96, %100 : vector<8x8x256xf32>
    %102 = arith.addf %95, %101 : vector<8x8x256xf32>
    %c2_57 = arith.constant 2 : index
    %c8_58 = arith.constant 8 : index
    %c0_59 = arith.constant 0 : index
    %103 = vector.load %arg6[%c2_57, %c8_58, %c0_59] : memref<10x24x256xf32, #tpu.memory_space<vmem>>, vector<8x8x256xf32>
    %104 = vector.extract_strided_slice %52 {offsets = [7, 0], sizes = [1, 256], strides = [1, 1]} : vector<9x256xf32> to vector<1x256xf32>
    %105 = vector.shape_cast %104 : vector<1x256xf32> to vector<256xf32>
    %106 = vector.shape_cast %105 : vector<256xf32> to vector<1x1x256xf32>
    %107 = vector.broadcast %106 : vector<1x1x256xf32> to vector<8x8x256xf32>
    %108 = arith.mulf %103, %107 : vector<8x8x256xf32>
    %109 = arith.addf %102, %108 : vector<8x8x256xf32>
    %c2_60 = arith.constant 2 : index
    %c9_61 = arith.constant 9 : index
    %c0_62 = arith.constant 0 : index
    %110 = vector.load %arg6[%c2_60, %c9_61, %c0_62] : memref<10x24x256xf32, #tpu.memory_space<vmem>>, vector<8x8x256xf32>
    %111 = vector.extract_strided_slice %52 {offsets = [8, 0], sizes = [1, 256], strides = [1, 1]} : vector<9x256xf32> to vector<1x256xf32>
    %112 = vector.shape_cast %111 : vector<1x256xf32> to vector<256xf32>
    %113 = vector.shape_cast %112 : vector<256xf32> to vector<1x1x256xf32>
    %114 = vector.broadcast %113 : vector<1x1x256xf32> to vector<8x8x256xf32>
    %115 = arith.mulf %110, %114 : vector<8x8x256xf32>
    %116 = arith.addf %109, %115 : vector<8x8x256xf32>
    %cst_63 = arith.constant dense<0.000000e+00> : vector<256xf32>
    %117 = vector.multi_reduction <add>, %116, %cst_63 [0, 1] : vector<8x8x256xf32> to vector<256xf32>
    %118 = vector.shape_cast %117 : vector<256xf32> to vector<1x1x256xf32>
    %cst_64 = arith.constant 6.400000e+01 : f32
    %119 = vector.broadcast %cst_64 : f32 to vector<1x1x256xf32>
    %120 = arith.divf %118, %119 : vector<1x1x256xf32>
    %121 = arith.mulf %116, %116 : vector<8x8x256xf32>
    %cst_65 = arith.constant dense<0.000000e+00> : vector<256xf32>
    %122 = vector.multi_reduction <add>, %121, %cst_65 [0, 1] : vector<8x8x256xf32> to vector<256xf32>
    %123 = vector.shape_cast %122 : vector<256xf32> to vector<1x1x256xf32>
    %cst_66 = arith.constant 6.400000e+01 : f32
    %124 = vector.broadcast %cst_66 : f32 to vector<1x1x256xf32>
    %125 = arith.divf %123, %124 : vector<1x1x256xf32>
    %126 = arith.mulf %120, %120 : vector<1x1x256xf32>
    %127 = arith.subf %125, %126 : vector<1x1x256xf32>
    %cst_67 = arith.constant 0.000000e+00 : f32
    %128 = vector.broadcast %cst_67 : f32 to vector<1x1x256xf32>
    %129 = arith.maximumf %127, %128 : vector<1x1x256xf32>
    %130 = vector.broadcast %120 : vector<1x1x256xf32> to vector<8x8x256xf32>
    %131 = arith.subf %116, %130 : vector<8x8x256xf32>
    %cst_68 = arith.constant 9.99999974E-6 : f32
    %132 = vector.broadcast %cst_68 : f32 to vector<1x1x256xf32>
    %133 = arith.addf %129, %132 : vector<1x1x256xf32>
    %134 = math.rsqrt %133 : vector<1x1x256xf32>
    %135 = vector.broadcast %134 : vector<1x1x256xf32> to vector<8x8x256xf32>
    %136 = arith.mulf %131, %135 : vector<8x8x256xf32>
    %cst_69 = arith.constant 0.000000e+00 : f32
    %137 = vector.broadcast %cst_69 : f32 to vector<8x8x256xf32>
    %138 = arith.maximumf %136, %137 : vector<8x8x256xf32>
    %139 = vector.shape_cast %138 : vector<8x8x256xf32> to vector<64x256xf32>
    %140 = arith.truncf %139 : vector<64x256xf32> to vector<64x256xbf16>
    %c0_70 = arith.constant 0 : index
    %c0_71 = arith.constant 0 : index
    %141 = vector.load %arg4[%c0_70, %c0_71] : memref<256x24xbf16, #tpu.memory_space<vmem>>, vector<256x24xbf16>
    %cst_72 = arith.constant dense<0.000000e+00> : vector<64x24xf32>
    %142 = tpu.matmul %140, %141, %cst_72 {dimension_numbers = #tpu.dot_dimension_numbers<[1], [0], [0], [1], [0, 0, 1, 1], [], []>} : vector<64x256xbf16>, vector<256x24xbf16>, vector<64x24xf32> -> vector<64x24xf32>
    %cst_73 = arith.constant dense<0.000000e+00> : vector<24xf32>
    %143 = vector.multi_reduction <add>, %142, %cst_73 [0] : vector<64x24xf32> to vector<24xf32>
    %144 = vector.shape_cast %143 : vector<24xf32> to vector<1x24xf32>
    %cst_74 = arith.constant 6.400000e+01 : f32
    %145 = vector.broadcast %cst_74 : f32 to vector<1x24xf32>
    %146 = arith.divf %144, %145 : vector<1x24xf32>
    %147 = arith.mulf %142, %142 : vector<64x24xf32>
    %cst_75 = arith.constant dense<0.000000e+00> : vector<24xf32>
    %148 = vector.multi_reduction <add>, %147, %cst_75 [0] : vector<64x24xf32> to vector<24xf32>
    %149 = vector.shape_cast %148 : vector<24xf32> to vector<1x24xf32>
    %cst_76 = arith.constant 6.400000e+01 : f32
    %150 = vector.broadcast %cst_76 : f32 to vector<1x24xf32>
    %151 = arith.divf %149, %150 : vector<1x24xf32>
    %152 = arith.mulf %146, %146 : vector<1x24xf32>
    %153 = arith.subf %151, %152 : vector<1x24xf32>
    %cst_77 = arith.constant 0.000000e+00 : f32
    %154 = vector.broadcast %cst_77 : f32 to vector<1x24xf32>
    %155 = arith.maximumf %153, %154 : vector<1x24xf32>
    %156 = vector.broadcast %146 : vector<1x24xf32> to vector<64x24xf32>
    %157 = arith.subf %142, %156 : vector<64x24xf32>
    %cst_78 = arith.constant 9.99999974E-6 : f32
    %158 = vector.broadcast %cst_78 : f32 to vector<1x24xf32>
    %159 = arith.addf %155, %158 : vector<1x24xf32>
    %160 = math.rsqrt %159 : vector<1x24xf32>
    %161 = vector.broadcast %160 : vector<1x24xf32> to vector<64x24xf32>
    %162 = arith.mulf %157, %161 : vector<64x24xf32>
    %163 = arith.addf %162, %13 : vector<64x24xf32>
    %c0_79 = arith.constant 0 : index
    %c0_80 = arith.constant 0 : index
    %c0_81 = arith.constant 0 : index
    %164 = vector.load %arg5[%c0_79, %c0_80, %c0_81] : memref<1x64x24xf32, #tpu.memory_space<vmem>>, vector<1x64x24xf32>
    %165 = vector.shape_cast %164 : vector<1x64x24xf32> to vector<64x24xf32>
    %166 = vector.shape_cast %163 : vector<64x24xf32> to vector<1x64x24xf32>
    tpu.vector_store %arg5[%c0_79, %c0_80, %c0_81], %166 {strides = array<i32>} : memref<1x64x24xf32, #tpu.memory_space<vmem>>, vector<1x64x24xf32>,
    return
  }
  func.func @transform_0(%arg0: i32) -> (i32, i32, i32) {
    %c0_i32 = arith.constant 0 : i32
    %c0_i32_0 = arith.constant 0 : i32
    %c0_i32_1 = arith.constant 0 : i32
    return %arg0, %c0_i32, %c0_i32_0 : i32, i32, i32
  }
  func.func @transform_1(%arg0: i32) -> (i32, i32) {
    %c0_i32 = arith.constant 0 : i32
    %c0_i32_0 = arith.constant 0 : i32
    %c0_i32_1 = arith.constant 0 : i32
    return %c0_i32, %c0_i32_0 : i32, i32
  }
  func.func @transform_2(%arg0: i32) -> (i32, i32) {
    %c0_i32 = arith.constant 0 : i32
    %c0_i32_0 = arith.constant 0 : i32
    %c0_i32_1 = arith.constant 0 : i32
    return %c0_i32, %c0_i32_0 : i32, i32
  }
  func.func @transform_3(%arg0: i32) -> (i32, i32) {
    %c0_i32 = arith.constant 0 : i32
    %c0_i32_0 = arith.constant 0 : i32
    %c0_i32_1 = arith.constant 0 : i32
    return %c0_i32, %c0_i32_0 : i32, i32
  }
  func.func @transform_4(%arg0: i32) -> (i32, i32, i32) {
    %c0_i32 = arith.constant 0 : i32
    %c0_i32_0 = arith.constant 0 : i32
    %c0_i32_1 = arith.constant 0 : i32
    return %arg0, %c0_i32, %c0_i32_0 : i32, i32, i32
  }
}

</mosaic_0001>

<bundles_post_ra>
// kernel: two_blocks.2
= control target key start
LH: loop header
LB: loop body
LE: loop exit
PB: predicated region body
PF: predicated region fallthrough
CT: control target
= control target key end

     0   :  { %s1777_s15 = smov 0   ;;  %s2360_s0 = inlined_call_operand.vmem [shape: f32[2,256,16], index: 0, kind: input, shape index: {}]   ;;  %s2361_s1 = inlined_call_operand.vmem [shape: bf16[16,128], index: 1, kind: input, shape index: {}]   ;;  %s2362_s2 = inlined_call_operand.vmem [shape: f32[9,128], index: 2, kind: input, shape index: {}]   ;;  %s2363_s3 = inlined_call_operand.vmem [shape: bf16[128,24], index: 3, kind: input, shape index: {}]   ;;  %s2364_s4 = inlined_call_operand.vmem [shape: f32[2,64,24], index: 4, kind: output, shape index: {}]  }
   0x1 LB: > { %s1574_s16 = sadd.s32 4294967295, %s1749_s15   ;;  %p1578_p0 = scmp.ge.s32.totalorder %s1749_s15, 1  ;;  %s1749_s15 = sphi %s1777_s15, %s14_s15  }
   0x2   : > { %p162_p1 = scmp.lt.s32.totalorder %s1749_s15, 3 }
   0x4   : > { %p163_p2 = pnand %p1578_p0, %p162_p1 }
   0x5   : > { %p188_p3 = scmp.lt.s32.totalorder (!%p163_p2), %s1574_s16, 1 }
   0x6   : > { %166 = sbr.rel (%p163_p2) target bundleno = 665 (0x299), region = 36 }
   0xb   : > { %v1728_v0 = vld [vmem:[%s2361_s1] sm:$0xff]   ;;  %s2366_s16 = smov (!%p188_p3, %s1574_s16), 1  ;;  %vm289_vm0 = vcmask 130048   ;;  %v1751_v49 = vmov 0.0   ;;  %v1729_v50 = vld [vmem:[%s2363_s3 + $0x38] sm:$0xff]   ;;  %v1730_v51 = vld [vmem:[%s2363_s3 + $0x30] sm:$0xff]  }
   0xc   : > { %1643 = vmatprep.subr.bf16.mxu0 %v1728_v0  ;;  %1661 = vmatprep.subr.bf16.mxu1 %v1728_v0  ;;  %s1611_s19 = sshll.u32 %s2366_s16, 8  ;;  %218 = vst [vmem:[#allocation2 + $0x140] sm:$0xff] %v1751_v49  ;;  %199 = vst [vmem:[#allocation2] sm:$0xff] %v1751_v49  ;;  %v1731_v52 = vld [vmem:[%s2363_s3 + $0x28] sm:$0xff]   ;;  %v1732_v53 = vld [vmem:[%s2363_s3 + $0x20] sm:$0xff]   ;;  %vm1389_vm1 = vcmask 195584  }
   0xd   : > { %1644 = vmatpush3.bf16.msra.mxu0 %v1728_v0  ;;  %1662 = vmatpush3.bf16.msra.mxu1 %v1728_v0  ;;  %s1794_s22 = scalar_lea.vmem %s2360_s0, %s1611_s19  ;;  %200 = vst [vmem:[#allocation2 + $0x8] sm:$0xff] %v1751_v49  ;;  %201 = vst [vmem:[#allocation2 + $0x10] sm:$0xff] %v1751_v49  ;;  %v1733_v56 = vld [vmem:[%s2363_s3 + $0x18] sm:$0xff]   ;;  %v1734_v61 = vld [vmem:[%s2363_s3 + $0x10] sm:$0xff]   ;;  %s1612_s19 = sshll.u32 %s2366_s16, 6 }
   0xe   : > { %v241_v1 = vld [vmem:[%s1794_s22] sm:$0xff]  ;;  %v242_v2 = vld [vmem:[%s1794_s22 + $0x8] sm:$0xff]  ;;  %v243_v6 = vld [vmem:[%s1794_s22 + $0x10] sm:$0xff]  ;;  %209 = vst [vmem:[#allocation2 + $0x20] sm:$0xff] %v1751_v49  ;;  %1679 = vmatprep.subr.bf16.mxu0 %v1729_v50  ;;  %1703 = vmatprep.subr.bf16.mxu1 %v1729_v50 }
   0xf   : > { %v257_v3 = vld [vmem:[%s1794_s22 + $0x80] sm:$0xff]  ;;  %v275_v4 = vpack.c.bf16 %v242_v2, %v241_v1  ;;  %v258_v5 = vld [vmem:[%s1794_s22 + $0x88] sm:$0xff]  ;;  %v244_v7 = vld [vmem:[%s1794_s22 + $0x18] sm:$0xff]  ;;  %210 = vst [vmem:[#allocation2 + $0x40] sm:$0xff] %v1751_v49 }
  0x10   : > { %v487_v8 = vpack.c.bf16 %v258_v5, %v257_v3  ;;  %v276_v9 = vpack.c.bf16 %v244_v7, %v243_v6  ;;  %v259_v10 = vld [vmem:[%s1794_s22 + $0x90] sm:$0xff]  ;;  %v260_v11 = vld [vmem:[%s1794_s22 + $0x98] sm:$0xff]  ;;  %v245_v12 = vld [vmem:[%s1794_s22 + $0x20] sm:$0xff]  ;;  %211 = vst [vmem:[#allocation2 + $0x60] sm:$0xff] %v1751_v49 }
  0x11   : > { %1645 = vmatprep.mubr.msk.bf16.mxu0 %vm289_vm0, %v275_v4  ;;  %v488_v13 = vpack.c.bf16 %v260_v11, %v259_v10  ;;  %v246_v14 = vld [vmem:[%s1794_s22 + $0x28] sm:$0xff]  ;;  %v261_v15 = vld [vmem:[%s1794_s22 + $0xa0] sm:$0xff]  ;;  %v247_v19 = vld [vmem:[%s1794_s22 + $0x30] sm:$0xff]  ;;  %212 = vst [vmem:[#allocation2 + $0x80] sm:$0xff] %v1751_v49 }
  0x12   : > { %v262_v16 = vld [vmem:[%s1794_s22 + $0xa8] sm:$0xff]  ;;  %1663 = vmatprep.mubr.msk.bf16.mxu1 %vm289_vm0, %v487_v8  ;;  %1646 = vmatmul.mubr.msk.bf16.vlgmr.msra.gmra.mxu0 %vm289_vm0, %v276_v9  ;;  %v277_v17 = vpack.c.bf16 %v246_v14, %v245_v12  ;;  %v248_v20 = vld [vmem:[%s1794_s22 + $0x38] sm:$0xff]  ;;  %v263_v21 = vld [vmem:[%s1794_s22 + $0xb0] sm:$0xff]  ;;  %213 = vst [vmem:[#allocation2 + $0xa0] sm:$0xff] %v1751_v49 }
  0x13   : > { %v489_v18 = vpack.c.bf16 %v262_v16, %v261_v15  ;;  %1664 = vmatmul.mubr.msk.bf16.vlgmr.msra.gmra.mxu1 %vm289_vm0, %v488_v13  ;;  %v264_v22 = vld [vmem:[%s1794_s22 + $0xb8] sm:$0xff]  ;;  %v249_v23 = vld [vmem:[%s1794_s22 + $0x40] sm:$0xff]  ;;  %v250_v24 = vld [vmem:[%s1794_s22 + $0x48] sm:$0xff]  ;;  %v278_v27 = vpack.c.bf16 %v248_v20, %v247_v19  ;;  %214 = vst [vmem:[#allocation2 + $0xc0] sm:$0xff] %v1751_v49  ;;  %1680 = vmatpush3.bf16.msra.mxu0 %v1729_v50 }
  0x14   : > { %1649 = vmatprep.mubr.msk.bf16.mxu0 %vm289_vm0, %v277_v17  ;;  %v265_v25 = vld [vmem:[%s1794_s22 + $0xc0] sm:$0xff]  ;;  %v266_v26 = vld [vmem:[%s1794_s22 + $0xc8] sm:$0xff]  ;;  %v490_v28 = vpack.c.bf16 %v264_v22, %v263_v21  ;;  %v279_v29 = vpack.c.bf16 %v250_v24, %v249_v23  ;;  %v251_v31 = vld [vmem:[%s1794_s22 + $0x50] sm:$0xff]  ;;  %215 = vst [vmem:[#allocation2 + $0xe0] sm:$0xff] %v1751_v49  ;;  %1711 = vmatpush3.bf16.msra.mxu1 %v1729_v50 }
  0x15   : > { %1667 = vmatprep.mubr.msk.bf16.mxu1 %vm289_vm0, %v489_v18  ;;  %v491_v30 = vpack.c.bf16 %v266_v26, %v265_v25  ;;  %v252_v32 = vld [vmem:[%s1794_s22 + $0x58] sm:$0xff]  ;;  %v267_v33 = vld [vmem:[%s1794_s22 + $0xd0] sm:$0xff]  ;;  %v253_v35 = vld [vmem:[%s1794_s22 + $0x60] sm:$0xff]  ;;  %216 = vst [vmem:[#allocation2 + $0x100] sm:$0xff] %v1751_v49  ;;  %1681 = vmatprep.subr.bf16.mxu0 %v1730_v51 }
  0x16   : > { %v268_v34 = vld [vmem:[%s1794_s22 + $0xd8] sm:$0xff]  ;;  %v254_v36 = vld [vmem:[%s1794_s22 + $0x68] sm:$0xff]  ;;  %v269_v37 = vld [vmem:[%s1794_s22 + $0xe0] sm:$0xff]  ;;  %v280_v39 = vpack.c.bf16 %v252_v32, %v251_v31  ;;  %217 = vst [vmem:[#allocation2 + $0x120] sm:$0xff] %v1751_v49  ;;  %1704 = vmatprep.subr.bf16.mxu1 %v1730_v51 }
  0x17   : > { %v270_v38 = vld [vmem:[%s1794_s22 + $0xe8] sm:$0xff]  ;;  %v492_v40 = vpack.c.bf16 %v268_v34, %v267_v33  ;;  %v281_v41 = vpack.c.bf16 %v254_v36, %v253_v35  ;;  %v255_v43 = vld [vmem:[%s1794_s22 + $0x70] sm:$0xff]  ;;  %v256_v44 = vld [vmem:[%s1794_s22 + $0x78] sm:$0xff]  ;;  %219 = vst [vmem:[#allocation2 + $0x160] sm:$0xff] %v1751_v49  ;;  %1682 = vmatpush3.bf16.msra.mxu0 %v1730_v51 }
  0x18   : > { %v493_v42 = vpack.c.bf16 %v270_v38, %v269_v37  ;;  %v271_v45 = vld [vmem:[%s1794_s22 + $0xf0] sm:$0xff]  ;;  %v272_v46 = vld [vmem:[%s1794_s22 + $0xf8] sm:$0xff]  ;;  %v282_v47 = vpack.c.bf16 %v256_v44, %v255_v43  ;;  %220 = vst [vmem:[#allocation2 + $0x180] sm:$0xff] %v1751_v49  ;;  %221 = vst [vmem:[#allocation2 + $0x1a0] sm:$0xff] %v1751_v49  ;;  %1712 = vmatpush3.bf16.msra.mxu1 %v1730_v51  ;;  %1683 = vmatprep.subr.bf16.mxu0 %v1731_v52  ;;  %s197_s22 = scalar_lea.vmem %s2364_s4, %s1612_s19 }
  0x19   : > { %v494_v48 = vpack.c.bf16 %v272_v46, %v271_v45  ;;  %222 = vst [vmem:[#allocation2 + $0x1c0] sm:$0xff] %v1751_v49  ;;  %223 = vst [vmem:[#allocation2 + $0x1e0] sm:$0xff] %v1751_v49  ;;  %1705 = vmatprep.subr.bf16.mxu1 %v1731_v52  ;;  %v1735_v11 = vld [vmem:[%s2363_s3 + $0x8] sm:$0xff]  }
  0x1a   : > { %1650 = vmatmul.mubr.msk.bf16.gmra.mxu0 %vm289_vm0, %v278_v27  ;;  %224 = vst [vmem:[#allocation2 + $0x200] sm:$0xff] %v1751_v49 }
  0x1b   : > { %1668 = vmatmul.mubr.msk.bf16.gmra.mxu1 %vm289_vm0, %v490_v28  ;;  %1653 = vmatprep.mubr.msk.bf16.mxu0 %vm289_vm0, %v279_v29  ;;  %v1736_v28 = vld [vmem:[%s2363_s3] sm:$0xff]  }
  0x1c   : > { %1671 = vmatprep.mubr.msk.bf16.mxu1 %vm289_vm0, %v491_v30  ;;  %1684 = vmatpush3.bf16.msra.mxu0 %v1731_v52 }
  0x1d   : > { %1713 = vmatpush3.bf16.msra.mxu1 %v1731_v52  ;;  %1685 = vmatprep.subr.bf16.mxu0 %v1732_v53 }
  0x1e   : > { %1706 = vmatprep.subr.bf16.mxu1 %v1732_v53 }
  0x20   : > { %1686 = vmatpush3.bf16.msra.mxu0 %v1732_v53 }
  0x21   : > { %1714 = vmatpush3.bf16.msra.mxu1 %v1732_v53  ;;  %1687 = vmatprep.subr.bf16.mxu0 %v1733_v56 }
  0x22   : > { %1654 = vmatmul.mubr.msk.bf16.gmra.mxu0 %vm289_vm0, %v280_v39  ;;  %1707 = vmatprep.subr.bf16.mxu1 %v1733_v56 }
  0x23   : > { %1672 = vmatmul.mubr.msk.bf16.gmra.mxu1 %vm289_vm0, %v492_v40  ;;  %1657 = vmatprep.mubr.msk.bf16.mxu0 %vm289_vm0, %v281_v41 }
  0x24   : > { %1675 = vmatprep.mubr.msk.bf16.mxu1 %vm289_vm0, %v493_v42  ;;  %1688 = vmatpush3.bf16.msra.mxu0 %v1733_v56 }
  0x25   : > { %1715 = vmatpush3.bf16.msra.mxu1 %v1733_v56  ;;  %1689 = vmatprep.subr.bf16.mxu0 %v1734_v61 }
  0x26   : > { %1708 = vmatprep.subr.bf16.mxu1 %v1734_v61 }
  0x28   : > { %1690 = vmatpush3.bf16.msra.mxu0 %v1734_v61 }
  0x29   : > { %1716 = vmatpush3.bf16.msra.mxu1 %v1734_v61  ;;  %1691 = vmatprep.subr.bf16.mxu0 %v1735_v11 }
  0x2a   : > { %1658 = vmatmul.mubr.msk.bf16.gmra.mxu0 %vm289_vm0, %v282_v47  ;;  %1709 = vmatprep.subr.bf16.mxu1 %v1735_v11 }
  0x2b   : > { %1676 = vmatmul.mubr.msk.bf16.gmra.mxu1 %vm289_vm0, %v494_v48 }
  0x2c   : > { %1692 = vmatpush3.bf16.msra.mxu0 %v1735_v11 }
  0x2d   : > { %1717 = vmatpush3.bf16.msra.mxu1 %v1735_v11  ;;  %1693 = vmatprep.subr.bf16.mxu0 %v1736_v28 }
  0x2e   : > { %1710 = vmatprep.subr.bf16.mxu1 %v1736_v28 }
  0x30   : > { %1694 = vmatpush3.bf16.msra.mxu0 %v1736_v28 }
  0x31   : > { %1718 = vmatpush3.bf16.msra.mxu1 %v1736_v28 }
  0xd2   : > { %v1856_v54 = vpop.f32.mrf.mxu0 }
  0xd3   : > { %v1858_v55 = vpop.f32.mrf.mxu1  ;;  %v435_v7 = vmul.f32 %v1856_v54, %v1856_v54 }
  0xd4   : > { %v1863_v57 = vpop.f32.mrf.mxu0  ;;  %v640_v12 = vmul.f32 %v1858_v55, %v1858_v55 }
  0xd5   : > { %v1865_v58 = vpop.f32.mrf.mxu1  ;;  %v433_v63 = vmul.f32 %v1863_v57, %v1863_v57 }
  0xd6   : > { %v1867_v59 = vpop.f32.mrf.mxu0  ;;  %v638_v3 = vmul.f32 %v1865_v58, %v1865_v58 }
  0xd7   : > { %v1869_v60 = vpop.f32.mrf.mxu1  ;;  %v436_v16 = vmul.f32 %v1867_v59, %v1867_v59 }
  0xd8   : > { %v1874_v62 = vpop.f32.mrf.mxu0  ;;  %v641_v20 = vmul.f32 %v1869_v60, %v1869_v60 }
  0xd9   : > { %v411_v0 = vadd.f32 %v1874_v62, %v1863_v57  ;;  %v434_v1 = vmul.f32 %v1874_v62, %v1874_v62  ;;  %v1882_v2 = vpop.f32.mrf.mxu1 }
  0xda   : > { %v616_v4 = vadd.f32 %v1882_v2, %v1865_v58  ;;  %v639_v5 = vmul.f32 %v1882_v2, %v1882_v2  ;;  %v1890_v6 = vpop.f32.mrf.mxu0 }
  0xdb   : > { %v412_v8 = vadd.f32 %v1856_v54, %v411_v0  ;;  %v449_v9 = vadd.f32 %v434_v1, %v433_v63  ;;  %v1895_v10 = vpop.f32.mrf.mxu1  ;;  %v439_v41 = vmul.f32 %v1890_v6, %v1890_v6 }
  0xdc   : > { %v617_v13 = vadd.f32 %v1858_v55, %v616_v4  ;;  %v654_v14 = vadd.f32 %v639_v5, %v638_v3  ;;  %v1903_v15 = vpop.f32.mrf.mxu0  ;;  %v644_v45 = vmul.f32 %v1895_v10, %v1895_v10 }
  0xdd   : > { %v450_v17 = vadd.f32 %v449_v9, %v435_v7  ;;  %v413_v18 = vadd.f32 %v1867_v59, %v412_v8  ;;  %v1908_v19 = vpop.f32.mrf.mxu1  ;;  %v437_v25 = vmul.f32 %v1903_v15, %v1903_v15 }
  0xde   : > { %v655_v21 = vadd.f32 %v654_v14, %v640_v12  ;;  %v618_v22 = vadd.f32 %v1869_v60, %v617_v13  ;;  %v1913_v23 = vpop.f32.mrf.mxu0  ;;  %v642_v30 = vmul.f32 %v1908_v19, %v1908_v19 }
  0xdf   : > { %v414_v24 = vadd.f32 %v413_v18, %v1903_v15  ;;  %v451_v26 = vadd.f32 %v450_v17, %v436_v16  ;;  %v1918_v27 = vpop.f32.mrf.mxu1  ;;  %v440_v49 = vmul.f32 %v1913_v23, %v1913_v23 }
  0xe0   : > { %v619_v29 = vadd.f32 %v618_v22, %v1908_v19  ;;  %v656_v31 = vadd.f32 %v655_v21, %v641_v20  ;;  %v1926_v32 = vpop.f32.mrf.mxu0  ;;  %v645_v53 = vmul.f32 %v1918_v27, %v1918_v27 }
  0xe1   : > { %v452_v33 = vadd.f32 %v451_v26, %v437_v25  ;;  %v415_v34 = vadd.f32 %v414_v24, %v1926_v32  ;;  %v438_v35 = vmul.f32 %v1926_v32, %v1926_v32  ;;  %v1931_v36 = vpop.f32.mrf.mxu1 }
  0xe2   : > { %v657_v37 = vadd.f32 %v656_v31, %v642_v30  ;;  %v620_v38 = vadd.f32 %v619_v29, %v1931_v36  ;;  %v643_v39 = vmul.f32 %v1931_v36, %v1931_v36  ;;  %v1936_v40 = vpop.f32.mrf.mxu0 }
  0xe3   : > { %v416_v42 = vadd.f32 %v1890_v6, %v415_v34  ;;  %v453_v43 = vadd.f32 %v452_v33, %v438_v35  ;;  %v1941_v44 = vpop.f32.mrf.mxu1  ;;  %v443_v21 = vmul.f32 %v1936_v40, %v1936_v40 }
  0xe4   : > { %v621_v46 = vadd.f32 %v1895_v10, %v620_v38  ;;  %v658_v47 = vadd.f32 %v657_v37, %v643_v39  ;;  %v1946_v48 = vpop.f32.mrf.mxu0  ;;  %v648_v26 = vmul.f32 %v1941_v44, %v1941_v44 }
  0xe5   : > { %v454_v50 = vadd.f32 %v453_v43, %v439_v41  ;;  %v417_v51 = vadd.f32 %v1913_v23, %v416_v42  ;;  %v1951_v52 = vpop.f32.mrf.mxu1  ;;  %v441_v1 = vmul.f32 %v1946_v48, %v1946_v48 }
  0xe6   : > { %v659_v56 = vadd.f32 %v658_v47, %v644_v45  ;;  %v622_v61 = vadd.f32 %v1918_v27, %v621_v46  ;;  %v1956_v63 = vpop.f32.mrf.mxu0  ;;  %v646_v7 = vmul.f32 %v1951_v52, %v1951_v52 }
  0xe7   : > { %v418_v0 = vadd.f32 %v417_v51, %v1946_v48  ;;  %v455_v3 = vadd.f32 %v454_v50, %v440_v49  ;;  %v1961_v4 = vpop.f32.mrf.mxu1  ;;  %v444_v31 = vmul.f32 %v1956_v63, %v1956_v63 }
  0xe8   : > { %v623_v5 = vadd.f32 %v622_v61, %v1951_v52  ;;  %v660_v8 = vadd.f32 %v659_v56, %v645_v53  ;;  %v1966_v9 = vpop.f32.mrf.mxu0  ;;  %v649_v37 = vmul.f32 %v1961_v4, %v1961_v4 }
  0xe9   : > { %v456_v11 = vadd.f32 %v455_v3, %v441_v1  ;;  %v419_v12 = vadd.f32 %v418_v0, %v1966_v9  ;;  %v442_v13 = vmul.f32 %v1966_v9, %v1966_v9  ;;  %v1971_v14 = vpop.f32.mrf.mxu1 }
  0xea   : > { %v661_v16 = vadd.f32 %v660_v8, %v646_v7  ;;  %v624_v17 = vadd.f32 %v623_v5, %v1971_v14  ;;  %v647_v18 = vmul.f32 %v1971_v14, %v1971_v14  ;;  %v1976_v20 = vpop.f32.mrf.mxu0 }
  0xeb   : > { %v420_v22 = vadd.f32 %v1936_v40, %v419_v12  ;;  %v457_v24 = vadd.f32 %v456_v11, %v442_v13  ;;  %v1981_v25 = vpop.f32.mrf.mxu1  ;;  %v447_v7 = vmul.f32 %v1976_v20, %v1976_v20 }
  0xec   : > { %v625_v28 = vadd.f32 %v1941_v44, %v624_v17  ;;  %v662_v29 = vadd.f32 %v661_v16, %v647_v18  ;;  %v1986_v30 = vpop.f32.mrf.mxu0  ;;  %v652_v12 = vmul.f32 %v1981_v25, %v1981_v25 }
  0xed   : > { %v458_v33 = vadd.f32 %v457_v24, %v443_v21  ;;  %v421_v34 = vadd.f32 %v1956_v63, %v420_v22  ;;  %v1991_v35 = vpop.f32.mrf.mxu1  ;;  %v445_v43 = vmul.f32 %v1986_v30, %v1986_v30 }
  0xee   : > { %v663_v38 = vadd.f32 %v662_v29, %v648_v26  ;;  %v626_v39 = vadd.f32 %v1961_v4, %v625_v28  ;;  %v1996_v41 = vpop.f32.mrf.mxu0  ;;  %v650_v49 = vmul.f32 %v1991_v35, %v1991_v35 }
  0xef   : > { %v422_v42 = vadd.f32 %v421_v34, %v1986_v30  ;;  %v459_v45 = vadd.f32 %v458_v33, %v444_v31  ;;  %v2001_v46 = vpop.f32.mrf.mxu1  ;;  %v448_v17 = vmul.f32 %v1996_v41, %v1996_v41 }
  0xf0   : > { %v627_v47 = vadd.f32 %v626_v39, %v1991_v35  ;;  %v664_v50 = vadd.f32 %v663_v38, %v649_v37  ;;  %v2006_v51 = vpop.f32.mrf.mxu0  ;;  %v653_v22 = vmul.f32 %v2001_v46, %v2001_v46 }
  0xf1   : > { %v460_v53 = vadd.f32 %v459_v45, %v445_v43  ;;  %v423_v56 = vadd.f32 %v422_v42, %v2006_v51  ;;  %v446_v61 = vmul.f32 %v2006_v51, %v2006_v51  ;;  %v2011_v0 = vpop.f32.mrf.mxu1 }
  0xf2   : > { %v665_v1 = vadd.f32 %v664_v50, %v650_v49  ;;  %v628_v3 = vadd.f32 %v627_v47, %v2011_v0  ;;  %v651_v5 = vmul.f32 %v2011_v0, %v2011_v0 }
  0xf3   : > { %v424_v8 = vadd.f32 %v1976_v20, %v423_v56  ;;  %v461_v11 = vadd.f32 %v460_v53, %v446_v61 }
  0xf4   : > { %v629_v13 = vadd.f32 %v1981_v25, %v628_v3  ;;  %v666_v16 = vadd.f32 %v665_v1, %v651_v5 }
  0xf5   : > { %v425_v18 = vadd.f32 %v1996_v41, %v424_v8  ;;  %v462_v21 = vadd.f32 %v461_v11, %v447_v7 }
  0xf6   : > { %v630_v24 = vadd.f32 %v2001_v46, %v629_v13  ;;  %v667_v26 = vadd.f32 %v666_v16, %v652_v12 }
  0xf7   : > { %v426_v28 = vrot.slane %v425_v18, 4  ;;  %v463_v29 = vadd.f32 %v462_v21, %v448_v17 }
  0xf8   : > { %v631_v31 = vrot.slane %v630_v24, 4  ;;  %v668_v33 = vadd.f32 %v667_v26, %v653_v22 }
  0xf9   : > { %v427_v34 = vadd.f32 %v426_v28, %v425_v18  ;;  %v464_v37 = vrot.slane %v463_v29, 4  ;;  %v881_v28 = vlaneseq }
  0xfa   : > { %v632_v38 = vadd.f32 %v631_v31, %v630_v24  ;;  %v669_v39 = vrot.slane %v668_v33, 4 }
  0xfb   : > { %v428_v42 = vrot.slane %v427_v34, 2  ;;  %v465_v43 = vadd.f32 %v464_v37, %v463_v29 }
  0xfc   : > { %v633_v45 = vrot.slane %v632_v38, 2  ;;  %v670_v47 = vadd.f32 %v669_v39, %v668_v33  ;;  %v2028_v33 = vshrl.u32 %v881_v28, 7 }
  0xfd   : > { %v429_v49 = vadd.f32 %v428_v42, %v427_v34  ;;  %v466_v50 = vrot.slane %v465_v43, 2 }
  0xfe   : > { %v634_v53 = vadd.f32 %v633_v45, %v632_v38  ;;  %v671_v56 = vrot.slane %v670_v47, 2  ;;  %v883_v34 = vsub.s32 0, %v2028_v33  ;;  %v919_v37 = vsub.s32 1, %v2028_v33  ;;  %v2035_v38 = vld [vmem:[%s2362_s2] sm:$0xff] }
  0xff   : > { %v430_v61 = vrot.slane %v429_v49, 1  ;;  %v467_v1 = vadd.f32 %v466_v50, %v465_v43  ;;  %v955_v43 = vsub.s32 2, %v2028_v33  ;;  %v866_v45 = vld [vmem:[#allocation2 + $0x7] ss:$2 sm:$0xff] }
 0x100   : > { %v635_v3 = vrot.slane %v634_v53, 1  ;;  %v672_v5 = vadd.f32 %v671_v56, %v670_v47  ;;  %v2038_v39 = vrot.slane %v2035_v38, %v883_v34  ;;  %v2041_v42 = vrot.slane %v2035_v38, %v919_v37  ;;  %v902_v47 = vld [vmem:[#allocation2 + $0x8] ss:$2 sm:$0xff] }
 0x101   : > { %v431_v7 = vadd.f32 %v430_v61, %v429_v49  ;;  %v468_v8 = vrot.slane %v467_v1, 1  ;;  %v991_v49 = vsub.s32 3, %v2028_v33  ;;  %v2048_v56 = vrot.slane %v2035_v38, %v955_v43 }
 0x102   : > { %v636_v11 = vadd.f32 %v635_v3, %v634_v53  ;;  %v673_v12 = vrot.slane %v672_v5, 1  ;;  %v885_v50 = vmul.f32 %v2038_v39, %v866_v45  ;;  %v921_v53 = vmul.f32 %v2041_v42, %v902_v47 }
 0x103   : > { %v469_v13 = vadd.f32 %v468_v8, %v467_v1  ;;  %v2051_v3 = vrot.slane %v2035_v38, %v991_v49 }
 0x104   : > { %v637_v16 = vadd.f32 %v636_v11, %v431_v7  ;;  %v674_v17 = vadd.f32 %v673_v12, %v672_v5  ;;  %v1027_v5 = vsub.s32 4, %v2028_v33  ;;  %v938_v7 = vld [vmem:[#allocation2 + $0x9] ss:$2 sm:$0xff] }
 0x106   : > { %v675_v18 = vadd.f32 %v674_v17, %v469_v13  ;;  %v694_v21 = vmul.f32 0.00390625, %v637_v16  ;;  %v1063_v16 = vsub.s32 5, %v2028_v33  ;;  %v1100_v17 = vsub.s32 6, %v2028_v33 }
 0x108   : > { %v695_v22 = vmul.f32 0.00390625, %v675_v18  ;;  %v696_v24 = vmul.f32 %v694_v21, %v694_v21  ;;  %v701_v61 = vsub.f32 0.0, %v694_v21  ;;  %v2062_v21 = vadd.f32 %v921_v53, %v885_v50 }
 0x10a   : > { %v697_v26 = vsub.f32 %v695_v22, %v696_v24 }
 0x10c   : > { %v698_v29 = vmax.f32 %v697_v26, 0.0 }
 0x10e   : > { %v699_v31 = vadd.f32 1e-05, %v698_v29  ;;  %v1136_v29 = vsub.s32 7, %v2028_v33 }
 0x110   : > { %1737 = vrsqrt.f32 %v699_v31 }
 0x11d   : > { %v1738_v1 = vpop.eup %1737 }
 0x11e   : > { %v2054_v8 = vmul.f32 %v1738_v1, %v701_v61  ;;  %v809_v11 = vmul.f32 %v1738_v1, %v1941_v44  ;;  %v810_v12 = vmul.f32 %v1738_v1, %v1961_v4  ;;  %v811_v13 = vmul.f32 %v1738_v1, %v1991_v35 }
 0x11f   : > { %v812_v18 = vmul.f32 %v1738_v1, %v2011_v0  ;;  %v2068_v44 = vmul.f32 %v2048_v56, %v938_v7  ;;  %v719_v35 = vmul.f32 %v1738_v1, %v1863_v57  ;;  %v720_v28 = vmul.f32 %v1738_v1, %v1874_v62 }
 0x120   : > { %v825_v22 = vadd.f32 %v809_v11, %v2054_v8  ;;  %v826_v24 = vadd.f32 %v810_v12, %v2054_v8  ;;  %v827_v26 = vadd.f32 %v811_v13, %v2054_v8  ;;  %v721_v37 = vmul.f32 %v1738_v1, %v1856_v54 }
 0x121   : > { %v828_v4 = vadd.f32 %v812_v18, %v2054_v8  ;;  %v722_v45 = vmul.f32 %v1738_v1, %v1867_v59  ;;  %v723_v47 = vmul.f32 %v1738_v1, %v1903_v15  ;;  %v724_v49 = vmul.f32 %v1738_v1, %v1926_v32 }
 0x122   : > { %v841_v0 = vmax.f32 %v825_v22, 0.0  ;;  %v842_v31 = vmax.f32 %v826_v24, 0.0  ;;  %v843_v34 = vmax.f32 %v827_v26, 0.0  ;;  %v725_v57 = vmul.f32 %v1738_v1, %v1890_v6 }
 0x123   : > { %v844_v43 = vmax.f32 %v828_v4, 0.0  ;;  %v726_v62 = vmul.f32 %v1738_v1, %v1913_v23  ;;  %v727_v50 = vmul.f32 %v1738_v1, %v1946_v48  ;;  %v728_v53 = vmul.f32 %v1738_v1, %v1966_v9 }
 0x124   : > { %857 = vst [vmem:[#allocation2 + $0x1c8] sm:$0xff] %v841_v0  ;;  %858 = vst [vmem:[#allocation2 + $0x1d0] sm:$0xff] %v842_v31  ;;  %v729_v54 = vmul.f32 %v1738_v1, %v1936_v40  ;;  %v730_v59 = vmul.f32 %v1738_v1, %v1956_v63  ;;  %v731_v15 = vmul.f32 %v1738_v1, %v1986_v30 }
 0x125   : > { %859 = vst [vmem:[#allocation2 + $0x1e8] sm:$0xff] %v843_v34  ;;  %860 = vst [vmem:[#allocation2 + $0x1f0] sm:$0xff] %v844_v43  ;;  %v732_v32 = vmul.f32 %v1738_v1, %v2006_v51  ;;  %v733_v61 = vmul.f32 %v1738_v1, %v1976_v20  ;;  %v734_v7 = vmul.f32 %v1738_v1, %v1996_v41 }
 0x126   : > { %v799_v6 = vmul.f32 %v1738_v1, %v1865_v58  ;;  %v800_v23 = vmul.f32 %v1738_v1, %v1882_v2  ;;  %v2091_v48 = vmul.f32 %v1738_v1, %v1858_v55  ;;  %v2094_v9 = vmul.f32 %v1738_v1, %v1869_v60 }
 0x127   : > { %v2097_v40 = vmul.f32 %v1738_v1, %v1908_v19  ;;  %v2100_v63 = vmul.f32 %v1738_v1, %v1931_v36  ;;  %v2103_v20 = vmul.f32 %v1738_v1, %v1895_v10  ;;  %v2106_v30 = vmul.f32 %v1738_v1, %v1918_v27 }
 0x128   : > { %v2109_v58 = vmul.f32 %v1738_v1, %v1951_v52  ;;  %v2112_v55 = vmul.f32 %v1738_v1, %v1971_v14  ;;  %v2115_v60 = vmul.f32 %v1738_v1, %v1981_v25  ;;  %v2118_v2 = vmul.f32 %v1738_v1, %v2001_v46 }
 0x129   : > { %v735_v19 = vadd.f32 %v719_v35, %v2054_v8  ;;  %v736_v10 = vadd.f32 %v720_v28, %v2054_v8  ;;  %v737_v36 = vadd.f32 %v721_v37, %v2054_v8  ;;  %v738_v27 = vadd.f32 %v722_v45, %v2054_v8 }
 0x12a   : > { %v739_v52 = vadd.f32 %v723_v47, %v2054_v8  ;;  %v740_v41 = vadd.f32 %v724_v49, %v2054_v8  ;;  %v741_v25 = vadd.f32 %v725_v57, %v2054_v8  ;;  %v742_v11 = vadd.f32 %v726_v62, %v2054_v8 }
 0x12b   : > { %v880_v14 = vld [vmem:[#allocation2 + $0x1c7] ss:$2 sm:$0xff]  ;;  %v916_v51 = vld [vmem:[#allocation2 + $0x1c8] ss:$2 sm:$0xff]  ;;  %v743_v46 = vadd.f32 %v727_v50, %v2054_v8  ;;  %v744_v1 = vadd.f32 %v728_v53, %v2054_v8  ;;  %v745_v18 = vadd.f32 %v729_v54, %v2054_v8  ;;  %v746_v22 = vadd.f32 %v730_v59, %v2054_v8 }
 0x12c   : > { %v892_v12 = vmul.f32 %v2038_v39, %v880_v14  ;;  %v928_v13 = vmul.f32 %v2041_v42, %v916_v51  ;;  %v747_v24 = vadd.f32 %v731_v15, %v2054_v8  ;;  %v748_v26 = vadd.f32 %v732_v32, %v2054_v8  ;;  %v952_v37 = vld [vmem:[#allocation2 + $0x1c9] ss:$2 sm:$0xff] }
 0x12d   : > { %v749_v4 = vadd.f32 %v733_v61, %v2054_v8  ;;  %v751_v35 = vmax.f32 %v735_v19, 0.0  ;;  %v750_v28 = vadd.f32 %v734_v7, %v2054_v8  ;;  %v752_v0 = vmax.f32 %v736_v10, 0.0 }
 0x12e   : > { %v753_v31 = vmax.f32 %v737_v36, 0.0  ;;  %v754_v34 = vmax.f32 %v738_v27, 0.0  ;;  %v755_v43 = vmax.f32 %v739_v52, 0.0  ;;  %v756_v45 = vmax.f32 %v740_v41, 0.0 }
 0x12f   : > { %v757_v47 = vmax.f32 %v741_v25, 0.0  ;;  %v758_v49 = vmax.f32 %v742_v11, 0.0  ;;  %767 = vst [vmem:[#allocation2 + $0x28] sm:$0xff] %v751_v35  ;;  %v936_v57 = vadd.f32 %v928_v13, %v892_v12  ;;  %v759_v62 = vmax.f32 %v743_v46, 0.0  ;;  %768 = vst [vmem:[#allocation2 + $0x30] sm:$0xff] %v752_v0 }
 0x130   : > { %v760_v50 = vmax.f32 %v744_v1, 0.0  ;;  %v761_v53 = vmax.f32 %v745_v18, 0.0  ;;  %769 = vst [vmem:[#allocation2 + $0x48] sm:$0xff] %v753_v31  ;;  %770 = vst [vmem:[#allocation2 + $0x50] sm:$0xff] %v754_v34  ;;  %v762_v54 = vmax.f32 %v746_v22, 0.0  ;;  %v763_v59 = vmax.f32 %v747_v24, 0.0 }
 0x131   : > { %v764_v15 = vmax.f32 %v748_v26, 0.0  ;;  %v765_v32 = vmax.f32 %v749_v4, 0.0  ;;  %771 = vst [vmem:[#allocation2 + $0x68] sm:$0xff] %v755_v43  ;;  %772 = vst [vmem:[#allocation2 + $0x70] sm:$0xff] %v756_v45  ;;  %v964_v61 = vmul.f32 %v2048_v56, %v952_v37  ;;  %v766_v7 = vmax.f32 %v750_v28, 0.0 }
 0x132   : > { %773 = vst [vmem:[#allocation2 + $0x88] sm:$0xff] %v757_v47  ;;  %774 = vst [vmem:[#allocation2 + $0x90] sm:$0xff] %v758_v49  ;;  %v815_v19 = vadd.f32 %v799_v6, %v2054_v8  ;;  %v816_v10 = vadd.f32 %v800_v23, %v2054_v8  ;;  %v817_v36 = vadd.f32 %v2091_v48, %v2054_v8  ;;  %v988_v25 = vld [vmem:[#allocation2 + $0x1e7] ss:$2 sm:$0xff]  ;;  %v1024_v4 = vld [vmem:[#allocation2 + $0x1e8] ss:$2 sm:$0xff] }
 0x133   : > { %775 = vst [vmem:[#allocation2 + $0xa8] sm:$0xff] %v759_v62  ;;  %776 = vst [vmem:[#allocation2 + $0xb0] sm:$0xff] %v760_v50  ;;  %v818_v27 = vadd.f32 %v2094_v9, %v2054_v8  ;;  %v819_v52 = vadd.f32 %v2097_v40, %v2054_v8  ;;  %v820_v41 = vadd.f32 %v2100_v63, %v2054_v8 }
 0x134   : > { %777 = vst [vmem:[#allocation2 + $0xc8] sm:$0xff] %v761_v53  ;;  %778 = vst [vmem:[#allocation2 + $0xd0] sm:$0xff] %v762_v54  ;;  %v972_v14 = vadd.f32 %v964_v61, %v936_v57  ;;  %v821_v6 = vadd.f32 %v2103_v20, %v2054_v8  ;;  %v822_v23 = vadd.f32 %v2106_v30, %v2054_v8  ;;  %v831_v51 = vmax.f32 %v815_v19, 0.0 }
 0x135   : > { %779 = vst [vmem:[#allocation2 + $0xe8] sm:$0xff] %v763_v59  ;;  %780 = vst [vmem:[#allocation2 + $0xf0] sm:$0xff] %v764_v15  ;;  %v823_v48 = vadd.f32 %v2109_v58, %v2054_v8  ;;  %v824_v9 = vadd.f32 %v2112_v55, %v2054_v8  ;;  %v829_v40 = vadd.f32 %v2115_v60, %v2054_v8  ;;  %v832_v11 = vmax.f32 %v816_v10, 0.0 }
 0x136   : > { %781 = vst [vmem:[#allocation2 + $0x108] sm:$0xff] %v765_v32  ;;  %782 = vst [vmem:[#allocation2 + $0x110] sm:$0xff] %v766_v7  ;;  %v830_v63 = vadd.f32 %v2118_v2, %v2054_v8  ;;  %v833_v46 = vmax.f32 %v817_v36, 0.0  ;;  %v834_v20 = vmax.f32 %v818_v27, 0.0  ;;  %v835_v1 = vmax.f32 %v819_v52, 0.0 }
 0x137   : > { %v836_v12 = vmax.f32 %v820_v41, 0.0  ;;  %v837_v30 = vmax.f32 %v821_v6, 0.0  ;;  %v838_v13 = vmax.f32 %v822_v23, 0.0  ;;  %v839_v18 = vmax.f32 %v823_v48, 0.0  ;;  %847 = vst [vmem:[#allocation2 + $0x128] sm:$0xff] %v831_v51  ;;  %848 = vst [vmem:[#allocation2 + $0x130] sm:$0xff] %v832_v11 }
 0x138   : > { %v868_v58 = vld [vmem:[#allocation2 + $0x47] ss:$2 sm:$0xff]  ;;  %v840_v22 = vmax.f32 %v824_v9, 0.0  ;;  %v845_v55 = vmax.f32 %v829_v40, 0.0  ;;  %v846_v24 = vmax.f32 %v830_v63, 0.0  ;;  %849 = vst [vmem:[#allocation2 + $0x148] sm:$0xff] %v833_v46  ;;  %v2165_v2 = vrot.slane %v2035_v38, %v1027_v5 }
 0x139   : > { %850 = vst [vmem:[#allocation2 + $0x150] sm:$0xff] %v834_v20  ;;  %851 = vst [vmem:[#allocation2 + $0x168] sm:$0xff] %v835_v1  ;;  %v870_v8 = vld [vmem:[#allocation2 + $0x87] ss:$2 sm:$0xff]  ;;  %v886_v60 = vmul.f32 %v2038_v39, %v868_v58  ;;  %v1000_v26 = vmul.f32 %v2051_v3, %v988_v25  ;;  %v906_v28 = vld [vmem:[#allocation2 + $0x88] ss:$2 sm:$0xff]  ;;  %v2172_v31 = vrot.slane %v2035_v38, %v1063_v16 }
 0x13a   : > { %852 = vst [vmem:[#allocation2 + $0x170] sm:$0xff] %v836_v12  ;;  %853 = vst [vmem:[#allocation2 + $0x188] sm:$0xff] %v837_v30  ;;  %v887_v35 = vmul.f32 %v2038_v39, %v870_v8  ;;  %v904_v0 = vld [vmem:[#allocation2 + $0x48] ss:$2 sm:$0xff]  ;;  %v2177_v5 = vrot.slane %v2035_v38, %v1100_v17  ;;  %v923_v43 = vmul.f32 %v2041_v42, %v906_v28  ;;  %v942_v45 = vld [vmem:[#allocation2 + $0x89] ss:$2 sm:$0xff] }
 0x13b   : > { %854 = vst [vmem:[#allocation2 + $0x190] sm:$0xff] %v838_v13  ;;  %855 = vst [vmem:[#allocation2 + $0x1a8] sm:$0xff] %v839_v18  ;;  %v872_v34 = vld [vmem:[#allocation2 + $0xc7] ss:$2 sm:$0xff]  ;;  %v908_v37 = vld [vmem:[#allocation2 + $0xc8] ss:$2 sm:$0xff]  ;;  %v922_v47 = vmul.f32 %v2041_v42, %v904_v0  ;;  %v1008_v49 = vadd.f32 %v1000_v26, %v972_v14  ;;  %v965_v17 = vadd.f32 %v2068_v44, %v2062_v21 }
 0x13c   : > { %856 = vst [vmem:[#allocation2 + $0x1b0] sm:$0xff] %v840_v22  ;;  %861 = vst [vmem:[#allocation2 + $0x208] sm:$0xff] %v845_v55  ;;  %v888_v16 = vmul.f32 %v2038_v39, %v872_v34  ;;  %v924_v50 = vmul.f32 %v2041_v42, %v908_v37  ;;  %v944_v53 = vld [vmem:[#allocation2 + $0xc9] ss:$2 sm:$0xff]  ;;  %v2190_v19 = vrot.slane %v2035_v38, %v1136_v29  ;;  %v1012_v28 = vld [vmem:[#allocation2 + $0x68] ss:$2 sm:$0xff] }
 0x13d   : > { %862 = vst [vmem:[#allocation2 + $0x210] sm:$0xff] %v846_v24  ;;  %v874_v57 = vld [vmem:[#allocation2 + $0x107] ss:$2 sm:$0xff]  ;;  %v910_v62 = vld [vmem:[#allocation2 + $0x108] ss:$2 sm:$0xff]  ;;  %v930_v32 = vadd.f32 %v922_v47, %v886_v60  ;;  %v1036_v10 = vmul.f32 %v2165_v2, %v1024_v4  ;;  %v931_v36 = vadd.f32 %v923_v43, %v887_v35  ;;  %v960_v41 = vmul.f32 %v2048_v56, %v944_v53 }
 0x13e   : > { %v889_v54 = vmul.f32 %v2038_v39, %v874_v57  ;;  %v925_v59 = vmul.f32 %v2041_v42, %v910_v62  ;;  %v946_v15 = vld [vmem:[#allocation2 + $0x109] ss:$2 sm:$0xff]  ;;  %v932_v27 = vadd.f32 %v924_v50, %v888_v16  ;;  %v959_v6 = vmul.f32 %v2048_v56, %v942_v45  ;;  %v1010_v35 = vld [vmem:[#allocation2 + $0x28] ss:$2 sm:$0xff] }
 0x13f   : > { %v940_v61 = vld [vmem:[#allocation2 + $0x49] ss:$2 sm:$0xff]  ;;  %v2197_v33 = vadd.f32 %v1036_v10, %v1008_v49  ;;  %v961_v40 = vmul.f32 %v2048_v56, %v946_v15  ;;  %v1014_v43 = vld [vmem:[#allocation2 + $0xa8] ss:$2 sm:$0xff] }
 0x140   : > { %v974_v7 = vld [vmem:[#allocation2 + $0x27] ss:$2 sm:$0xff]  ;;  %v958_v52 = vmul.f32 %v2048_v56, %v940_v61  ;;  %v933_v44 = vadd.f32 %v925_v59, %v889_v54  ;;  %v912_v29 = vld [vmem:[#allocation2 + $0x148] ss:$2 sm:$0xff]  ;;  %v967_v12 = vadd.f32 %v959_v6, %v931_v36  ;;  %v968_v30 = vadd.f32 %v960_v41, %v932_v27 }
 0x141   : > { %v976_v21 = vld [vmem:[#allocation2 + $0x67] ss:$2 sm:$0xff]  ;;  %v993_v48 = vmul.f32 %v2051_v3, %v974_v7  ;;  %v926_v20 = vmul.f32 %v2041_v42, %v912_v29  ;;  %v1016_v45 = vld [vmem:[#allocation2 + $0xe8] ss:$2 sm:$0xff]  ;;  %v1029_v54 = vmul.f32 %v2165_v2, %v1010_v35  ;;  %v1030_v59 = vmul.f32 %v2165_v2, %v1012_v28 }
 0x142   : > { %v980_v14 = vld [vmem:[#allocation2 + $0xe7] ss:$2 sm:$0xff]  ;;  %v966_v63 = vadd.f32 %v958_v52, %v930_v32  ;;  %v994_v51 = vmul.f32 %v2051_v3, %v976_v21  ;;  %v914_v46 = vld [vmem:[#allocation2 + $0x188] ss:$2 sm:$0xff]  ;;  %v969_v55 = vadd.f32 %v961_v40, %v933_v44  ;;  %v1031_v61 = vmul.f32 %v2165_v2, %v1014_v43 }
 0x143   : > { %v978_v23 = vld [vmem:[#allocation2 + $0xa7] ss:$2 sm:$0xff]  ;;  %v927_v18 = vmul.f32 %v2041_v42, %v914_v46  ;;  %v996_v26 = vmul.f32 %v2051_v3, %v980_v14  ;;  %v1001_v4 = vadd.f32 %v993_v48, %v965_v17  ;;  %v1018_v57 = vld [vmem:[#allocation2 + $0x128] ss:$2 sm:$0xff]  ;;  %v1032_v7 = vmul.f32 %v2165_v2, %v1016_v45 }
 0x144   : > { %v876_v38 = vld [vmem:[#allocation2 + $0x147] ss:$2 sm:$0xff]  ;;  %v995_v24 = vmul.f32 %v2051_v3, %v978_v23  ;;  %v1002_v42 = vadd.f32 %v994_v51, %v966_v63  ;;  %v1020_v16 = vld [vmem:[#allocation2 + $0x168] ss:$2 sm:$0xff]  ;;  %v1033_v44 = vmul.f32 %v2165_v2, %v1018_v57 }
 0x145   : > { %v948_v9 = vld [vmem:[#allocation2 + $0x149] ss:$2 sm:$0xff]  ;;  %v890_v11 = vmul.f32 %v2038_v39, %v876_v38  ;;  %v1004_v50 = vadd.f32 %v996_v26, %v968_v30  ;;  %v1022_v52 = vld [vmem:[#allocation2 + $0x1a8] ss:$2 sm:$0xff]  ;;  %v1034_v21 = vmul.f32 %v2165_v2, %v1020_v16  ;;  %v1037_v41 = vadd.f32 %v1029_v54, %v1001_v4 }
 0x146   : > { %v878_v25 = vld [vmem:[#allocation2 + $0x187] ss:$2 sm:$0xff]  ;;  %v962_v60 = vmul.f32 %v2048_v56, %v948_v9  ;;  %v1003_v62 = vadd.f32 %v995_v24, %v967_v12  ;;  %v1038_v14 = vadd.f32 %v1030_v59, %v1002_v42  ;;  %v1121_v43 = vld [vmem:[#allocation2 + $0x88] ss:$2 sm:$0xff] }
 0x147   : > { %v950_v1 = vld [vmem:[#allocation2 + $0x189] ss:$2 sm:$0xff]  ;;  %v891_v13 = vmul.f32 %v2038_v39, %v878_v25  ;;  %v934_v8 = vadd.f32 %v926_v20, %v890_v11  ;;  %v1040_v38 = vadd.f32 %v1032_v7, %v1004_v50  ;;  %v1123_v45 = vld [vmem:[#allocation2 + $0xc8] ss:$2 sm:$0xff]  ;;  %v1139_v7 = vmul.f32 %v2190_v19, %v1121_v43 }
 0x148   : > { %v982_v58 = vld [vmem:[#allocation2 + $0x127] ss:$2 sm:$0xff]  ;;  %v963_v34 = vmul.f32 %v2048_v56, %v950_v1  ;;  %v1039_v48 = vadd.f32 %v1031_v61, %v1003_v62  ;;  %v1035_v1 = vmul.f32 %v2165_v2, %v1022_v52  ;;  %v1119_v2 = vld [vmem:[#allocation2 + $0x48] ss:$2 sm:$0xff] }
 0x149   : > { %v984_v22 = vld [vmem:[#allocation2 + $0x167] ss:$2 sm:$0xff]  ;;  %v935_v0 = vadd.f32 %v927_v18, %v891_v13  ;;  %v997_v39 = vmul.f32 %v2051_v3, %v982_v58  ;;  %v970_v47 = vadd.f32 %v962_v60, %v934_v8  ;;  %v1125_v50 = vld [vmem:[#allocation2 + $0x108] ss:$2 sm:$0xff] }
 0x14a   : > { %v986_v37 = vld [vmem:[#allocation2 + $0x1a7] ss:$2 sm:$0xff]  ;;  %v998_v49 = vmul.f32 %v2051_v3, %v984_v22  ;;  %v1127_v61 = vld [vmem:[#allocation2 + $0x148] ss:$2 sm:$0xff] }
 0x14b   : > { %v971_v53 = vadd.f32 %v963_v34, %v935_v0  ;;  %v1005_v17 = vadd.f32 %v997_v39, %v969_v55  ;;  %v1046_v56 = vld [vmem:[#allocation2 + $0x29] ss:$2 sm:$0xff]  ;;  %v999_v15 = vmul.f32 %v2051_v3, %v986_v37 }
 0x14c   : > { %v1006_v32 = vadd.f32 %v998_v49, %v970_v47  ;;  %v1048_v10 = vld [vmem:[#allocation2 + $0x69] ss:$2 sm:$0xff]  ;;  %v1065_v3 = vmul.f32 %v2172_v31, %v1046_v56  ;;  %v1131_v56 = vld [vmem:[#allocation2 + $0x1c8] ss:$2 sm:$0xff] }
 0x14d   : > { %v1050_v36 = vld [vmem:[#allocation2 + $0xa9] ss:$2 sm:$0xff]  ;;  %v1007_v23 = vadd.f32 %v999_v15, %v971_v53  ;;  %v1041_v40 = vadd.f32 %v1033_v44, %v1005_v17  ;;  %v1066_v63 = vmul.f32 %v2172_v31, %v1048_v10  ;;  %v2234_v53 = vld [vmem:[%s2362_s2 + $0x8] ss:$0 sm:$0xff]  ;;  %v1138_v15 = vmul.f32 %v2190_v19, %v1119_v2 }
 0x14e   : > { %v1052_v27 = vld [vmem:[#allocation2 + $0xe9] ss:$2 sm:$0xff]  ;;  %v1067_v51 = vmul.f32 %v2172_v31, %v1050_v36  ;;  %v1042_v12 = vadd.f32 %v1034_v21, %v1006_v32  ;;  %v1073_v13 = vadd.f32 %v1065_v3, %v1037_v41  ;;  %v1140_v10 = vmul.f32 %v2190_v19, %v1123_v45  ;;  %v1129_v44 = vld [vmem:[#allocation2 + $0x188] ss:$2 sm:$0xff] }
 0x14f   : > { %v1054_v6 = vld [vmem:[#allocation2 + $0x129] ss:$2 sm:$0xff]  ;;  %v1068_v25 = vmul.f32 %v2172_v31, %v1052_v27  ;;  %v1074_v22 = vadd.f32 %v1066_v63, %v1038_v14  ;;  %v1043_v60 = vadd.f32 %v1035_v1, %v1007_v23  ;;  %v1141_v41 = vmul.f32 %v2190_v19, %v1125_v50 }
 0x150   : > { %v1083_v29 = vld [vmem:[#allocation2 + $0x47] ss:$2 sm:$0xff]  ;;  %v1069_v30 = vmul.f32 %v2172_v31, %v1054_v6  ;;  %v1075_v55 = vadd.f32 %v1067_v51, %v1039_v48  ;;  %v1144_v48 = vmul.f32 %v2190_v19, %v1131_v56 }
 0x151   : > { %v1056_v9 = vld [vmem:[#allocation2 + $0x169] ss:$2 sm:$0xff]  ;;  %v1076_v24 = vadd.f32 %v1068_v25, %v1040_v38  ;;  %v1102_v8 = vmul.f32 %v2177_v5, %v1083_v29 }
 0x152   : > { %v1085_v11 = vld [vmem:[#allocation2 + $0x87] ss:$2 sm:$0xff]  ;;  %v1070_v26 = vmul.f32 %v2172_v31, %v1056_v9  ;;  %v1077_v34 = vadd.f32 %v1069_v30, %v1041_v40  ;;  %v1142_v9 = vmul.f32 %v2190_v19, %v1127_v61 }
 0x153   : > { %v1087_v46 = vld [vmem:[#allocation2 + $0xc7] ss:$2 sm:$0xff]  ;;  %v1103_v35 = vmul.f32 %v2177_v5, %v1085_v11  ;;  %v1110_v42 = vadd.f32 %v1102_v8, %v1073_v13 }
 0x154   : > { %v1060_v20 = vld [vmem:[#allocation2 + $0x1e9] ss:$2 sm:$0xff]  ;;  %v1104_v28 = vmul.f32 %v2177_v5, %v1087_v46  ;;  %v1078_v57 = vadd.f32 %v1070_v26, %v1042_v12  ;;  %v1133_v12 = vld [vmem:[#allocation2 + $0x208] ss:$2 sm:$0xff] }
 0x155   : > { %v1089_v18 = vld [vmem:[#allocation2 + $0x107] ss:$2 sm:$0xff]  ;;  %v1072_v0 = vmul.f32 %v2172_v31, %v1060_v20  ;;  %v1111_v16 = vadd.f32 %v1103_v35, %v1074_v22  ;;  %v1146_v14 = vadd.f32 %v1138_v15, %v1110_v42  ;;  %v1143_v20 = vmul.f32 %v2190_v19, %v1129_v44 }
 0x156   : > { %v1058_v58 = vld [vmem:[#allocation2 + $0x1a9] ss:$2 sm:$0xff]  ;;  %v1105_v39 = vmul.f32 %v2177_v5, %v1089_v18  ;;  %v1112_v62 = vadd.f32 %v1104_v28, %v1075_v55  ;;  %v1145_v2 = vmul.f32 %v2190_v19, %v1133_v12 }
 0x157   : > { %v1091_v4 = vld [vmem:[#allocation2 + $0x147] ss:$2 sm:$0xff]  ;;  %v1071_v49 = vmul.f32 %v2172_v31, %v1058_v58  ;;  %v1080_v17 = vadd.f32 %v1072_v0, %v2197_v33  ;;  %v1147_v38 = vadd.f32 %v1139_v7, %v1111_v16 }
 0x158   : > { %v1093_v37 = vld [vmem:[#allocation2 + $0x187] ss:$2 sm:$0xff]  ;;  %v1106_v54 = vmul.f32 %v2177_v5, %v1091_v4  ;;  %v1113_v59 = vadd.f32 %v1105_v39, %v1076_v24  ;;  %v1148_v3 = vadd.f32 %v1140_v10, %v1112_v62 }
 0x159   : > { %v1095_v47 = vld [vmem:[#allocation2 + $0x1c7] ss:$2 sm:$0xff]  ;;  %v1079_v32 = vadd.f32 %v1071_v49, %v1043_v60  ;;  %v1107_v31 = vmul.f32 %v2177_v5, %v1093_v37 }
 0x15a   : > { %v1155_v36 = vld [vmem:[#allocation2 + $0x49] ss:$2 sm:$0xff]  ;;  %v1108_v21 = vmul.f32 %v2177_v5, %v1095_v47  ;;  %v1114_v33 = vadd.f32 %v1106_v54, %v1077_v34  ;;  %v1149_v40 = vadd.f32 %v1141_v41, %v1113_v59 }
 0x15b   : > { %v1157_v27 = vld [vmem:[#allocation2 + $0x89] ss:$2 sm:$0xff]  ;;  %v1115_v23 = vadd.f32 %v1107_v31, %v1078_v57  ;;  %v1174_v51 = vmul.f32 %v2234_v53, %v1155_v36 }
 0x15c   : > { %v1097_v52 = vld [vmem:[#allocation2 + $0x207] ss:$2 sm:$0xff]  ;;  %v1175_v25 = vmul.f32 %v2234_v53, %v1157_v27  ;;  %v1116_v46 = vadd.f32 %v1108_v21, %v1079_v32  ;;  %v1150_v30 = vadd.f32 %v1142_v9, %v1114_v33 }
 0x15d   : > { %v1159_v6 = vld [vmem:[#allocation2 + $0xc9] ss:$2 sm:$0xff]  ;;  %v1109_v11 = vmul.f32 %v2177_v5, %v1097_v52  ;;  %v2252_v58 = vadd.f32 %v1174_v51, %v1146_v14  ;;  %v1151_v24 = vadd.f32 %v1143_v20, %v1115_v23 }
 0x15e   : > { %v1161_v29 = vld [vmem:[#allocation2 + $0x109] ss:$2 sm:$0xff]  ;;  %v1176_v1 = vmul.f32 %v2234_v53, %v1159_v6  ;;  %v2254_v22 = vadd.f32 %v1175_v25, %v1147_v38  ;;  %v1152_v0 = vadd.f32 %v1144_v48, %v1116_v46 }
 0x15f   : > { %v1163_v63 = vld [vmem:[#allocation2 + $0x149] ss:$2 sm:$0xff]  ;;  %v1177_v18 = vmul.f32 %v2234_v53, %v1161_v29  ;;  %v1117_v55 = vadd.f32 %v1109_v11, %v1080_v17  ;;  %v1205_v35 = vmul.f32 %v2252_v58, %v2252_v58 }
 0x160   : > { %v1165_v13 = vld [vmem:[#allocation2 + $0x189] ss:$2 sm:$0xff]  ;;  %v1178_v8 = vmul.f32 %v2234_v53, %v1163_v63  ;;  %v2257_v60 = vadd.f32 %v1176_v1, %v1148_v3  ;;  %v1190_v4 = vadd.f32 %v2254_v22, %v2252_v58  ;;  %v1206_v28 = vmul.f32 %v2254_v22, %v2254_v22 }
 0x161   : > { %v1167_v5 = vld [vmem:[#allocation2 + $0x1c9] ss:$2 sm:$0xff]  ;;  %v2259_v26 = vadd.f32 %v1177_v18, %v1149_v40  ;;  %v1179_v34 = vmul.f32 %v2234_v53, %v1165_v13  ;;  %v1153_v47 = vadd.f32 %v1145_v2, %v1117_v55 }
 0x162   : > { %v1169_v37 = vld [vmem:[#allocation2 + $0x209] ss:$2 sm:$0xff]  ;;  %v1186_v39 = vadd.f32 %v1178_v8, %v1150_v30  ;;  %v1191_v42 = vadd.f32 %v1190_v4, %v2257_v60  ;;  %v1207_v43 = vmul.f32 %v2257_v60, %v2257_v60  ;;  %v1213_v45 = vadd.f32 %v1206_v28, %v1205_v35 }
 0x163   : > { %v1180_v49 = vmul.f32 %v2234_v53, %v1167_v5  ;;  %v1187_v57 = vadd.f32 %v1179_v34, %v1151_v24  ;;  %v1208_v19 = vmul.f32 %v2259_v26, %v2259_v26  ;;  %v1181_v50 = vmul.f32 %v2234_v53, %v1169_v37 }
 0x164   : > { %v1192_v16 = vadd.f32 %v1191_v42, %v2259_v26  ;;  %v1214_v62 = vadd.f32 %v1213_v45, %v1207_v43  ;;  %v1209_v59 = vmul.f32 %v1186_v39, %v1186_v39 }
 0x165   : > { %v1188_v17 = vadd.f32 %v1180_v49, %v1152_v0  ;;  %v1189_v15 = vadd.f32 %v1181_v50, %v1153_v47  ;;  %v1210_v31 = vmul.f32 %v1187_v57, %v1187_v57 }
 0x166   : > { %v1193_v54 = vadd.f32 %v1192_v16, %v1186_v39  ;;  %v1215_v56 = vadd.f32 %v1214_v62, %v1208_v19 }
 0x167   : > { %v1211_v10 = vmul.f32 %v1188_v17, %v1188_v17  ;;  %v1212_v52 = vmul.f32 %v1189_v15, %v1189_v15 }
 0x168   : > { %v1194_v32 = vadd.f32 %v1193_v54, %v1187_v57  ;;  %v1216_v61 = vadd.f32 %v1215_v56, %v1209_v59 }
 0x16a   : > { %v1195_v7 = vadd.f32 %v1194_v32, %v1188_v17  ;;  %v1217_v36 = vadd.f32 %v1216_v61, %v1210_v31 }
 0x16c   : > { %v1196_v27 = vadd.f32 %v1195_v7, %v1189_v15  ;;  %v1218_v21 = vadd.f32 %v1217_v36, %v1211_v10 }
 0x16e   : > { %v1197_v33 = vrot.slane %v1196_v27, 4  ;;  %v1219_v44 = vadd.f32 %v1218_v21, %v1212_v52 }
 0x170   : > { %v1198_v41 = vadd.f32 %v1197_v33, %v1196_v27  ;;  %v1220_v14 = vrot.slane %v1219_v44, 4 }
 0x172   : > { %v1199_v6 = vrot.slane %v1198_v41, 2  ;;  %v1221_v53 = vadd.f32 %v1220_v14, %v1219_v44 }
 0x174   : > { %v1200_v23 = vadd.f32 %v1199_v6, %v1198_v41  ;;  %v1222_v48 = vrot.slane %v1221_v53, 2 }
 0x176   : > { %v1201_v38 = vrot.slane %v1200_v23, 1  ;;  %v1223_v3 = vadd.f32 %v1222_v48, %v1221_v53 }
 0x178   : > { %v1202_v29 = vadd.f32 %v1201_v38, %v1200_v23  ;;  %v1224_v9 = vrot.slane %v1223_v3, 1 }
 0x17a   : > { %v1204_v40 = vmul.f32 0.015625, %v1202_v29  ;;  %v1225_v63 = vadd.f32 %v1224_v9, %v1223_v3 }
 0x17c   : > { %v1226_v51 = vmul.f32 0.015625, %v1225_v63  ;;  %v1227_v25 = vmul.f32 %v1204_v40, %v1204_v40  ;;  %v1230_v1 = vsub.f32 %v2252_v58, %v1204_v40  ;;  %v1231_v12 = vsub.f32 %v2254_v22, %v1204_v40 }
 0x17d   : > { %v1234_v30 = vsub.f32 %v1186_v39, %v1204_v40  ;;  %v1235_v13 = vsub.f32 %v1187_v57, %v1204_v40  ;;  %v1232_v55 = vsub.f32 %v2257_v60, %v1204_v40  ;;  %v1233_v24 = vsub.f32 %v2259_v26, %v1204_v40 }
 0x17e   : > { %v1228_v11 = vsub.f32 %v1226_v51, %v1227_v25  ;;  %v1236_v8 = vsub.f32 %v1188_v17, %v1204_v40  ;;  %v1237_v5 = vsub.f32 %v1189_v15, %v1204_v40 }
 0x180   : > { %v1229_v46 = vmax.f32 %v1228_v11, 0.0 }
 0x182   : > { %v1238_v20 = vadd.f32 1e-05, %v1229_v46 }
 0x184   : > { %1739 = vrsqrt.f32 %v1238_v20 }
 0x191   : > { %v1740_v18 = vpop.eup %1739 }
 0x192   : > { %v1240_v4 = vmul.f32 %v1740_v18, %v1230_v1  ;;  %v1241_v35 = vmul.f32 %v1740_v18, %v1231_v12  ;;  %v1244_v28 = vmul.f32 %v1740_v18, %v1234_v30  ;;  %v1245_v2 = vmul.f32 %v1740_v18, %v1235_v13 }
 0x193   : > { %v1242_v0 = vmul.f32 %v1740_v18, %v1232_v55  ;;  %v1243_v34 = vmul.f32 %v1740_v18, %v1233_v24  ;;  %v1246_v37 = vmul.f32 %v1740_v18, %v1236_v8  ;;  %v1247_v42 = vmul.f32 %v1740_v18, %v1237_v5 }
 0x194   : > { %v1248_v58 = vmax.f32 %v1240_v4, 0.0  ;;  %v1249_v43 = vmax.f32 %v1241_v35, 0.0  ;;  %v1252_v22 = vmax.f32 %v1244_v28, 0.0  ;;  %v1253_v39 = vmax.f32 %v1245_v2, 0.0 }
 0x195   : > { %v1250_v45 = vmax.f32 %v1242_v0, 0.0  ;;  %v1251_v47 = vmax.f32 %v1243_v34, 0.0  ;;  %v1254_v49 = vmax.f32 %v1246_v37, 0.0  ;;  %v1255_v60 = vmax.f32 %v1247_v42, 0.0 }
 0x196   : > { %v1256_v57 = vpack.c.bf16 %v1249_v43, %v1248_v58  ;;  %v1258_v26 = vpack.c.bf16 %v1253_v39, %v1252_v22 }
 0x197   : > { %v1257_v16 = vpack.c.bf16 %v1251_v47, %v1250_v45  ;;  %v1259_v19 = vpack.c.bf16 %v1255_v60, %v1254_v49 }
 0x198   : > { %1695 = vmatprep.mubr.bf16.mxu0 %v1256_v57  ;;  %1699 = vmatprep.mubr.bf16.mxu1 %v1258_v26 }
 0x199   : > { %1696 = vmatmul.mubr.bf16.vlgmr.msra.gmra.mxu0 %v1257_v16  ;;  %1700 = vmatmul.mubr.bf16.vlgmr.msra.gmra.mxu1 %v1259_v19 }
 0x259   : > { %v2281_v62 = vpop.f32.mrf.mxu0  ;;  %v2283_v50 = vpop.f32.mrf.mxu1 }
 0x25a   : > { %v1414_v31 = vmul.f32 %v2281_v62, %v2281_v62  ;;  %v1393_v27 = vsel %vm1389_vm1, %v2281_v62, 0.0  ;;  %v1418_v51 = vmul.f32 %v2283_v50, %v2283_v50  ;;  %v1401_v1 = vsel %vm1389_vm1, %v2283_v50, 0.0 }
 0x25b   : > { %v2285_v17 = vpop.f32.mrf.mxu0  ;;  %v2287_v54 = vpop.f32.mrf.mxu1 }
 0x25c   : > { %v1412_v56 = vmul.f32 %v2285_v17, %v2285_v17  ;;  %v1390_v61 = vsel %vm1389_vm1, %v2285_v17, 0.0  ;;  %v1423_v6 = vsel %vm1389_vm1, %v1414_v31, 0.0  ;;  %v1416_v53 = vmul.f32 %v2287_v54, %v2287_v54 }
 0x25d   : > { %v2289_v59 = vpop.f32.mrf.mxu0  ;;  %v2293_v15 = vpop.f32.mrf.mxu1  ;;  %v1397_v3 = vsel %vm1389_vm1, %v2287_v54, 0.0  ;;  %v1431_v55 = vsel %vm1389_vm1, %v1418_v51, 0.0 }
 0x25e   : > { %v1420_v52 = vsel %vm1389_vm1, %v1412_v56, 0.0  ;;  %v1415_v21 = vmul.f32 %v2289_v59, %v2289_v59  ;;  %v1395_v23 = vsel %vm1389_vm1, %v2289_v59, 0.0  ;;  %v1427_v25 = vsel %vm1389_vm1, %v1416_v53, 0.0 }
 0x25f   : > { %v2295_v32 = vpop.f32.mrf.mxu0  ;;  %v2311_v14 = vpop.f32.mrf.mxu1  ;;  %v1419_v12 = vmul.f32 %v2293_v15, %v2293_v15  ;;  %v1403_v24 = vsel %vm1389_vm1, %v2293_v15, 0.0 }
 0x260   : > { %v1391_v7 = vsel %vm1389_vm1, %v2295_v32, 0.0  ;;  %v1413_v10 = vmul.f32 %v2295_v32, %v2295_v32  ;;  %v1425_v29 = vsel %vm1389_vm1, %v1415_v21, 0.0  ;;  %v1417_v9 = vmul.f32 %v2311_v14, %v2311_v14 }
 0x261   : > { %v1392_v36 = vadd.f32 %v1391_v7, %v1390_v61  ;;  %v1399_v11 = vsel %vm1389_vm1, %v2311_v14, 0.0  ;;  %v1433_v4 = vsel %vm1389_vm1, %v1419_v12, 0.0 }
 0x262   : > { %v1421_v33 = vsel %vm1389_vm1, %v1413_v10, 0.0  ;;  %v1429_v30 = vsel %vm1389_vm1, %v1417_v9, 0.0 }
 0x263   : > { %v1394_v44 = vadd.f32 %v1393_v27, %v1392_v36  ;;  %v1422_v41 = vadd.f32 %v1421_v33, %v1420_v52 }
 0x265   : > { %v1424_v48 = vadd.f32 %v1423_v6, %v1422_v41  ;;  %v1396_v38 = vadd.f32 %v1395_v23, %v1394_v44 }
 0x267   : > { %v1398_v40 = vadd.f32 %v1397_v3, %v1396_v38  ;;  %v1426_v63 = vadd.f32 %v1425_v29, %v1424_v48 }
 0x269   : > { %v1400_v46 = vadd.f32 %v1399_v11, %v1398_v40  ;;  %v1428_v20 = vadd.f32 %v1427_v25, %v1426_v63 }
 0x26b   : > { %v1402_v13 = vadd.f32 %v1401_v1, %v1400_v46  ;;  %v1430_v18 = vadd.f32 %v1429_v30, %v1428_v20 }
 0x26d   : > { %v1404_v8 = vadd.f32 %v1403_v24, %v1402_v13  ;;  %v1432_v5 = vadd.f32 %v1431_v55, %v1430_v18 }
 0x26f   : > { %v1405_v35 = vrot.slane %v1404_v8, 4  ;;  %v1434_v28 = vadd.f32 %v1433_v4, %v1432_v5 }
 0x271   : > { %v1406_v2 = vadd.f32 %v1405_v35, %v1404_v8  ;;  %v1435_v0 = vrot.slane %v1434_v28, 4 }
 0x273   : > { %v1407_v34 = vrot.slane %v1406_v2, 2  ;;  %v1436_v37 = vadd.f32 %v1435_v0, %v1434_v28 }
 0x275   : > { %v1408_v42 = vadd.f32 %v1407_v34, %v1406_v2  ;;  %v1437_v58 = vrot.slane %v1436_v37, 2 }
 0x277   : > { %v1409_v43 = vrot.slane %v1408_v42, 1  ;;  %v1438_v22 = vadd.f32 %v1437_v58, %v1436_v37 }
 0x279   : > { %v1410_v39 = vadd.f32 %v1409_v43, %v1408_v42  ;;  %v1439_v45 = vrot.slane %v1438_v22, 1 }
 0x27b   : > { %v1411_v47 = vmul.f32 0.015625, %v1410_v39  ;;  %v1440_v49 = vadd.f32 %v1439_v45, %v1438_v22 }
 0x27d   : > { %v1441_v60 = vmul.f32 0.015625, %v1440_v49  ;;  %v1442_v57 = vmul.f32 %v1411_v47, %v1411_v47  ;;  %v1445_v56 = vsub.f32 %v2285_v17, %v1411_v47  ;;  %v1446_v31 = vsub.f32 %v2295_v32, %v1411_v47 }
 0x27e   : > { %v1447_v61 = vsub.f32 %v2281_v62, %v1411_v47  ;;  %v1448_v7 = vsub.f32 %v2289_v59, %v1411_v47  ;;  %v1449_v36 = vsub.f32 %v2287_v54, %v1411_v47  ;;  %v1450_v27 = vsub.f32 %v2311_v14, %v1411_v47 }
 0x27f   : > { %v1443_v26 = vsub.f32 %v1441_v60, %v1442_v57  ;;  %v1451_v52 = vsub.f32 %v2283_v50, %v1411_v47  ;;  %v1452_v21 = vsub.f32 %v2293_v15, %v1411_v47 }
 0x281   : > { %v1444_v16 = vmax.f32 %v1443_v26, 0.0 }
 0x283   : > { %v1453_v19 = vadd.f32 1e-05, %v1444_v16 }
 0x285   : > { %1741 = vrsqrt.f32 %v1453_v19 }
 0x292   : > { %v1742_v10 = vpop.eup %1741 }
 0x293   : > { %v1455_v17 = vmul.f32 %v1742_v10, %v1445_v56  ;;  %v1456_v33 = vmul.f32 %v1742_v10, %v1446_v31  ;;  %v1457_v32 = vmul.f32 %v1742_v10, %v1447_v61  ;;  %v1458_v44 = vmul.f32 %v1742_v10, %v1448_v7 }
 0x294   : > { %v1459_v62 = vmul.f32 %v1742_v10, %v1449_v36  ;;  %v1460_v41 = vmul.f32 %v1742_v10, %v1450_v27  ;;  %v1461_v59 = vmul.f32 %v1742_v10, %v1451_v52  ;;  %v1462_v6 = vmul.f32 %v1742_v10, %v1452_v21 }
 0x295   : > { %1463 = vst.msk [vmem:[%s197_s22] sm:$0xff] %vm1389_vm1, %v1455_v17  ;;  %1464 = vst.msk [vmem:[%s197_s22 + $0x8] sm:$0xff] %vm1389_vm1, %v1456_v33 }
 0x296   : > { %1465 = vst.msk [vmem:[%s197_s22 + $0x10] sm:$0xff] %vm1389_vm1, %v1457_v32  ;;  %1466 = vst.msk [vmem:[%s197_s22 + $0x18] sm:$0xff] %vm1389_vm1, %v1458_v44 }
 0x297   : > { %1467 = vst.msk [vmem:[%s197_s22 + $0x20] sm:$0xff] %vm1389_vm1, %v1459_v62  ;;  %1468 = vst.msk [vmem:[%s197_s22 + $0x28] sm:$0xff] %vm1389_vm1, %v1460_v41 }
 0x298   : > { %1469 = vst.msk [vmem:[%s197_s22 + $0x30] sm:$0xff] %vm1389_vm1, %v1461_v59  ;;  %1470 = vst.msk [vmem:[%s197_s22 + $0x38] sm:$0xff] %vm1389_vm1, %v1462_v6 }
 0x299 PF: > { %s14_s15 = sadd.s32 1, %s1749_s15  }
 0x29a   : > { %p11_p4 = scmp.ge.s32.totalorder %s14_s15, 4  }
 0x29c   :  { %13 = sbr.rel (!%p11_p4) target bundleno = 1 (0x1), region = 142 }

// kernel: two_blocks.3
= control target key start
LH: loop header
LB: loop body
LE: loop exit
PB: predicated region body
PF: predicated region fallthrough
CT: control target
= control target key end

     0   :  { %9 = vsyncpa [#allocation4], 0  ;;  %s4597_s0 = inlined_call_operand.vmem [shape: f32[2,64,24], index: 0, kind: input, shape index: {}]   ;;  %s4598_s1 = inlined_call_operand.vmem [shape: bf16[24,256], index: 1, kind: input, shape index: {}]   ;;  %s4599_s2 = inlined_call_operand.vmem [shape: f32[9,256], index: 2, kind: input, shape index: {}]   ;;  %s4600_s3 = inlined_call_operand.vmem [shape: bf16[256,24], index: 3, kind: input, shape index: {}]   ;;  %s4601_s4 = inlined_call_operand.hbm [shape: f32[2,64,24], index: 4, kind: output, shape index: {}]  }
   0x1   :  { %11 = vsyncpa [#allocation4 + $0x1], 0  ;;  %s3001_s15 = smov 0   ;;  %s3003_s16 = smov 0  }
   0x2   :  { %s3005_s17 = smov 0   ;;  %s3007_s18 = smov 0  }
   0x3 LB: > { %s3022_s19 = sadd.s32 4294967295, %s2969_s18   ;;  %s2728_s20 = sadd.s32 4294967294, %s2969_s18   ;;  %s2969_s18 = sphi %s3007_s18, %s4949_s18   ;;  %s2965_s17 = sphi %s3005_s17, %s4948_s17   ;;  %s2961_s16 = sphi %s3003_s16, %s4947_s16   ;;  %s2957_s15 = sphi %s3001_s15, %s4946_s15  }
   0x4   : > { %s3026_s21 = sadd.s32 1, %s2969_s18   ;;  %s113_s22 = sadd.s32 1, %s2965_s17 }
   0x5   : > { %s110_s23 = ssub.s32 %s2969_s18, %s3026_s21  ;;  %p123_p0 = scmp.ne.s32.totalorder %s2965_s17, %s2961_s16 }
   0x6   : > { %p111_p1 = scmp.eq.s32.totalorder %s110_s23, 0  ;;  %p124_p2 = scmp.eq.s32.totalorder %s3022_s19, 1 }
   0x7   : > { %p129_p3 = scmp.ne.s32.totalorder %s2961_s16, %s2957_s15  ;;  %p130_p4 = scmp.eq.s32.totalorder %s2728_s20, 1 }
   0x8   : > { %s3037_s24 = scalar_select %p111_p1, %s2965_s17, %s113_s22  }
   0x9   : > { %p3039_p5 = por %p124_p2, %p123_p0  ;;  %p3043_p6 = por %p130_p4, %p129_p3 }
   0xa   : > { %p2731_p7 = scmp.ge.s32.totalorder %s2969_s18, 1  ;;  %p165_p8 = scmp.lt.s32.totalorder %s2969_s18, 3 }
   0xc   : > { %p166_p9 = pnand %p2731_p7, %p165_p8 }
   0xe   : > { %169 = sbr.rel (%p166_p9) target bundleno = 837 (0x345), region = 36 }
  0x13   : > { %v253_v0 = vld [vmem:[%s4598_s1 + $0x10] sm:$0xff]  ;;  %vm286_vm0 = vcmask 1043456   ;;  %p191_p10 = scmp.lt.s32.totalorder %s3022_s19, 1  ;;  %v2870_v3 = vld [vmem:[%s4598_s1 + $0x4] ss:$8 sps:$4 sm:$0xff]   ;;  %v2971_v4 = vmov 0   ;;  %v589_v25 = vlaneseq }
  0x14   : > { %v2738_v1 = vcombine.high %v253_v0, %v253_v0  ;;  %v2737_v2 = vcombine.low %v253_v0, %v253_v0  ;;  %325 = vmatprep.mubr.bf16.mxu0 %v2971_v4  ;;  %v2872_v5 = vld [vmem:[%s4598_s1] ss:$8 sps:$4 sm:$0xff]   ;;  %vm273_vm1 = vcmask 195584   ;;  %v2972_v19 = vmov 0.0   ;;  %v2873_v20 = vld [vmem:[%s4600_s3 + $0x78] sm:$0xff]   ;;  %v2875_v22 = vld [vmem:[%s4600_s3 + $0x70] sm:$0xff]  }
  0x15   : > { %s192_s7 = scalar_select %p191_p10, %s3022_s19, 1  ;;  %204 = vst [vmem:[#allocation2 + $0x140] sm:$0xff] %v2972_v19  ;;  %206 = vst [vmem:[#allocation2 + $0xa0] sm:$0xff] %v2972_v19  ;;  %v2874_v21 = vld [vmem:[%s4600_s3 + $0x38] sm:$0xff]   ;;  %2809 = vmatprep.subr.bf16.mxu1 %v2873_v20  ;;  %v2876_v23 = vld [vmem:[%s4600_s3 + $0x30] sm:$0xff]   ;;  %v3100_v29 = vshrl.u32 %v589_v25, 7 }
  0x16   : > { %2739 = vmatprep.subr.msk.bf16.mxu0 %vm286_vm0, %v2738_v1  ;;  %v288_v6 = vsel %vm286_vm0, %v2737_v2, 0  ;;  %208 = vst [vmem:[#allocation2 + $0xe8] sm:$0xff] %v2972_v19  ;;  %221 = vst [vmem:[#allocation2 + $0x138] sm:$0xff] %v2972_v19  ;;  %2817 = vmatpush3.bf16.msra.mxu1 %v2874_v21  ;;  %v2877_v24 = vld [vmem:[%s4600_s3 + $0x68] sm:$0xff]   ;;  %v2879_v27 = vld [vmem:[%s4600_s3 + $0x60] sm:$0xff]   ;;  %vm885_vm2 = vcmask 1045504  }
  0x17   : > { %306 = vmatpush1.bf16.msra.mxu0 %v288_v6  ;;  %s2767_s8 = sshll.u32 %s192_s7, 6  ;;  %223 = vst [vmem:[#allocation2 + $0x80] sm:$0xff] %v2972_v19  ;;  %225 = vst [vmem:[#allocation2 + $0x118] sm:$0xff] %v2972_v19  ;;  %2810 = vmatprep.subr.bf16.mxu1 %v2875_v22  ;;  %v2878_v26 = vld [vmem:[%s4600_s3 + $0x28] sm:$0xff]   ;;  %v591_v31 = vsub.s32 0, %v3100_v29  ;;  %v4603_v32 = vsub.s32 5, %v3100_v29 }
  0x18   : > { %307 = vmatprep.subr.bf16.mxu0 %v2870_v3  ;;  %s3063_s11 = scalar_lea.vmem %s4597_s0, %s2767_s8  ;;  %237 = vst [vmem:[#allocation2 + $0xd0] sm:$0xff] %v2972_v19  ;;  %239 = vst [vmem:[#allocation2 + $0x128] sm:$0xff] %v2972_v19  ;;  %v2880_v33 = vld [vmem:[%s4600_s3 + $0x20] sm:$0xff]   ;;  %v815_v35 = vsub.s32 2, %v3100_v29  ;;  %v1120_v36 = vsub.s32 4, %v3100_v29  ;;  %v1561_v37 = vsub.s32 7, %v3100_v29 }
  0x19   : > { %v243_v7 = vld [vmem:[%s3063_s11] sm:$0xff]  ;;  %v244_v8 = vld [vmem:[%s3063_s11 + $0x8] sm:$0xff]  ;;  %v245_v10 = vld [vmem:[%s3063_s11 + $0x10] sm:$0xff]  ;;  %241 = vst [vmem:[#allocation2 + $0x1b8] sm:$0xff] %v2972_v19  ;;  %v679_v42 = vsub.s32 1, %v3100_v29  ;;  %v1032_v47 = vsub.s32 3, %v3100_v29 }
  0x1a   : > { %v254_v9 = vpack.c.bf16 %v244_v8, %v243_v7  ;;  %v246_v11 = vld [vmem:[%s3063_s11 + $0x18] sm:$0xff]  ;;  %v247_v13 = vld [vmem:[%s3063_s11 + $0x20] sm:$0xff]  ;;  %v248_v14 = vld [vmem:[%s3063_s11 + $0x28] sm:$0xff]  ;;  %197 = vst [vmem:[#allocation2 + $0x120] sm:$0xff] %v2972_v19  ;;  %2818 = vmatpush3.bf16.msra.mxu1 %v2876_v23  ;;  %v4602_v53 = vsub.s32 6, %v3100_v29  ;;  %vm1911_vm3 = vcmask 1040384  }
  0x1b   : > { %308 = vmatpush1.bf16.msra.mxu0 %v2872_v5  ;;  %v255_v12 = vpack.c.bf16 %v246_v11, %v245_v10  ;;  %v256_v15 = vpack.c.bf16 %v248_v14, %v247_v13  ;;  %v249_v16 = vld [vmem:[%s3063_s11 + $0x30] sm:$0xff]  ;;  %v250_v17 = vld [vmem:[%s3063_s11 + $0x38] sm:$0xff]  ;;  %198 = vst [vmem:[#allocation2 + $0x130] sm:$0xff] %v2972_v19  ;;  %199 = vst [vmem:[#allocation2 + $0x188] sm:$0xff] %v2972_v19  ;;  %2811 = vmatprep.subr.bf16.mxu1 %v2877_v24  ;;  %s188_s7 = sand.u32 1, %s2961_s16   ;;  %s2768_s9 = sshll.u32 %s3022_s19, 10 }
  0x1c   : > { %v257_v18 = vpack.c.bf16 %v250_v17, %v249_v16  ;;  %200 = vst [vmem:[#allocation2 + $0x18] sm:$0xff] %v2972_v19  ;;  %201 = vst [vmem:[#allocation2 + $0x1d0] sm:$0xff] %v2972_v19  ;;  %2769 = vmatprep.subr.bf16.mxu0 %v2873_v20  ;;  %v553_v34 = vld [vmem:[%s4599_s2] sm:$0xff]  ;;  %v2881_v38 = vld [vmem:[%s4600_s3 + $0x58] sm:$0xff]   ;;  %s2732_s8 = sshll.u32 %s188_s7, 6  ;;  %s4531_s14 = scalar_lea.hbm %s4601_s4, %s2768_s9 }
  0x1d   : > { %202 = vst [vmem:[#allocation2 + $0x48] sm:$0xff] %v2972_v19  ;;  %205 = vst [vmem:[#allocation2 + $0x1c8] sm:$0xff] %v2972_v19  ;;  %v581_v40 = vld [vmem:[#allocation2 + $0x138] sm:$0x80]  ;;  %v3120_v41 = vrot.slane %v553_v34, %v591_v31  ;;  %v3125_v46 = vrot.slane %v553_v34, %v815_v35  ;;  %v3131_v48 = vld [vmem:[%s4599_s2 + $0x8] sm:$0xff]  ;;  %v3140_v51 = vrot.slane %v553_v34, %v679_v42  ;;  %s4521_s10 = scalar_lea.vmem [#allocation3], %s2732_s8 }
  0x1e   : > { %2740 = vmatmul.mubr.msk.bf16.vlgmr.msra.gmra.mxu0 %vm273_vm1, %v254_v9  ;;  %207 = vst [vmem:[#allocation2 + $0xe0] sm:$0xff] %v2972_v19  ;;  %209 = vst [vmem:[#allocation2 + $0xc8] sm:$0xff] %v2972_v19  ;;  %2819 = vmatpush3.bf16.msra.mxu1 %v2878_v26  ;;  %v585_v44 = vld [vmem:[#allocation2 + $0x80] sm:$0x80]  ;;  %v3138_v50 = vld [vmem:[%s4599_s2 + $0x10] ss:$0 sm:$0xff]  ;;  %v3144_v52 = vrot.slane %v553_v34, %v4603_v32  ;;  %v3155_v58 = vrot.slane %v553_v34, %v1120_v36 }
  0x1f   : > { %335 = vmatprep.mubr.bf16.mxu0 %v2971_v4  ;;  %211 = vst [vmem:[#allocation2 + $0x110] sm:$0xff] %v2972_v19  ;;  %212 = vst [vmem:[#allocation2 + $0x1a0] sm:$0xff] %v2972_v19  ;;  %2770 = vmatpush3.bf16.msra.mxu0 %v2874_v21  ;;  %v807_v43 = vld [vmem:[#allocation2 + $0xd0] sm:$0x1]  ;;  %v811_v45 = vld [vmem:[#allocation2 + $0x128] sm:$0x1]  ;;  %v3159_v61 = vrot.slane %v553_v34, %v1561_v37  ;;  %v3167_v0 = vmul.f32 %v3120_v41, %v581_v40 }
  0x20   : > { %213 = vst [vmem:[#allocation2 + $0xb8] sm:$0xff] %v2972_v19  ;;  %214 = vst [vmem:[#allocation2 + $0x30] sm:$0xff] %v2972_v19  ;;  %2771 = vmatprep.subr.bf16.mxu0 %v2875_v22  ;;  %2812 = vmatprep.subr.bf16.mxu1 %v2879_v27  ;;  %v1691_v54 = vld [vmem:[#allocation2 + $0xa0] sm:$0xfe]  ;;  %v1693_v55 = vld [vmem:[#allocation2 + $0xe8] sm:$0x1]  ;;  %v3151_v57 = vmul.f32 %v3125_v46, %v807_v43  ;;  %v3170_v1 = vmul.f32 %v3120_v41, %v585_v44 }
  0x21   : > { %215 = vst [vmem:[#allocation2 + $0x50] sm:$0xff] %v2972_v19  ;;  %216 = vst [vmem:[#allocation2 + $0xa8] sm:$0xff] %v2972_v19  ;;  %v2882_v56 = vld [vmem:[%s4600_s3 + $0x18] sm:$0xff]   ;;  %v1248_v59 = vld [vmem:[#allocation2 + $0x128] sm:$0x1]  ;;  %v3175_v6 = vrot.slane %v3131_v48, %v679_v42  ;;  %v3178_v7 = vmul.f32 %v3125_v46, %v811_v45  ;;  %v3181_v8 = vmul.f32 %v3138_v50, %v1691_v54  ;;  %s2666_s12 = sshll.u32 %s4521_s10, 4  ;;  %s4533_s12 = int_to_ptr.vmem [resolvable:$true] %s2666_s12 }
  0x22   : > { %217 = vst [vmem:[#allocation2 + $0x148] sm:$0xff] %v2972_v19  ;;  %218 = vst [vmem:[#allocation2 + $0x170] sm:$0xff] %v2972_v19  ;;  %2820 = vmatpush3.bf16.msra.mxu1 %v2880_v33  ;;  %v1252_v60 = vld [vmem:[#allocation2 + $0x1b8] sm:$0x1]  ;;  %v2883_v62 = vld [vmem:[%s4600_s3 + $0x50] sm:$0xff]   ;;  %v1733_v9 = vmul.f32 %v3138_v50, %v1693_v55  ;;  %v3185_v10 = vrot.slane %v3131_v48, %v591_v31  ;;  %v3220_v31 = vrot.slane %v3131_v48, %v815_v35  ;;  %s2909_s20 = scalar_lea.vmem %s4533_s12, 1024 }
  0x23   : > { %219 = vst [vmem:[#allocation2 + $0x90] sm:$0xff] %v2972_v19  ;;  %220 = vst [vmem:[#allocation2 + $0x108] sm:$0xff] %v2972_v19  ;;  %2772 = vmatpush3.bf16.msra.mxu0 %v2876_v23  ;;  %2813 = vmatprep.subr.bf16.mxu1 %v2881_v38  ;;  %v1022_v2 = vld [vmem:[#allocation2 + $0x80] sm:$0x80]  ;;  %v1026_v3 = vld [vmem:[#allocation2 + $0x118] sm:$0x80]  ;;  %v3193_v13 = vmul.f32 %v3144_v52, %v1252_v60  ;;  %p2910_p11 = scmp.ne.s32.totalorder %s4533_s12, %s2909_s20 }
  0x24   : > { %222 = vst [vmem:[#allocation2 + $0x28] sm:$0xff] %v2972_v19  ;;  %224 = vst [vmem:[#allocation2 + $0x1a8] sm:$0xff] %v2972_v19  ;;  %2773 = vmatprep.subr.bf16.mxu0 %v2877_v24  ;;  %v1689_v5 = vld [vmem:[#allocation2 + $0x1b8] sm:$0x1]  ;;  %v1463_v14 = vld [vmem:[#allocation2 + $0x118] sm:$0x80] }
  0x25   : > { %226 = vst [vmem:[#allocation2 + $0x198] sm:$0xff] %v2972_v19  ;;  %227 = vst [vmem:[#allocation2 + $0x8] sm:$0xff] %v2972_v19  ;;  %v2884_v16 = vld [vmem:[%s4600_s3 + $0x10] sm:$0xff]   ;;  %v1467_v21 = vld [vmem:[#allocation2 + $0x140] sm:$0x80]  ;;  %v3210_v23 = vmul.f32 %v3138_v50, %v1689_v5  ;;  %v4604_v42 = vrot.slane %v3181_v8, 2  ;;  %p2911_p12 = pnand %p2910_p11, %p3039_p5 }
  0x26   : > { %2741 = vmatmul.mubr.msk.bf16.gmra.mxu0 %vm273_vm1, %v255_v12  ;;  %228 = vst [vmem:[#allocation2 + $0x70] sm:$0xff] %v2972_v19  ;;  %229 = vst [vmem:[#allocation2 + $0x150] sm:$0xff] %v2972_v19  ;;  %v3190_v12 = vmul.f32 %v3144_v52, %v1248_v59  ;;  %2821 = vmatpush3.bf16.msra.mxu1 %v2882_v56  ;;  %v558_v17 = vld [vmem:[#allocation2 + $0x130] sm:$0x80]  ;;  %v1469_v22 = vld [vmem:[#allocation2 + $0xa0] sm:$0x7f] }
  0x27   : > { %345 = vmatprep.mubr.bf16.mxu0 %v2971_v4  ;;  %230 = vst [vmem:[#allocation2 + $0xf0] sm:$0xff] %v2972_v19  ;;  %231 = vst [vmem:[#allocation2 + $0x178] sm:$0xff] %v2972_v19  ;;  %2774 = vmatpush3.bf16.msra.mxu0 %v2878_v26  ;;  %v2885_v24 = vld [vmem:[%s4600_s3 + $0x48] sm:$0xff]   ;;  %v1811_v43 = vrot.slane %v1733_v9, 2  ;;  %v562_v44 = vld [vmem:[#allocation2 + $0x1a0] sm:$0x80]  ;;  %v3238_v35 = vmul.f32 %v3185_v10, %v558_v17  ;;  %v3276_v17 = vrot.slane %v3131_v48, %v1561_v37  ;;  %p2912_p13 = pneg %p2911_p12 }
  0x28   : > { %232 = vst [vmem:[#allocation2 + $0x190] sm:$0xff] %v2972_v19  ;;  %233 = vst [vmem:[#allocation2 + $0xb0] sm:$0xff] %v2972_v19  ;;  %2775 = vmatprep.subr.bf16.mxu0 %v2879_v27  ;;  %2814 = vmatprep.subr.bf16.mxu1 %v2883_v62  ;;  %v566_v59 = vld [vmem:[#allocation2 + $0x30] sm:$0x80]  ;;  %v2887_v5 = vld [vmem:[%s4600_s3 + $0x40] sm:$0xff]   ;;  %s2973_s22 = smov [#allocation3]  }
  0x29   : > { %234 = vst [vmem:[#allocation2 + $0x88] sm:$0xff] %v2972_v19  ;;  %235 = vst [vmem:[#allocation2 + $0x1c0] sm:$0xff] %v2972_v19  ;;  %v574_v60 = vld [vmem:[#allocation2 + $0x170] sm:$0x80]  ;;  %s2913_s23 = sshll.u32 %s2973_s22, 4  ;;  %s2914_s23 = int_to_ptr.vmem [resolvable:$false] %s2913_s23 }
  0x2a   : > { %236 = vst [vmem:[#allocation2 + $0xf8] sm:$0xff] %v2972_v19  ;;  %238 = vst [vmem:[#allocation2 + $0x100] sm:$0xff] %v2972_v19  ;;  %2822 = vmatpush3.bf16.msra.mxu1 %v2884_v16  ;;  %s2915_s27 = scalar_lea.vmem %s2914_s23, 2048  ;;  %p2916_p0 = scmp.lt.s32.totalorder %s4533_s12, %s2914_s23 }
  0x2b   : > { %240 = vst [vmem:[#allocation2] sm:$0xff] %v2972_v19  ;;  %242 = vst [vmem:[#allocation2 + $0x20] sm:$0xff] %v2972_v19  ;;  %2776 = vmatpush3.bf16.msra.mxu0 %v2880_v33  ;;  %v582_v26 = vld [vmem:[#allocation2 + $0x28] sm:$0x80]  ;;  %v3223_v33 = vrot.slane %v3131_v48, %v1032_v47  ;;  %2815 = vmatprep.subr.bf16.mxu1 %v2885_v24  ;;  %p2917_p1 = scmp.lt.s32.totalorder %s2915_s27, %s2909_s20 }
  0x2c   : > { %4685 = vst [vmem:[#allocation6_spill] sm:$0xff] %v3120_v41  ;;  %4686 = vst [vmem:[#allocation7_spill] sm:$0xff] %v3125_v46  ;;  %2777 = vmatprep.subr.bf16.mxu0 %v2881_v38  ;;  %v586_v27 = vld [vmem:[#allocation2 + $0x1a8] sm:$0x80]  ;;  %v3231_v38 = vmul.f32 0.0, %v3175_v6 }
  0x2d   : > { %4687 = vst [vmem:[#allocation8_spill] sm:$0xff] %v3138_v50  ;;  %4688 = vst [vmem:[#allocation9_spill] sm:$0xff] %v3140_v51  ;;  %p2918_p2 = por %p2917_p1, %p2916_p0 }
  0x2e   : > { %2742 = vmatmul.mubr.msk.bf16.gmra.mxu0 %vm273_vm1, %v256_v15  ;;  %4689 = vst [vmem:[#allocation10_spill] sm:$0xff] %v3144_v52  ;;  %4690 = vst [vmem:[#allocation11_spill] sm:$0xff] %v3151_v57  ;;  %v3197_v15 = vrot.slane %v553_v34, %v4602_v53  ;;  %v1444_v52 = vld [vmem:[#allocation2 + $0xa8] sm:$0x80] }
  0x2f   : > { %355 = vmatprep.mubr.bf16.mxu0 %v2971_v4  ;;  %4691 = vst [vmem:[#allocation12_spill] sm:$0xff] %v3155_v58  ;;  %4692 = vst [vmem:[#allocation13_spill] sm:$0xff] %v3159_v61  ;;  %v3172_v4 = vrot.slane %v553_v34, %v1032_v47  ;;  %2778 = vmatpush3.bf16.msra.mxu0 %v2882_v56  ;;  %v3228_v34 = vrot.slane %v3131_v48, %v1120_v36  ;;  %v2886_v56 = vld [vmem:[%s4600_s3 + $0x8] sm:$0xff]   ;;  %v796_v57 = vld [vmem:[#allocation2 + $0x190] sm:$0x1]  ;;  %p2919_p3 = pnand %p2918_p2, %p2912_p13 }
  0x30   : > { %4694 = vst [vmem:[#allocation15_spill] sm:$0xff] %v3175_v6  ;;  %4695 = vst [vmem:[#allocation16_spill] sm:$0xff] %v3178_v7  ;;  %2779 = vmatprep.subr.bf16.mxu0 %v2883_v62  ;;  %v3234_v40 = vmul.f32 %v3197_v15, %v1463_v14  ;;  %v3246_v54 = vmul.f32 %v3197_v15, %v1467_v21  ;;  %v3249_v55 = vmul.f32 %v3197_v15, %v1469_v22 }
  0x31   : > { %4693 = vst [vmem:[#allocation14_spill] sm:$0xff] %v3172_v4  ;;  %4696 = vst [vmem:[#allocation17_spill] sm:$0xff] %v3181_v8  ;;  %v3204_v19 = vmul.f32 %v3172_v4, %v1022_v2  ;;  %v3207_v20 = vmul.f32 %v3172_v4, %v1026_v3  ;;  %v3256_v62 = vmul.f32 0.0, %v3159_v61  ;;  %v3259_v2 = vmul.f32 %v3185_v10, %v582_v26  ;;  %v1245_v50 = vld [vmem:[#allocation2 + $0x100] sm:$0x1] }
  0x32   : > { %4697 = vst [vmem:[#allocation18_spill] sm:$0xff] %v3185_v10  ;;  %4698 = vst [vmem:[#allocation19_spill] sm:$0xff] %v3190_v12  ;;  %v3262_v3 = vmul.f32 %v3185_v10, %v586_v27  ;;  %v3279_v21 = vmul.f32 %v3185_v10, %v562_v44  ;;  %v3288_v26 = vsel %vm885_vm2, %v4604_v42, %v1811_v43  ;;  %v570_v27 = vld [vmem:[#allocation2 + $0xa8] sm:$0x80]  ;;  %2823 = vmatpush3.bf16.msra.mxu1 %v2886_v56  ;;  %v2888_v43 = vld [vmem:[%s4600_s3] sm:$0xff]  }
  0x33   : > { %4699 = vst [vmem:[#allocation20_spill] sm:$0xff] %v3193_v13  ;;  %4700 = vst [vmem:[#allocation21_spill] sm:$0xff] %v3197_v15  ;;  %2780 = vmatpush3.bf16.msra.mxu0 %v2884_v16  ;;  %v3291_v36 = vmul.f32 %v3185_v10, %v566_v59  ;;  %2816 = vmatprep.subr.bf16.mxu1 %v2887_v5  ;;  %v3317_v8 = vmul.f32 %v3185_v10, %v574_v60  ;;  %v784_v13 = vld [vmem:[#allocation2 + $0x48] sm:$0x1]  ;;  %v1015_v15 = vld [vmem:[#allocation2 + $0x108] sm:$0x80] }
  0x34   : > { %4701 = vst [vmem:[#allocation22_spill] sm:$0xff] %v3204_v19  ;;  %4702 = vst [vmem:[#allocation23_spill] sm:$0xff] %v3207_v20  ;;  %2781 = vmatprep.subr.bf16.mxu0 %v2885_v24 }
  0x35   : > { %4703 = vst [vmem:[#allocation24_spill] sm:$0xff] %v3210_v23  ;;  %4704 = vst [vmem:[#allocation25_spill] sm:$0xff] %v3220_v31  ;;  %v1027_v23 = vld [vmem:[#allocation2 + $0x198] sm:$0x80] }
  0x36   : > { %2743 = vmatmul.mubr.msk.bf16.gmra.mxu0 %vm273_vm1, %v257_v18  ;;  %4705 = vst [vmem:[#allocation26_spill] sm:$0xff] %v3228_v34  ;;  %4706 = vst [vmem:[#allocation27_spill] sm:$0xff] %v3234_v40  ;;  %2824 = vmatpush3.bf16.msra.mxu1 %v2888_v43  ;;  %v3405_v20 = vmul.f32 %v3223_v33, %v1027_v23 }
  0x37   : > { %4707 = vst [vmem:[#allocation28_spill] sm:$0xff] %v3246_v54  ;;  %4708 = vst [vmem:[#allocation29_spill] sm:$0xff] %v3249_v55  ;;  %2782 = vmatpush3.bf16.msra.mxu0 %v2886_v56 }
  0x38   : > { %4709 = vst [vmem:[#allocation30_spill] sm:$0xff] %v3256_v62  ;;  %4710 = vst [vmem:[#allocation31_spill] sm:$0xff] %v3259_v2  ;;  %2783 = vmatprep.subr.bf16.mxu0 %v2887_v5 }
  0x39   : > { %4711 = vst [vmem:[#allocation32_spill] sm:$0xff] %v3262_v3  ;;  %4712 = vst [vmem:[#allocation33_spill] sm:$0xff] %v3276_v17 }
  0x3a   : > { %4713 = vst [vmem:[#allocation34_spill] sm:$0xff] %v3279_v21  ;;  %4714 = vst [vmem:[#allocation35_spill] sm:$0xff] %v3288_v26  ;;  %v3314_v26 = vmul.f32 %v3185_v10, %v570_v27 }
  0x3b   : > { %4715 = vst [vmem:[#allocation36_spill] sm:$0xff] %v3291_v36  ;;  %v808_v36 = vld [vmem:[#allocation2 + $0x100] sm:$0x1]  ;;  %4717 = vst [vmem:[#allocation38_spill] sm:$0xff] %v3317_v8  ;;  %2784 = vmatpush3.bf16.msra.mxu0 %v2888_v43 }
  0x3c   : > { %4716 = vst [vmem:[#allocation37_spill] sm:$0xff] %v3314_v26  ;;  %v3329_v60 = vmul.f32 %v3220_v31, %v808_v36  ;;  %v4719_v36 = vsub.s32 5, %v3100_v29  ;;  %4728 = vst [vmem:[#allocation47_spill] sm:$0xff] %v3405_v20 }
  0x3e   : > { %4718 = vst [vmem:[#allocation39_spill] sm:$0xff] %v3329_v60  ;;  %v3342_v43 = vrot.slane %v3131_v48, %v4719_v36 }
  0x40   : > { %4720 = vst [vmem:[#allocation40_spill] sm:$0xff] %v3342_v43 }
  0xde   : > { %v3098_v28 = vpop.f32.mrf.mxu0 }
  0xdf   : > { %v394_v9 = vmul.f32 %v3098_v28, %v3098_v28 }
  0xe0   : > { %v3102_v30 = vpop.f32.mrf.mxu0 }
  0xe1   : > { %v395_v37 = vmul.f32 %v3102_v30, %v3102_v30 }
  0xe2   : > { %v3118_v39 = vpop.f32.mrf.mxu0 }
  0xe3   : > { %v396_v45 = vmul.f32 %v3118_v39, %v3118_v39  ;;  %v366_v22 = vadd.f32 %v3118_v39, %v3098_v28 }
  0xe4   : > { %v3133_v49 = vpop.f32.mrf.mxu0 }
  0xe5   : > { %v397_v14 = vmul.f32 %v3133_v49, %v3133_v49  ;;  %v410_v44 = vadd.f32 %v396_v45, %v394_v9  ;;  %v379_v59 = vadd.f32 %v3133_v49, %v3102_v30 }
  0xe6   : > { %v3164_v63 = vpop.f32.mrf.mxu0 }
  0xe7   : > { %v398_v24 = vmul.f32 %v3164_v63, %v3164_v63  ;;  %v367_v42 = vadd.f32 %v366_v22, %v3164_v63  ;;  %v423_v32 = vadd.f32 %v397_v14, %v395_v37  ;;  %v578_v14 = vld [vmem:[#allocation2 + $0x108] sm:$0x80] }
  0xe8   : > { %v3187_v11 = vpop.f32.mrf.mxu0 }
  0xe9   : > { %v399_v18 = vmul.f32 %v3187_v11, %v3187_v11  ;;  %v411_v22 = vadd.f32 %v410_v44, %v398_v24  ;;  %v380_v3 = vadd.f32 %v379_v59, %v3187_v11  ;;  %v560_v59 = vld [vmem:[#allocation2 + $0x18] sm:$0x7f] }
  0xea   : > { %v3215_v25 = vpop.f32.mrf.mxu0 }
  0xeb   : > { %v400_v45 = vmul.f32 %v3215_v25, %v3215_v25  ;;  %v368_v9 = vadd.f32 %v367_v42, %v3215_v25  ;;  %v424_v37 = vadd.f32 %v423_v32, %v399_v18  ;;  %v812_v18 = vld [vmem:[#allocation2] sm:$0x1] }
  0xec   : > { %v3242_v47 = vpop.f32.mrf.mxu0  ;;  %v3354_v34 = vmul.f32 %v3220_v31, %v812_v18  ;;  %v4723_v18 = vsub.s32 6, %v3100_v29  ;;  %v3382_v29 = vld [vmem:[%s4599_s2 + $0x18] ss:$0 sm:$0xff] }
  0xed   : > { %v401_v56 = vmul.f32 %v3242_v47, %v3242_v47  ;;  %v412_v24 = vadd.f32 %v411_v22, %v400_v45  ;;  %v381_v42 = vadd.f32 %v380_v3, %v3242_v47  ;;  %v3345_v3 = vmul.f32 %v3185_v10, %v578_v14 }
  0xee   : > { %v3271_v16 = vpop.f32.mrf.mxu0  ;;  %4722 = vst [vmem:[#allocation42_spill] sm:$0xff] %v3354_v34  ;;  %v3358_v14 = vmul.f32 %v3185_v10, %v560_v59  ;;  %v3369_v36 = vrot.slane %v3131_v48, %v4723_v18  ;;  %v718_v59 = vrot.slane %v3231_v38, 1  ;;  %v1023_v48 = vld [vmem:[#allocation2 + $0x1a8] sm:$0x80] }
  0xef   : > { %v402_v5 = vmul.f32 %v3271_v16, %v3271_v16  ;;  %v369_v44 = vadd.f32 %v368_v9, %v3271_v16  ;;  %v425_v8 = vadd.f32 %v424_v37, %v401_v56  ;;  %4721 = vst [vmem:[#allocation41_spill] sm:$0xff] %v3345_v3  ;;  %v782_v37 = vld [vmem:[#allocation2 + $0x18] sm:$0xfe]  ;;  %v1249_v3 = vld [vmem:[#allocation2] sm:$0x1] }
  0xf0   : > { %v3297_v53 = vpop.f32.mrf.mxu0 }
  0xf1   : > { %v403_v2 = vmul.f32 %v3297_v53, %v3297_v53  ;;  %v413_v45 = vadd.f32 %v412_v24, %v402_v5  ;;  %v382_v9 = vadd.f32 %v381_v42, %v3297_v53 }
  0xf2   : > { %v3311_v21 = vpop.f32.mrf.mxu0 }
  0xf3   : > { %v404_v32 = vmul.f32 %v3311_v21, %v3311_v21  ;;  %v370_v22 = vadd.f32 %v369_v44, %v3311_v21  ;;  %v426_v62 = vadd.f32 %v425_v8, %v403_v2  ;;  %v1253_v8 = vld [vmem:[#allocation2 + $0x20] sm:$0x1] }
  0xf4   : > { %v3325_v55 = vpop.f32.mrf.mxu0 }
  0xf5   : > { %v405_v26 = vmul.f32 %v3325_v55, %v3325_v55  ;;  %v414_v5 = vadd.f32 %v413_v45, %v404_v32  ;;  %v383_v24 = vadd.f32 %v382_v9, %v3325_v55  ;;  %v3373_v32 = vmul.f32 %v3220_v31, %v782_v37 }
  0xf6   : > { %v3337_v27 = vpop.f32.mrf.mxu0 }
  0xf7   : > { %v406_v56 = vmul.f32 %v3337_v27, %v3337_v27  ;;  %v371_v42 = vadd.f32 %v370_v22, %v3337_v27  ;;  %v427_v2 = vadd.f32 %v426_v62, %v405_v26  ;;  %v1690_v26 = vld [vmem:[#allocation2 + $0x20] sm:$0x1] }
  0xf8   : > { %v3351_v54 = vpop.f32.mrf.mxu0 }
  0xf9   : > { %v407_v44 = vmul.f32 %v3351_v54, %v3351_v54  ;;  %v415_v45 = vadd.f32 %v414_v5, %v406_v56  ;;  %v384_v9 = vadd.f32 %v383_v24, %v3351_v54  ;;  %v3388_v56 = vmul.f32 %v3342_v43, %v1249_v3 }
  0xfa   : > { %v3364_v40 = vpop.f32.mrf.mxu0  ;;  %v3391_v5 = vmul.f32 %v3342_v43, %v1253_v8  ;;  %v750_v3 = vadd.f32 %v718_v59, %v3238_v35  ;;  %v887_v8 = vrot.slane %v3373_v32, 2  ;;  %v788_v32 = vld [vmem:[#allocation2 + $0x70] sm:$0x1] }
  0xfb   : > { %v372_v22 = vadd.f32 %v371_v42, %v3364_v40  ;;  %v408_v62 = vmul.f32 %v3364_v40, %v3364_v40  ;;  %v428_v18 = vadd.f32 %v427_v2, %v407_v44  ;;  %4724 = vst [vmem:[#allocation43_spill] sm:$0xff] %v3388_v56  ;;  %v3397_v44 = vmul.f32 %v3223_v33, %v1023_v48 }
  0xfc   : > { %v3384_v38 = vpop.f32.mrf.mxu0  ;;  %4725 = vst [vmem:[#allocation44_spill] sm:$0xff] %v3391_v5  ;;  %v3400_v2 = vmul.f32 %v3382_v29, %v1690_v26  ;;  %v3409_v48 = vmul.f32 0.0, %v3276_v17  ;;  %v824_v26 = vmul.f32 %v3220_v31, %v784_v13  ;;  %v792_v13 = vld [vmem:[#allocation2 + $0xf0] sm:$0x1]  ;;  %v1237_v5 = vld [vmem:[#allocation2 + $0x88] sm:$0x1] }
  0xfd   : > { %v373_v24 = vrot.slane %v372_v22, 4  ;;  %v416_v42 = vadd.f32 %v415_v45, %v408_v62  ;;  %v385_v60 = vadd.f32 %v384_v9, %v3384_v38  ;;  %v409_v10 = vmul.f32 %v3384_v38, %v3384_v38  ;;  %4726 = vst [vmem:[#allocation45_spill] sm:$0xff] %v3397_v44  ;;  %v1692_v9 = vld [vmem:[#allocation2 + $0xe0] sm:$0xfe] }
  0xfe   : > { %4727 = vst [vmem:[#allocation46_spill] sm:$0xff] %v3400_v2  ;;  %4729 = vst [vmem:[#allocation48_spill] sm:$0xff] %v3409_v48  ;;  %v800_v2 = vld [vmem:[#allocation2 + $0x88] sm:$0x1] }
  0xff   : > { %v374_v37 = vadd.f32 %v373_v24, %v372_v22  ;;  %v417_v34 = vrot.slane %v416_v42, 4  ;;  %v386_v45 = vrot.slane %v385_v60, 4  ;;  %v429_v62 = vadd.f32 %v428_v18, %v409_v10  ;;  %v999_v22 = vld [vmem:[#allocation2 + $0x1a0] sm:$0x80] }
 0x100   : > { %v3414_v10 = vmul.f32 %v3382_v29, %v1692_v9  ;;  %v3417_v18 = vadd.f32 %v887_v8, %v750_v3 }
 0x101   : > { %v375_v44 = vrot.slane %v374_v37, 2  ;;  %v418_v19 = vadd.f32 %v417_v34, %v416_v42  ;;  %v387_v35 = vadd.f32 %v386_v45, %v385_v60  ;;  %v430_v7 = vrot.slane %v429_v62, 4 }
 0x102   : > { %v3421_v60 = vmul.f32 %v3220_v31, %v788_v32  ;;  %v890_v42 = vrot.slane %v824_v26, 2  ;;  %v3424_v45 = vmul.f32 %v3223_v33, %v999_v22  ;;  %v3434_v32 = vmul.f32 %v3220_v31, %v796_v57 }
 0x103   : > { %v376_v12 = vadd.f32 %v375_v44, %v374_v37  ;;  %v419_v56 = vrot.slane %v418_v19, 2  ;;  %v388_v20 = vrot.slane %v387_v35, 2  ;;  %v431_v17 = vadd.f32 %v430_v7, %v429_v62  ;;  %v804_v37 = vld [vmem:[#allocation2 + $0xf8] sm:$0x1] }
 0x104   : > { %4730 = vst [vmem:[#allocation49_spill] sm:$0xff] %v3421_v60  ;;  %v3428_v7 = vadd.f32 %v718_v59, %v3358_v14  ;;  %v3431_v62 = vmul.f32 %v3220_v31, %v792_v13  ;;  %4732 = vst [vmem:[#allocation51_spill] sm:$0xff] %v3434_v32  ;;  %v891_v14 = vsel %vm885_vm2, %v887_v8, %v890_v42  ;;  %v1233_v13 = vld [vmem:[#allocation2 + $0x190] sm:$0x1] }
 0x105   : > { %v377_v9 = vrot.slane %v376_v12, 1  ;;  %v420_v24 = vadd.f32 %v419_v56, %v418_v19  ;;  %v389_v23 = vadd.f32 %v388_v20, %v387_v35  ;;  %v432_v3 = vrot.slane %v431_v17, 2  ;;  %v1225_v19 = vld [vmem:[#allocation2 + $0x70] sm:$0x1] }
 0x106   : > { %4731 = vst [vmem:[#allocation50_spill] sm:$0xff] %v3431_v62  ;;  %v1229_v20 = vld [vmem:[#allocation2 + $0xf0] sm:$0x1]  ;;  %v3437_v56 = vmul.f32 %v3220_v31, %v800_v2  ;;  %v3440_v35 = vmul.f32 %v3220_v31, %v804_v37  ;;  %v3449_v37 = vmul.f32 %v3342_v43, %v1225_v19  ;;  %v3462_v2 = vmul.f32 %v3342_v43, %v1237_v5  ;;  %v1470_v62 = vld [vmem:[#allocation2 + $0xe0] sm:$0x7f] }
 0x107   : > { %v378_v26 = vadd.f32 %v377_v9, %v376_v12  ;;  %v421_v22 = vrot.slane %v420_v24, 1  ;;  %v390_v34 = vrot.slane %v389_v23, 1  ;;  %v433_v48 = vadd.f32 %v432_v3, %v431_v17  ;;  %v1241_v17 = vld [vmem:[#allocation2 + $0xf8] sm:$0x1] }
 0x108   : > { %4733 = vst [vmem:[#allocation52_spill] sm:$0xff] %v3437_v56  ;;  %4734 = vst [vmem:[#allocation53_spill] sm:$0xff] %v3440_v35  ;;  %v3452_v8 = vmul.f32 %v3342_v43, %v1229_v20  ;;  %v3465_v19 = vmul.f32 %v3342_v43, %v1241_v17  ;;  %v685_v20 = vmul.f32 0.0, %v3140_v51  ;;  %v3473_v5 = vmul.f32 %v3342_v43, %v1245_v50  ;;  %v1007_v35 = vld [vmem:[#allocation2 + $0xa8] sm:$0x80] }
 0x109   : > { %v422_v44 = vadd.f32 %v421_v22, %v420_v24  ;;  %v3444_v57 = vmul.f32 0.015625, %v378_v26  ;;  %v391_v12 = vadd.f32 %v390_v34, %v389_v23  ;;  %v434_v9 = vrot.slane %v433_v48, 1  ;;  %4735 = vst [vmem:[#allocation54_spill] sm:$0xff] %v3449_v37  ;;  %v557_v34 = vld [vmem:[#allocation2 + $0x120] sm:$0x80]  ;;  %4738 = vst [vmem:[#allocation57_spill] sm:$0xff] %v3462_v2 }
 0x10a   : > { %4736 = vst [vmem:[#allocation55_spill] sm:$0xff] %v3452_v8  ;;  %v3457_v23 = vmul.f32 %v3342_v43, %v1233_v13  ;;  %v559_v22 = vld [vmem:[#allocation2 + $0x188] sm:$0x7f]  ;;  %4739 = vst [vmem:[#allocation58_spill] sm:$0xff] %v3465_v19  ;;  %v597_v17 = vmul.f32 %v3120_v41, %v557_v34  ;;  %v1011_v56 = vld [vmem:[#allocation2 + $0x170] sm:$0x80] }
 0x10b   : > { %v457_v42 = vmul.f32 0.015625, %v422_v44  ;;  %v459_v24 = vmul.f32 %v3444_v57, %v3444_v57  ;;  %v435_v26 = vadd.f32 %v434_v9, %v433_v48  ;;  %v3459_v3 = vmul.f32 0.015625, %v391_v12  ;;  %v1464_v9 = vld [vmem:[#allocation2 + $0x198] sm:$0x80]  ;;  %v1468_v12 = vld [vmem:[#allocation2 + $0x1c8] sm:$0x80] }
 0x10c   : > { %4737 = vst [vmem:[#allocation56_spill] sm:$0xff] %v3457_v23  ;;  %4740 = vst [vmem:[#allocation59_spill] sm:$0xff] %v3473_v5  ;;  %v599_v60 = vmul.f32 %v3120_v41, %v559_v22  ;;  %v1694_v43 = vld [vmem:[#allocation2 + $0xc8] sm:$0x1]  ;;  %v717_v34 = vrot.slane %v685_v20, 1  ;;  %v3483_v22 = vmul.f32 %v3369_v36, %v1464_v9  ;;  %v3497_v20 = vadd.f32 %v3424_v45, %v3417_v18 }
 0x10d   : > { %v461_v44 = vsub.f32 %v457_v42, %v459_v24  ;;  %v458_v59 = vmul.f32 0.015625, %v435_v26  ;;  %v460_v13 = vmul.f32 %v3459_v3, %v3459_v3  ;;  %v1003_v42 = vld [vmem:[#allocation2 + $0x30] sm:$0x80]  ;;  %v3489_v26 = vmul.f32 %v3369_v36, %v1470_v62  ;;  %v1019_v24 = vld [vmem:[#allocation2 + $0x28] sm:$0x80] }
 0x10e   : > { %v1440_v2 = vld [vmem:[#allocation2 + $0x30] sm:$0x80]  ;;  %v749_v50 = vadd.f32 %v717_v34, %v597_v17  ;;  %v751_v19 = vadd.f32 %v717_v34, %v599_v60  ;;  %4741 = vst [vmem:[#allocation60_spill] sm:$0xff] %v3497_v20  ;;  %v1666_v9 = vld [vmem:[#allocation2 + $0xf0] sm:$0x1]  ;;  %v1734_v23 = vmul.f32 %v3382_v29, %v1694_v43  ;;  %v3501_v8 = vmul.f32 %v3223_v33, %v1003_v42 }
 0x10f   : > { %v463_v31 = vmax.f32 %v461_v44, 0.0  ;;  %v462_v32 = vsub.f32 %v458_v59, %v460_v13  ;;  %v3486_v44 = vmul.f32 %v3369_v36, %v1468_v12  ;;  %v781_v59 = vld [vmem:[#allocation2 + $0x188] sm:$0xfe]  ;;  %v783_v13 = vld [vmem:[#allocation2 + $0x1d0] sm:$0x1]  ;;  %v3509_v18 = vmul.f32 %v3223_v33, %v1011_v56 }
 0x110   : > { %v1670_v62 = vld [vmem:[#allocation2 + $0x190] sm:$0x1]  ;;  %v1674_v12 = vld [vmem:[#allocation2 + $0x88] sm:$0x1]  ;;  %v1448_v17 = vld [vmem:[#allocation2 + $0x170] sm:$0x80]  ;;  %v823_v60 = vmul.f32 %v3125_v46, %v783_v13  ;;  %v3512_v45 = vmul.f32 %v3223_v33, %v1015_v15  ;;  %v3515_v43 = vmul.f32 %v3223_v33, %v1019_v24  ;;  %v3530_v24 = vmul.f32 %v3369_v36, %v1444_v52 }
 0x111   : > { %v465_v6 = vadd.f32 1e-05, %v463_v31  ;;  %v464_v48 = vmax.f32 %v462_v32, 0.0  ;;  %v3493_v31 = vadd.f32 %v891_v14, %v3428_v7  ;;  %v3506_v7 = vmul.f32 %v3223_v33, %v1007_v35  ;;  %v1452_v14 = vld [vmem:[#allocation2 + $0x108] sm:$0x80] }
 0x112   : > { %4742 = vst [vmem:[#allocation61_spill] sm:$0xff] %v3512_v45  ;;  %4743 = vst [vmem:[#allocation62_spill] sm:$0xff] %v3515_v43  ;;  %v1678_v42 = vld [vmem:[#allocation2 + $0xf8] sm:$0x1]  ;;  %v1460_v34 = vld [vmem:[#allocation2 + $0x1a8] sm:$0x80]  ;;  %v3521_v35 = vmul.f32 %v3382_v29, %v1666_v9  ;;  %v3524_v56 = vmul.f32 %v3382_v29, %v1670_v62  ;;  %v3527_v15 = vmul.f32 %v3382_v29, %v1674_v12 }
 0x113   : > { %2889 = vrsqrt.f32 %v465_v6  ;;  %v466_v32 = vadd.f32 1e-05, %v464_v48  ;;  %v821_v6 = vmul.f32 %v3125_v46, %v781_v59  ;;  %v1456_v48 = vld [vmem:[#allocation2 + $0x28] sm:$0x80]  ;;  %v3518_v59 = vmul.f32 %v3369_v36, %v1440_v2  ;;  %v1682_v13 = vld [vmem:[#allocation2 + $0x100] sm:$0x1] }
 0x114   : > { %v1686_v5 = vld [vmem:[#allocation2] sm:$0x1]  ;;  %4745 = vst [vmem:[#allocation64_spill] sm:$0xff] %v3521_v35  ;;  %4746 = vst [vmem:[#allocation65_spill] sm:$0xff] %v3524_v56  ;;  %v3533_v37 = vmul.f32 %v3369_v36, %v1448_v17  ;;  %v1813_v2 = vrot.slane %v1734_v23, 2  ;;  %v3539_v9 = vmul.f32 %v3382_v29, %v1678_v42  ;;  %v888_v45 = vrot.slane %v823_v60, 2 }
 0x115   : > { %4744 = vst [vmem:[#allocation63_spill] sm:$0xff] %v3518_v59  ;;  %4747 = vst [vmem:[#allocation66_spill] sm:$0xff] %v3527_v15  ;;  %2891 = vrsqrt.f32 %v466_v32  ;;  %v3536_v59 = vmul.f32 %v3369_v36, %v1452_v14  ;;  %v787_v20 = vld [vmem:[#allocation2 + $0x8] sm:$0x1]  ;;  %v791_v62 = vld [vmem:[#allocation2 + $0x150] sm:$0x1]  ;;  %v3542_v12 = vmul.f32 %v3369_v36, %v1456_v48  ;;  %v3545_v52 = vmul.f32 %v3369_v36, %v1460_v34 }
 0x116   : > { %4748 = vst [vmem:[#allocation67_spill] sm:$0xff] %v3530_v24  ;;  %4749 = vst [vmem:[#allocation68_spill] sm:$0xff] %v3533_v37  ;;  %v886_v43 = vrot.slane %v821_v6, 2  ;;  %v3548_v32 = vmul.f32 %v3382_v29, %v1682_v13  ;;  %v3551_v23 = vmul.f32 %v3382_v29, %v1686_v5  ;;  %v795_v17 = vld [vmem:[#allocation2 + $0x178] sm:$0x1]  ;;  %v3558_v13 = vmul.f32 %v3125_v46, %v787_v20 }
 0x117   : > { %4750 = vst [vmem:[#allocation69_spill] sm:$0xff] %v3536_v59  ;;  %4751 = vst [vmem:[#allocation70_spill] sm:$0xff] %v3539_v9  ;;  %v799_v14 = vld [vmem:[#allocation2 + $0xb0] sm:$0x1]  ;;  %v803_v42 = vld [vmem:[#allocation2 + $0x1c0] sm:$0x1]  ;;  %v3561_v5 = vmul.f32 %v3125_v46, %v791_v62  ;;  %v3569_v60 = vmul.f32 %v3125_v46, %v795_v17 }
 0x118   : > { %4752 = vst [vmem:[#allocation71_spill] sm:$0xff] %v3542_v12  ;;  %4753 = vst [vmem:[#allocation72_spill] sm:$0xff] %v3545_v52  ;;  %v561_v48 = vld [vmem:[#allocation2 + $0x110] sm:$0x80]  ;;  %v889_v12 = vsel %vm885_vm2, %v886_v43, %v888_v45  ;;  %v565_v34 = vld [vmem:[#allocation2 + $0xb8] sm:$0x80]  ;;  %v3563_v37 = vadd.f32 %v886_v43, %v749_v50  ;;  %v3572_v45 = vmul.f32 %v3125_v46, %v799_v14 }
 0x119   : > { %4754 = vst [vmem:[#allocation73_spill] sm:$0xff] %v3548_v32  ;;  %4755 = vst [vmem:[#allocation74_spill] sm:$0xff] %v3551_v23  ;;  %v569_v52 = vld [vmem:[#allocation2 + $0x50] sm:$0x80]  ;;  %v3565_v24 = vadd.f32 %v889_v12, %v751_v19  ;;  %v573_v6 = vld [vmem:[#allocation2 + $0x148] sm:$0x80]  ;;  %v3575_v20 = vmul.f32 %v3125_v46, %v803_v42  ;;  %v3585_v12 = vmul.f32 %v3120_v41, %v561_v48 }
 0x11a   : > { %4756 = vst [vmem:[#allocation75_spill] sm:$0xff] %v3558_v13  ;;  %4757 = vst [vmem:[#allocation76_spill] sm:$0xff] %v3561_v5  ;;  %v577_v56 = vld [vmem:[#allocation2 + $0x90] sm:$0x80]  ;;  %v4763_v19 = vrot.slane %v3414_v10, 2  ;;  %v469_v59 = vsub.f32 0.0, %v3444_v57  ;;  %v3590_v42 = vmul.f32 %v3120_v41, %v565_v34  ;;  %v3593_v62 = vmul.f32 %v3120_v41, %v569_v52 }
 0x11b   : > { %4758 = vst [vmem:[#allocation77_spill] sm:$0xff] %v3563_v37  ;;  %4759 = vst [vmem:[#allocation78_spill] sm:$0xff] %v3565_v24  ;;  %v998_v17 = vld [vmem:[#allocation2 + $0x110] sm:$0x80]  ;;  %v470_v14 = vsub.f32 0.0, %v3459_v3  ;;  %v3596_v50 = vmul.f32 %v3120_v41, %v573_v6 }
 0x11c   : > { %4760 = vst [vmem:[#allocation79_spill] sm:$0xff] %v3569_v60  ;;  %4761 = vst [vmem:[#allocation80_spill] sm:$0xff] %v3572_v45  ;;  %v3582_v43 = vsel %vm885_vm2, %v4763_v19, %v1813_v2  ;;  %v3599_v2 = vmul.f32 %v3120_v41, %v577_v56  ;;  %v3607_v52 = vmul.f32 %v3172_v4, %v998_v17  ;;  %v4819_v23 = vld [vmem:[#allocation40_spill] sm:$0xff] }
 0x11d   : > { %4762 = vst [vmem:[#allocation81_spill] sm:$0xff] %v3575_v20  ;;  %4764 = vst [vmem:[#allocation82_spill] sm:$0xff] %v3582_v43  ;;  %v4825_v43 = vld [vmem:[#allocation47_spill] sm:$0xff] }
 0x11e   : > { %4765 = vst [vmem:[#allocation83_spill] sm:$0xff] %v3585_v12  ;;  %4766 = vst [vmem:[#allocation84_spill] sm:$0xff] %v3590_v42 }
 0x11f   : > { %4767 = vst [vmem:[#allocation85_spill] sm:$0xff] %v3593_v62  ;;  %4768 = vst [vmem:[#allocation86_spill] sm:$0xff] %v3596_v50 }
 0x120   : > { %4769 = vst [vmem:[#allocation87_spill] sm:$0xff] %v3599_v2  ;;  %v2890_v24 = vpop.eup %2889  ;;  %4770 = vst [vmem:[#allocation88_spill] sm:$0xff] %v3607_v52 }
 0x121   : > { %v471_v37 = vmul.f32 %v2890_v24, %v469_v59  ;;  %v489_v6 = vmul.f32 %v2890_v24, %v3098_v28  ;;  %v491_v56 = vmul.f32 %v2890_v24, %v3118_v39  ;;  %v493_v2 = vmul.f32 %v2890_v24, %v3164_v63 }
 0x122   : > { %v495_v48 = vmul.f32 %v2890_v24, %v3215_v25  ;;  %v497_v19 = vmul.f32 %v2890_v24, %v3271_v16  ;;  %v499_v57 = vmul.f32 %v2890_v24, %v3311_v21  ;;  %v501_v3 = vmul.f32 %v2890_v24, %v3337_v27  ;;  %v2892_v59 = vpop.eup %2891 }
 0x123   : > { %v503_v34 = vmul.f32 %v2890_v24, %v3364_v40  ;;  %v505_v20 = vadd.f32 %v489_v6, %v471_v37  ;;  %v507_v17 = vadd.f32 %v491_v56, %v471_v37  ;;  %v509_v52 = vadd.f32 %v493_v2, %v471_v37 }
 0x124   : > { %v511_v45 = vadd.f32 %v495_v48, %v471_v37  ;;  %v513_v28 = vadd.f32 %v497_v19, %v471_v37  ;;  %v515_v60 = vadd.f32 %v499_v57, %v471_v37  ;;  %v517_v39 = vadd.f32 %v501_v3, %v471_v37 }
 0x125   : > { %v519_v5 = vadd.f32 %v503_v34, %v471_v37  ;;  %v521_v63 = vmax.f32 %v505_v20, 0.0  ;;  %v523_v13 = vmax.f32 %v507_v17, 0.0  ;;  %v525_v25 = vmax.f32 %v509_v52, 0.0  ;;  %v1002_v34 = vld [vmem:[#allocation2 + $0xb8] sm:$0x80] }
 0x126   : > { %v527_v50 = vmax.f32 %v511_v45, 0.0  ;;  %v529_v16 = vmax.f32 %v513_v28, 0.0  ;;  %v531_v62 = vmax.f32 %v515_v60, 0.0  ;;  %v533_v21 = vmax.f32 %v517_v39, 0.0  ;;  %v1006_v52 = vld [vmem:[#allocation2 + $0x50] sm:$0x80] }
 0x127   : > { %v535_v42 = vmax.f32 %v519_v5, 0.0  ;;  %537 = vst [vmem:[#allocation2 + $0x10] sm:$0xff] %v521_v63  ;;  %539 = vst [vmem:[#allocation2 + $0x98] sm:$0xff] %v523_v13  ;;  %v472_v40 = vmul.f32 %v2892_v59, %v470_v14  ;;  %v490_v27 = vmul.f32 %v2892_v59, %v3102_v30  ;;  %v492_v24 = vmul.f32 %v2892_v59, %v3133_v49 }
 0x128   : > { %541 = vst [vmem:[#allocation2 + $0x38] sm:$0xff] %v525_v25  ;;  %543 = vst [vmem:[#allocation2 + $0xd8] sm:$0xff] %v527_v50  ;;  %v697_v37 = vmul.f32 %v3140_v51, %v531_v62  ;;  %v699_v45 = vmul.f32 %v3140_v51, %v533_v21  ;;  %v3622_v60 = vmul.f32 %v3155_v58, %v533_v21 }
 0x129   : > { %545 = vst [vmem:[#allocation2 + $0x78] sm:$0xff] %v529_v16  ;;  %547 = vst [vmem:[#allocation2 + $0x168] sm:$0xff] %v531_v62  ;;  %v494_v5 = vmul.f32 %v2892_v59, %v3187_v11  ;;  %v3626_v13 = vmul.f32 %v3155_v58, %v535_v42  ;;  %v3629_v30 = vmul.f32 %v3159_v61, %v535_v42  ;;  %v4776_v11 = vld [vmem:[#allocation10_spill] sm:$0xff]  ;;  %v4777_v58 = vld [vmem:[#allocation21_spill] sm:$0xff] }
 0x12a   : > { %549 = vst [vmem:[#allocation2 + $0x40] sm:$0xff] %v533_v21  ;;  %551 = vst [vmem:[#allocation2 + $0x68] sm:$0xff] %v535_v42  ;;  %v496_v49 = vmul.f32 %v2892_v59, %v3242_v47  ;;  %v498_v20 = vmul.f32 %v2892_v59, %v3297_v53  ;;  %v729_v50 = vrot.slane %v697_v37, 1  ;;  %v731_v62 = vrot.slane %v699_v45, 1 }
 0x12b   : > { %v500_v2 = vmul.f32 %v2892_v59, %v3325_v55  ;;  %v502_v19 = vmul.f32 %v2892_v59, %v3351_v54  ;;  %v504_v57 = vmul.f32 %v2892_v59, %v3384_v38  ;;  %v506_v3 = vadd.f32 %v490_v27, %v472_v40 }
 0x12c   : > { %v773_v42 = vadd.f32 %v729_v50, %v3167_v0  ;;  %v777_v47 = vadd.f32 %v731_v62, %v3170_v1  ;;  %v508_v53 = vadd.f32 %v492_v24, %v472_v40  ;;  %v510_v6 = vadd.f32 %v494_v5, %v472_v40 }
 0x12d   : > { %v512_v56 = vadd.f32 %v496_v49, %v472_v40  ;;  %v514_v17 = vadd.f32 %v498_v20, %v472_v40  ;;  %v3641_v55 = vadd.f32 %v500_v2, %v472_v40  ;;  %v518_v28 = vadd.f32 %v502_v19, %v472_v40  ;;  %v4775_v2 = vld [vmem:[#allocation15_spill] sm:$0xff] }
 0x12e   : > { %v3643_v39 = vadd.f32 %v504_v57, %v472_v40  ;;  %v3645_v63 = vmax.f32 %v506_v3, 0.0  ;;  %v3647_v54 = vmax.f32 %v508_v53, 0.0  ;;  %v563_v38 = vld [vmem:[#allocation2 + $0x10] sm:$0x7f]  ;;  %v567_v0 = vld [vmem:[#allocation2 + $0x98] sm:$0x7f]  ;;  %v3656_v27 = vmul.f32 %v3172_v4, %v1002_v34 }
 0x12f   : > { %v3650_v16 = vmul.f32 %v3120_v41, %v563_v38  ;;  %v3653_v21 = vmul.f32 %v3120_v41, %v567_v0  ;;  %v3659_v40 = vmul.f32 %v3172_v4, %v1006_v52 }
 0x130   : > { %v583_v59 = vld [vmem:[#allocation2 + $0x168] sm:$0x7f]  ;;  %4773 = vst [vmem:[#allocation91_spill] sm:$0xff] %v3656_v27  ;;  %538 = vst [vmem:[#allocation2 + $0x1d8] sm:$0xff] %v3645_v63  ;;  %v3668_v19 = vmul.f32 %v4775_v2, %v3645_v63  ;;  %v3675_v0 = vmul.f32 %v4775_v2, %v3647_v54 }
 0x131   : > { %v587_v1 = vld [vmem:[#allocation2 + $0x40] sm:$0x7f]  ;;  %v805_v25 = vld [vmem:[#allocation2 + $0x168] sm:$0xfe]  ;;  %4771 = vst [vmem:[#allocation89_spill] sm:$0xff] %v3650_v16  ;;  %4772 = vst [vmem:[#allocation90_spill] sm:$0xff] %v3653_v21  ;;  %v623_v24 = vmul.f32 %v3120_v41, %v583_v59 }
 0x132   : > { %4774 = vst [vmem:[#allocation92_spill] sm:$0xff] %v3659_v40  ;;  %v627_v37 = vmul.f32 %v3120_v41, %v587_v1  ;;  %v809_v45 = vld [vmem:[#allocation2 + $0x40] sm:$0xfe]  ;;  %v845_v5 = vmul.f32 %v3125_v46, %v805_v25  ;;  %v1028_v20 = vld [vmem:[#allocation2 + $0x68] sm:$0x7f]  ;;  %540 = vst [vmem:[#allocation2 + $0x180] sm:$0xff] %v3647_v54 }
 0x133   : > { %v1024_v49 = vld [vmem:[#allocation2 + $0x40] sm:$0x7f]  ;;  %v849_v57 = vmul.f32 %v3125_v46, %v809_v45  ;;  %v1068_v53 = vmul.f32 %v3172_v4, %v1028_v20  ;;  %v1250_v52 = vld [vmem:[#allocation2 + $0x68] sm:$0xfe]  ;;  %v775_v59 = vadd.f32 %v729_v50, %v623_v24  ;;  %v4778_v40 = vld [vmem:[#allocation8_spill] sm:$0xff]  ;;  %v3684_v46 = vmax.f32 %v510_v6, 0.0 }
 0x134   : > { %v1064_v3 = vmul.f32 %v3172_v4, %v1024_v49  ;;  %v1246_v34 = vld [vmem:[#allocation2 + $0x40] sm:$0xfe]  ;;  %v1465_v38 = vld [vmem:[#allocation2 + $0x68] sm:$0x7f]  ;;  %v779_v1 = vadd.f32 %v731_v62, %v627_v37  ;;  %v922_v25 = vrot.slane %v845_v5, 2  ;;  %v1290_v45 = vmul.f32 %v4776_v11, %v1250_v52  ;;  %v4781_v50 = vld [vmem:[#allocation16_spill] sm:$0xff] }
 0x135   : > { %v1286_v48 = vmul.f32 %v4776_v11, %v1246_v34  ;;  %v1687_v14 = vld [vmem:[#allocation2 + $0x68] sm:$0xfe]  ;;  %v928_v61 = vrot.slane %v849_v57, 2  ;;  %v1505_v49 = vmul.f32 %v4777_v58, %v1465_v38  ;;  %v4782_v62 = vrot.slane %v4781_v50, 2  ;;  %v4783_v52 = vld [vmem:[#allocation22_spill] sm:$0xff]  ;;  %542 = vst [vmem:[#allocation2 + $0x158] sm:$0xff] %v3684_v46 }
 0x136   : > { %v1727_v20 = vmul.f32 %v4778_v40, %v1687_v14  ;;  %v4779_v27 = vld [vmem:[#allocation11_spill] sm:$0xff]  ;;  %v990_v16 = vadd.f32 %v922_v25, %v773_v42  ;;  %v1368_v57 = vrot.slane %v1290_v45, 2  ;;  %v4787_v6 = vld [vmem:[#allocation20_spill] sm:$0xff] }
 0x137   : > { %v4780_v4 = vrot.slane %v4779_v27, 2  ;;  %v1362_v12 = vrot.slane %v1286_v48, 2  ;;  %v931_v24 = vsel %vm885_vm2, %v928_v61, %v4782_v62  ;;  %v994_v5 = vadd.f32 %v928_v61, %v777_v47  ;;  %v4784_v58 = vld [vmem:[#allocation19_spill] sm:$0xff]  ;;  %v564_v61 = vld [vmem:[#allocation2 + $0x1d8] sm:$0x7f] }
 0x138   : > { %v996_v34 = vadd.f32 %v931_v24, %v779_v1  ;;  %v1094_v38 = vadd.f32 %v4783_v52, %v990_v16  ;;  %v4785_v14 = vrot.slane %v4784_v58, 2  ;;  %v1803_v40 = vrot.slane %v1727_v20, 2  ;;  %v4786_v48 = vld [vmem:[#allocation23_spill] sm:$0xff]  ;;  %v4790_v58 = vld [vmem:[#allocation24_spill] sm:$0xff] }
 0x139   : > { %v925_v21 = vsel %vm885_vm2, %v922_v25, %v4780_v4  ;;  %v1098_v42 = vadd.f32 %v4786_v48, %v994_v5  ;;  %v4788_v25 = vrot.slane %v4787_v6, 2  ;;  %v4789_v16 = vrot.slane %v3622_v60, 1  ;;  %v4795_v60 = vld [vmem:[#allocation18_spill] sm:$0xff]  ;;  %v4798_v6 = vld [vmem:[#allocation28_spill] sm:$0xff] }
 0x13a   : > { %v992_v37 = vadd.f32 %v925_v21, %v775_v59  ;;  %v1365_v27 = vsel %vm885_vm2, %v1362_v12, %v4785_v14  ;;  %v3698_v21 = vmax.f32 %v512_v56, 0.0  ;;  %v1100_v47 = vadd.f32 %v1068_v53, %v996_v34  ;;  %v4797_v48 = vld [vmem:[#allocation26_spill] sm:$0xff] }
 0x13b   : > { %v1371_v50 = vsel %vm885_vm2, %v1368_v57, %v4788_v25  ;;  %v1214_v59 = vadd.f32 %v4789_v16, %v1094_v38  ;;  %v4791_v1 = vrot.slane %v4790_v58, 2  ;;  %v3705_v20 = vmax.f32 %v514_v17, 0.0 }
 0x13c   : > { %v1096_v4 = vadd.f32 %v1064_v3, %v992_v37  ;;  %v4792_v3 = vmov %v4789_v16  ;;  %v4793_v24 = vrot.slane %v3626_v13, 1  ;;  %v3712_v56 = vmax.f32 %v3641_v55, 0.0  ;;  %544 = vst [vmem:[#allocation2 + $0x58] sm:$0xff] %v3698_v21  ;;  %v568_v16 = vld [vmem:[#allocation2 + $0x180] sm:$0x7f] }
 0x13d   : > { %v1806_v45 = vsel %vm885_vm2, %v1803_v40, %v4791_v1  ;;  %v3714_v5 = vmax.f32 %v518_v28, 0.0  ;;  %v1430_v52 = vadd.f32 %v1362_v12, %v1214_v59  ;;  %v536_v17 = vmax.f32 %v3643_v39, 0.0  ;;  %546 = vst [vmem:[#allocation2 + $0x60] sm:$0xff] %v3705_v20  ;;  %v4796_v28 = vld [vmem:[#allocation27_spill] sm:$0xff]  ;;  %v4799_v59 = vld [vmem:[#allocation29_spill] sm:$0xff] }
 0x13e   : > { %v1216_v62 = vadd.f32 %v4792_v3, %v1096_v4  ;;  %v1218_v37 = vadd.f32 %v4793_v24, %v1098_v42  ;;  %v4794_v53 = vmov %v4793_v24  ;;  %v3722_v38 = vmul.f32 %v4795_v60, %v564_v61  ;;  %548 = vst [vmem:[#allocation2 + $0xc0] sm:$0xff] %v3712_v56  ;;  %v572_v24 = vld [vmem:[#allocation2 + $0x158] sm:$0x7f] }
 0x13f   : > { %v1220_v34 = vadd.f32 %v4794_v53, %v1100_v47  ;;  %550 = vst [vmem:[#allocation2 + $0x1b0] sm:$0xff] %v3714_v5  ;;  %v698_v55 = vmul.f32 %v4775_v2, %v3712_v56  ;;  %v700_v13 = vmul.f32 %v4775_v2, %v3714_v5  ;;  %v1535_v39 = vadd.f32 %v4796_v28, %v1430_v52 }
 0x140   : > { %v1432_v14 = vadd.f32 %v1365_v27, %v1216_v62  ;;  %v1434_v4 = vadd.f32 %v1368_v57, %v1218_v37  ;;  %552 = vst [vmem:[#allocation2 + $0x160] sm:$0xff] %v536_v17  ;;  %v3733_v42 = vmul.f32 %v4797_v48, %v3714_v5  ;;  %v3736_v57 = vmul.f32 %v4797_v48, %v536_v17 }
 0x141   : > { %v1436_v12 = vadd.f32 %v1371_v50, %v1220_v34  ;;  %v730_v61 = vrot.slane %v698_v55, 1  ;;  %v732_v47 = vrot.slane %v700_v13, 1  ;;  %v4800_v50 = vrot.slane %v3629_v30, 1  ;;  %v4802_v34 = vld [vmem:[#allocation30_spill] sm:$0xff]  ;;  %v4805_v55 = vld [vmem:[#allocation32_spill] sm:$0xff] }
 0x142   : > { %v1537_v27 = vadd.f32 %v1505_v49, %v1432_v14  ;;  %v1539_v25 = vadd.f32 %v4798_v6, %v1434_v4  ;;  %v4803_v49 = vrot.slane %v4802_v34, 1  ;;  %v4804_v14 = vld [vmem:[#allocation31_spill] sm:$0xff]  ;;  %v3758_v62 = vmul.f32 %v4795_v60, %v568_v16 }
 0x143   : > { %v1541_v58 = vadd.f32 %v4799_v59, %v1436_v12  ;;  %v1655_v1 = vadd.f32 %v4800_v50, %v1535_v39  ;;  %v4801_v37 = vmov %v4800_v50  ;;  %v774_v4 = vadd.f32 %v730_v61, %v4804_v14  ;;  %v4808_v39 = vld [vmem:[#allocation33_spill] sm:$0xff] }
 0x144   : > { %v1657_v53 = vadd.f32 %v4801_v37, %v1537_v27  ;;  %v1659_v52 = vadd.f32 %v4803_v49, %v1539_v25  ;;  %v778_v13 = vadd.f32 %v732_v47, %v4805_v55  ;;  %v4806_v12 = vmov %v4803_v49  ;;  %v576_v50 = vld [vmem:[#allocation2 + $0x58] sm:$0x7f] }
 0x145   : > { %v1661_v28 = vadd.f32 %v4806_v12, %v1541_v58  ;;  %v3752_v6 = vadd.f32 %v1803_v40, %v1655_v1  ;;  %v3755_v59 = vmul.f32 %v4808_v39, %v536_v17  ;;  %v4810_v27 = vld [vmem:[#allocation17_spill] sm:$0xff]  ;;  %v3767_v49 = vmul.f32 %v4795_v60, %v572_v24  ;;  %v4813_v40 = vld [vmem:[#allocation35_spill] sm:$0xff]  ;;  %v806_v12 = vld [vmem:[#allocation2 + $0xc0] sm:$0xfe] }
 0x146   : > { %v3760_v30 = vadd.f32 %v1806_v45, %v1657_v53  ;;  %v4811_v25 = vrot.slane %v4810_v27, 2  ;;  %v3770_v58 = vmul.f32 %v4795_v60, %v576_v50  ;;  %v584_v45 = vld [vmem:[#allocation2 + $0xc0] sm:$0x7f]  ;;  %v588_v53 = vld [vmem:[#allocation2 + $0x1b0] sm:$0x7f]  ;;  %v4818_v17 = vld [vmem:[#allocation25_spill] sm:$0xff] }
 0x147   : > { %4807 = vst [vmem:[#allocation15_spill] sm:$0xff] %v3752_v6  ;;  %v3773_v1 = vadd.f32 %v4813_v40, %v1661_v28  ;;  %v3778_v16 = vmul.f32 %v3752_v6, %v3752_v6  ;;  %v810_v28 = vld [vmem:[#allocation2 + $0x1b0] sm:$0xfe]  ;;  %v580_v50 = vld [vmem:[#allocation2 + $0x60] sm:$0x7f]  ;;  %v628_v40 = vmul.f32 %v4795_v60, %v588_v53 }
 0x148   : > { %4809 = vst [vmem:[#allocation8_spill] sm:$0xff] %v3760_v30  ;;  %v3764_v37 = vadd.f32 %v4811_v25, %v1659_v52  ;;  %v3785_v14 = vmul.f32 %v3760_v30, %v3760_v30  ;;  %v624_v25 = vmul.f32 %v4795_v60, %v584_v45  ;;  %v846_v52 = vmul.f32 %v4818_v17, %v806_v12  ;;  %v1025_v24 = vld [vmem:[#allocation2 + $0x1b0] sm:$0x7f]  ;;  %v1029_v34 = vld [vmem:[#allocation2 + $0x160] sm:$0x7f] }
 0x149   : > { %4814 = vst [vmem:[#allocation16_spill] sm:$0xff] %v3773_v1  ;;  %4815 = vst [vmem:[#allocation22_spill] sm:$0xff] %v3778_v16  ;;  %v1065_v6 = vmul.f32 %v3223_v33, %v1025_v24  ;;  %v1247_v30 = vld [vmem:[#allocation2 + $0x1b0] sm:$0xfe]  ;;  %v1251_v11 = vld [vmem:[#allocation2 + $0x160] sm:$0xfe]  ;;  %v780_v27 = vadd.f32 %v732_v47, %v628_v40  ;;  %v1069_v45 = vmul.f32 %v3223_v33, %v1029_v34 }
 0x14a   : > { %4812 = vst [vmem:[#allocation11_spill] sm:$0xff] %v3764_v37  ;;  %4816 = vst [vmem:[#allocation19_spill] sm:$0xff] %v3785_v14  ;;  %v3789_v55 = vmul.f32 %v3764_v37, %v3764_v37  ;;  %v850_v37 = vmul.f32 %v4818_v17, %v810_v28  ;;  %v776_v51 = vadd.f32 %v730_v61, %v624_v25  ;;  %v923_v16 = vrot.slane %v846_v52, 2  ;;  %v1466_v53 = vld [vmem:[#allocation2 + $0x160] sm:$0x7f] }
 0x14b   : > { %v1688_v41 = vld [vmem:[#allocation2 + $0x160] sm:$0xfe]  ;;  %v1287_v32 = vmul.f32 %v4819_v23, %v1247_v30  ;;  %v1291_v3 = vmul.f32 %v4819_v23, %v1251_v11  ;;  %v1506_v1 = vmul.f32 %v3369_v36, %v1466_v53  ;;  %v620_v47 = vmul.f32 %v4795_v60, %v580_v50  ;;  %v4824_v11 = vld [vmem:[#allocation45_spill] sm:$0xff] }
 0x14c   : > { %4817 = vst [vmem:[#allocation23_spill] sm:$0xff] %v3789_v55  ;;  %v929_v12 = vrot.slane %v850_v37, 2  ;;  %v4820_v55 = vld [vmem:[#allocation39_spill] sm:$0xff]  ;;  %v991_v14 = vadd.f32 %v923_v16, %v774_v4  ;;  %v1728_v61 = vmul.f32 %v3382_v29, %v1688_v41  ;;  %v4822_v52 = vld [vmem:[#allocation42_spill] sm:$0xff]  ;;  %v692_v29 = vmul.f32 %v4775_v2, %v3684_v46 }
 0x14d   : > { %v4821_v28 = vrot.slane %v4820_v55, 2  ;;  %v4823_v34 = vrot.slane %v4822_v52, 2  ;;  %v1363_v30 = vrot.slane %v1287_v32, 2  ;;  %v1369_v53 = vrot.slane %v1291_v3, 2  ;;  %v4826_v4 = vld [vmem:[#allocation43_spill] sm:$0xff]  ;;  %v4829_v32 = vld [vmem:[#allocation44_spill] sm:$0xff] }
 0x14e   : > { %v995_v40 = vadd.f32 %v929_v12, %v778_v13  ;;  %v1095_v15 = vadd.f32 %v4824_v11, %v991_v14  ;;  %v1804_v35 = vrot.slane %v1728_v61, 2  ;;  %v4830_v50 = vrot.slane %v4829_v32, 2  ;;  %v4831_v3 = vld [vmem:[#allocation46_spill] sm:$0xff] }
 0x14f   : > { %v927_v24 = vsel %vm885_vm2, %v923_v16, %v4821_v28  ;;  %v933_v25 = vsel %vm885_vm2, %v929_v12, %v4823_v34  ;;  %v4827_v16 = vrot.slane %v4826_v4, 2  ;;  %v724_v11 = vrot.slane %v692_v29, 1  ;;  %v4839_v29 = vld [vmem:[#allocation37_spill] sm:$0xff] }
 0x150   : > { %v993_v37 = vadd.f32 %v927_v24, %v776_v51  ;;  %v997_v9 = vadd.f32 %v933_v25, %v780_v27  ;;  %v1099_v28 = vadd.f32 %v4825_v43, %v995_v40  ;;  %v4828_v51 = vrot.slane %v3733_v42, 1 }
 0x151   : > { %v1367_v41 = vsel %vm885_vm2, %v1363_v30, %v4827_v16  ;;  %v1373_v14 = vsel %vm885_vm2, %v1369_v53, %v4830_v50  ;;  %v4832_v27 = vrot.slane %v4831_v3, 2  ;;  %v4834_v24 = vrot.slane %v3736_v57, 1 }
 0x152   : > { %v1097_v55 = vadd.f32 %v1065_v6, %v993_v37  ;;  %v1101_v60 = vadd.f32 %v1069_v45, %v997_v9  ;;  %v1215_v13 = vadd.f32 %v4828_v51, %v1095_v15  ;;  %v4833_v43 = vmov %v4828_v51  ;;  %v4836_v51 = vld [vmem:[#allocation34_spill] sm:$0xff] }
 0x153   : > { %v1808_v6 = vsel %vm885_vm2, %v1804_v35, %v4832_v27  ;;  %v1219_v61 = vadd.f32 %v4834_v24, %v1099_v28  ;;  %v694_v9 = vmul.f32 %v4775_v2, %v3698_v21  ;;  %v696_v15 = vmul.f32 %v4775_v2, %v3705_v20  ;;  %v4841_v27 = vld [vmem:[#allocation48_spill] sm:$0xff] }
 0x154   : > { %v1217_v12 = vadd.f32 %v4833_v43, %v1097_v55  ;;  %v4835_v45 = vmov %v4834_v24  ;;  %v1431_v34 = vadd.f32 %v1363_v30, %v1215_v13  ;;  %v720_v25 = vrot.slane %v3668_v19, 1  ;;  %v4837_v30 = vld [vmem:[#allocation36_spill] sm:$0xff] }
 0x155   : > { %v1221_v52 = vadd.f32 %v4835_v45, %v1101_v60  ;;  %v722_v37 = vrot.slane %v3675_v0, 1  ;;  %v1435_v42 = vadd.f32 %v1369_v53, %v1219_v61  ;;  %v726_v55 = vrot.slane %v694_v9, 1  ;;  %v798_v61 = vld [vmem:[#allocation2 + $0x58] sm:$0xfe]  ;;  %v802_v9 = vld [vmem:[#allocation2 + $0x60] sm:$0xfe] }
 0x156   : > { %v1433_v40 = vadd.f32 %v1367_v41, %v1217_v12  ;;  %v1536_v28 = vadd.f32 %v3483_v22, %v1431_v34  ;;  %v728_v16 = vrot.slane %v696_v15, 1  ;;  %v754_v32 = vadd.f32 %v720_v25, %v4836_v51  ;;  %v786_v22 = vld [vmem:[#allocation2 + $0x1d8] sm:$0xfe]  ;;  %v4843_v12 = vld [vmem:[#allocation38_spill] sm:$0xff] }
 0x157   : > { %v1437_v4 = vadd.f32 %v1373_v14, %v1221_v52  ;;  %v1540_v2 = vadd.f32 %v3486_v44, %v1435_v42  ;;  %v756_v57 = vadd.f32 %v720_v25, %v3722_v38  ;;  %v758_v60 = vadd.f32 %v722_v37, %v4837_v30  ;;  %v790_v14 = vld [vmem:[#allocation2 + $0x180] sm:$0xfe]  ;;  %v1001_v25 = vld [vmem:[#allocation2 + $0x1d8] sm:$0x7f] }
 0x158   : > { %v1538_v50 = vadd.f32 %v1506_v1, %v1433_v40  ;;  %v4838_v0 = vrot.slane %v3755_v59, 1  ;;  %v760_v41 = vadd.f32 %v722_v37, %v3758_v62  ;;  %v762_v13 = vadd.f32 %v724_v11, %v4839_v29  ;;  %v4845_v59 = vld [vmem:[#allocation41_spill] sm:$0xff]  ;;  %v1005_v37 = vld [vmem:[#allocation2 + $0x180] sm:$0x7f] }
 0x159   : > { %v1542_v19 = vadd.f32 %v3489_v26, %v1437_v4  ;;  %v4842_v44 = vrot.slane %v4841_v27, 1  ;;  %v764_v38 = vadd.f32 %v724_v11, %v3767_v49  ;;  %v766_v24 = vadd.f32 %v726_v55, %v4843_v12  ;;  %v794_v26 = vld [vmem:[#allocation2 + $0x158] sm:$0xfe]  ;;  %v4850_v27 = vld [vmem:[#allocation50_spill] sm:$0xff]  ;;  %v4852_v12 = vld [vmem:[#allocation51_spill] sm:$0xff] }
 0x15a   : > { %v1656_v53 = vadd.f32 %v4838_v0, %v1536_v28  ;;  %v4840_v3 = vmov %v4838_v0  ;;  %v768_v52 = vadd.f32 %v726_v55, %v3770_v58  ;;  %v770_v34 = vadd.f32 %v728_v16, %v4845_v59  ;;  %v1009_v40 = vld [vmem:[#allocation2 + $0x158] sm:$0x7f] }
 0x15b   : > { %v1658_v1 = vadd.f32 %v4840_v3, %v1538_v50  ;;  %v1660_v43 = vadd.f32 %v4842_v44, %v1540_v2  ;;  %v4844_v15 = vmov %v4842_v44  ;;  %v4846_v49 = vrot.slane %v3414_v10, 2  ;;  %v1013_v50 = vld [vmem:[#allocation2 + $0x58] sm:$0x7f]  ;;  %v1017_v2 = vld [vmem:[#allocation2 + $0x60] sm:$0x7f] }
 0x15c   : > { %v3856_v62 = vadd.f32 %v4844_v15, %v1542_v19  ;;  %v3858_v45 = vadd.f32 %v1804_v35, %v1656_v53  ;;  %v772_v4 = vadd.f32 %v728_v16, %v620_v47  ;;  %v826_v28 = vmul.f32 %v4818_v17, %v786_v22  ;;  %v4848_v29 = vld [vmem:[#allocation49_spill] sm:$0xff] }
 0x15d   : > { %v3862_v42 = vadd.f32 %v1808_v6, %v1658_v1  ;;  %v3866_v11 = vadd.f32 %v4846_v49, %v1660_v43  ;;  %v830_v51 = vmul.f32 %v4818_v17, %v790_v14  ;;  %v834_v35 = vmul.f32 %v4818_v17, %v794_v26 }
 0x15e   : > { %v838_v58 = vmul.f32 %v4818_v17, %v798_v61  ;;  %v842_v55 = vmul.f32 %v4818_v17, %v802_v9  ;;  %v893_v30 = vrot.slane %v826_v28, 2  ;;  %v1041_v6 = vmul.f32 %v3223_v33, %v1001_v25  ;;  %v4854_v9 = vld [vmem:[#allocation52_spill] sm:$0xff]  ;;  %v4856_v25 = vld [vmem:[#allocation53_spill] sm:$0xff] }
 0x15f   : > { %4847 = vst [vmem:[#allocation20_spill] sm:$0xff] %v3866_v11  ;;  %v1045_v10 = vmul.f32 %v3223_v33, %v1005_v37  ;;  %v1049_v19 = vmul.f32 %v3223_v33, %v1009_v40  ;;  %v899_v47 = vrot.slane %v830_v51, 2  ;;  %v905_v16 = vrot.slane %v834_v35, 2  ;;  %v1021_v40 = vld [vmem:[#allocation2 + $0xc0] sm:$0x7f] }
 0x160   : > { %v911_v0 = vrot.slane %v838_v58, 2  ;;  %v917_v53 = vrot.slane %v842_v55, 2  ;;  %v4849_v22 = vrot.slane %v4848_v29, 2  ;;  %v971_v3 = vadd.f32 %v893_v30, %v754_v32 }
 0x161   : > { %v1053_v17 = vmul.f32 %v3223_v33, %v1013_v50  ;;  %v1057_v1 = vmul.f32 %v3223_v33, %v1017_v2  ;;  %v4851_v44 = vrot.slane %v4850_v27, 2  ;;  %v4853_v26 = vrot.slane %v4852_v12, 2 }
 0x162   : > { %v897_v14 = vsel %vm885_vm2, %v893_v30, %v4849_v22  ;;  %v4855_v15 = vrot.slane %v4854_v9, 2  ;;  %v4857_v37 = vrot.slane %v4856_v25, 2  ;;  %v975_v28 = vadd.f32 %v899_v47, %v758_v60  ;;  %v1223_v60 = vld [vmem:[#allocation2 + $0x1d8] sm:$0xfe] }
 0x163   : > { %v903_v43 = vsel %vm885_vm2, %v899_v47, %v4851_v44  ;;  %v909_v61 = vsel %vm885_vm2, %v905_v16, %v4853_v26  ;;  %v973_v49 = vadd.f32 %v897_v14, %v756_v57  ;;  %v979_v35 = vadd.f32 %v905_v16, %v762_v13  ;;  %v4858_v13 = vld [vmem:[#allocation61_spill] sm:$0xff] }
 0x164   : > { %v915_v59 = vsel %vm885_vm2, %v911_v0, %v4855_v15  ;;  %v921_v32 = vsel %vm885_vm2, %v917_v53, %v4857_v37  ;;  %v977_v51 = vadd.f32 %v903_v43, %v760_v41  ;;  %v981_v58 = vadd.f32 %v909_v61, %v764_v38  ;;  %v4860_v43 = vld [vmem:[#allocation60_spill] sm:$0xff]  ;;  %v1235_v25 = vld [vmem:[#allocation2 + $0x58] sm:$0xfe]  ;;  %v1239_v37 = vld [vmem:[#allocation2 + $0x60] sm:$0xfe] }
 0x165   : > { %v983_v55 = vadd.f32 %v911_v0, %v766_v24  ;;  %v985_v50 = vadd.f32 %v915_v59, %v768_v52  ;;  %v987_v2 = vadd.f32 %v917_v53, %v770_v34  ;;  %v989_v30 = vadd.f32 %v921_v32, %v772_v4  ;;  %v4859_v52 = vld [vmem:[#allocation62_spill] sm:$0xff] }
 0x166   : > { %v1061_v29 = vmul.f32 %v3223_v33, %v1021_v40  ;;  %v1073_v22 = vadd.f32 %v1041_v6, %v3493_v31  ;;  %v1075_v27 = vadd.f32 %v3501_v8, %v971_v3  ;;  %v1077_v44 = vadd.f32 %v1045_v10, %v973_v49  ;;  %v1227_v4 = vld [vmem:[#allocation2 + $0x180] sm:$0xfe] }
 0x167   : > { %v1079_v12 = vadd.f32 %v3506_v7, %v975_v28  ;;  %v1081_v26 = vadd.f32 %v1049_v19, %v977_v51  ;;  %v1083_v57 = vadd.f32 %v3509_v18, %v979_v35  ;;  %v1085_v41 = vadd.f32 %v1053_v17, %v981_v58  ;;  %v1231_v7 = vld [vmem:[#allocation2 + $0x158] sm:$0xfe]  ;;  %v1442_v51 = vld [vmem:[#allocation2 + $0x180] sm:$0x7f] }
 0x168   : > { %v1087_v38 = vadd.f32 %v4858_v13, %v983_v55  ;;  %v1089_v24 = vadd.f32 %v1057_v1, %v985_v50  ;;  %v1091_v34 = vadd.f32 %v4859_v52, %v987_v2  ;;  %v1093_v47 = vadd.f32 %v1061_v29, %v989_v30  ;;  %v1446_v35 = vld [vmem:[#allocation2 + $0x158] sm:$0x7f] }
 0x169   : > { %v1127_v33 = vmul.f32 %v4797_v48, %v3645_v63  ;;  %v1129_v8 = vmul.f32 %v4797_v48, %v3647_v54  ;;  %v1131_v31 = vmul.f32 %v4797_v48, %v3684_v46  ;;  %v1133_v18 = vmul.f32 %v4797_v48, %v3698_v21 }
 0x16a   : > { %v1135_v6 = vmul.f32 %v4797_v48, %v3705_v20  ;;  %v1137_v10 = vmul.f32 %v4797_v48, %v3712_v56  ;;  %v1263_v19 = vmul.f32 %v4819_v23, %v1223_v60  ;;  %v1267_v53 = vmul.f32 %v4819_v23, %v1227_v4  ;;  %v1243_v48 = vld [vmem:[#allocation2 + $0xc0] sm:$0xfe] }
 0x16b   : > { %v1159_v16 = vrot.slane %v1127_v33, 1  ;;  %v1161_v63 = vrot.slane %v1129_v8, 1  ;;  %v1163_v0 = vrot.slane %v1131_v31, 1  ;;  %v1165_v14 = vrot.slane %v1133_v18, 1  ;;  %v4865_v33 = vld [vmem:[#allocation56_spill] sm:$0xff]  ;;  %v4867_v18 = vld [vmem:[#allocation57_spill] sm:$0xff] }
 0x16c   : > { %v1167_v3 = vrot.slane %v1135_v6, 1  ;;  %v1169_v17 = vrot.slane %v1137_v10, 1  ;;  %v1271_v1 = vmul.f32 %v4819_v23, %v1231_v7  ;;  %v1275_v30 = vmul.f32 %v4819_v23, %v1235_v25 }
 0x16d   : > { %v1191_v61 = vadd.f32 %v1159_v16, %v4860_v43  ;;  %v1193_v9 = vadd.f32 %v1159_v16, %v1073_v22  ;;  %v1195_v15 = vadd.f32 %v1161_v63, %v1075_v27  ;;  %v1197_v59 = vadd.f32 %v1161_v63, %v1077_v44  ;;  %v1458_v43 = vld [vmem:[#allocation2 + $0xc0] sm:$0x7f] }
 0x16e   : > { %v1199_v32 = vadd.f32 %v1163_v0, %v1079_v12  ;;  %v1201_v40 = vadd.f32 %v1163_v0, %v1081_v26  ;;  %v1203_v49 = vadd.f32 %v1165_v14, %v1083_v57  ;;  %v1205_v28 = vadd.f32 %v1165_v14, %v1085_v41  ;;  %v4861_v57 = vld [vmem:[#allocation54_spill] sm:$0xff]  ;;  %v4871_v0 = vld [vmem:[#allocation59_spill] sm:$0xff] }
 0x16f   : > { %v1207_v58 = vadd.f32 %v1167_v3, %v1087_v38  ;;  %v1209_v55 = vadd.f32 %v1167_v3, %v1089_v24  ;;  %v1211_v50 = vadd.f32 %v1169_v17, %v1091_v34  ;;  %v1213_v2 = vadd.f32 %v1169_v17, %v1093_v47  ;;  %v4863_v34 = vld [vmem:[#allocation55_spill] sm:$0xff]  ;;  %v1450_v17 = vld [vmem:[#allocation2 + $0x58] sm:$0x7f] }
 0x170   : > { %v1279_v29 = vmul.f32 %v4819_v23, %v1239_v37  ;;  %v1283_v22 = vmul.f32 %v4819_v23, %v1243_v48  ;;  %v1327_v27 = vrot.slane %v1263_v19, 2  ;;  %v1333_v44 = vrot.slane %v1267_v53, 2  ;;  %v4869_v19 = vld [vmem:[#allocation58_spill] sm:$0xff]  ;;  %v1462_v48 = vld [vmem:[#allocation2 + $0x1b0] sm:$0x7f] }
 0x171   : > { %v1339_v60 = vrot.slane %v1271_v1, 2  ;;  %v1482_v12 = vmul.f32 %v3369_v36, %v1442_v51  ;;  %v1486_v26 = vmul.f32 %v3369_v36, %v1446_v35  ;;  %v4862_v41 = vrot.slane %v4861_v57, 2  ;;  %v1454_v1 = vld [vmem:[#allocation2 + $0x60] sm:$0x7f] }
 0x172   : > { %v1345_v38 = vrot.slane %v1275_v30, 2  ;;  %v1351_v24 = vrot.slane %v1279_v29, 2  ;;  %v1357_v52 = vrot.slane %v1283_v22, 2  ;;  %v4864_v4 = vrot.slane %v4863_v34, 2 }
 0x173   : > { %v1331_v13 = vsel %vm885_vm2, %v1327_v27, %v4862_v41  ;;  %v4866_v23 = vrot.slane %v4865_v33, 2  ;;  %v1407_v31 = vadd.f32 %v1327_v27, %v1191_v61  ;;  %v4868_v6 = vrot.slane %v4867_v18, 2  ;;  %v1668_v33 = vld [vmem:[#allocation2 + $0x158] sm:$0xfe] }
 0x174   : > { %v1337_v47 = vsel %vm885_vm2, %v1333_v44, %v4864_v4  ;;  %v1409_v7 = vadd.f32 %v1331_v13, %v1193_v9  ;;  %v4870_v16 = vrot.slane %v4869_v19, 2  ;;  %v4872_v53 = vrot.slane %v4871_v0, 2  ;;  %v4878_v4 = vld [vmem:[#allocation72_spill] sm:$0xff] }
 0x175   : > { %v1343_v8 = vsel %vm885_vm2, %v1339_v60, %v4866_v23  ;;  %v1349_v10 = vsel %vm885_vm2, %v1345_v38, %v4868_v6  ;;  %v1411_v3 = vadd.f32 %v1333_v44, %v1195_v15  ;;  %v1413_v25 = vadd.f32 %v1337_v47, %v1197_v59  ;;  %v4873_v44 = vld [vmem:[#allocation63_spill] sm:$0xff] }
 0x176   : > { %v1355_v63 = vsel %vm885_vm2, %v1351_v24, %v4870_v16  ;;  %v1361_v14 = vsel %vm885_vm2, %v1357_v52, %v4872_v53  ;;  %v1415_v37 = vadd.f32 %v1339_v60, %v1199_v32  ;;  %v1417_v61 = vadd.f32 %v1343_v8, %v1201_v40  ;;  %v4874_v32 = vld [vmem:[#allocation67_spill] sm:$0xff]  ;;  %v4875_v60 = vld [vmem:[#allocation68_spill] sm:$0xff]  ;;  %v1672_v8 = vld [vmem:[#allocation2 + $0x58] sm:$0xfe] }
 0x177   : > { %v1419_v9 = vadd.f32 %v1345_v38, %v1203_v49  ;;  %v1421_v51 = vadd.f32 %v1349_v10, %v1205_v28  ;;  %v1423_v35 = vadd.f32 %v1351_v24, %v1207_v58  ;;  %v1425_v30 = vadd.f32 %v1355_v63, %v1209_v55  ;;  %v4876_v55 = vld [vmem:[#allocation69_spill] sm:$0xff]  ;;  %v4877_v24 = vld [vmem:[#allocation71_spill] sm:$0xff] }
 0x178   : > { %v1427_v29 = vadd.f32 %v1357_v52, %v1211_v50  ;;  %v1429_v22 = vadd.f32 %v1361_v14, %v1213_v2  ;;  %v1490_v27 = vmul.f32 %v3369_v36, %v1450_v17  ;;  %v1494_v57 = vmul.f32 %v3369_v36, %v1454_v1  ;;  %v1664_v2 = vld [vmem:[#allocation2 + $0x180] sm:$0xfe] }
 0x179   : > { %v1498_v41 = vmul.f32 %v3369_v36, %v1458_v43  ;;  %v1502_v15 = vmul.f32 %v3369_v36, %v1462_v48  ;;  %v1512_v13 = vadd.f32 %v4873_v44, %v1407_v31  ;;  %v1514_v59 = vadd.f32 %v1482_v12, %v1409_v7  ;;  %v1676_v17 = vld [vmem:[#allocation2 + $0x60] sm:$0xfe] }
 0x17a   : > { %v1516_v40 = vadd.f32 %v4874_v32, %v1411_v3  ;;  %v1518_v49 = vadd.f32 %v1486_v26, %v1413_v25  ;;  %v1520_v28 = vadd.f32 %v4875_v60, %v1415_v37  ;;  %v1522_v58 = vadd.f32 %v1490_v27, %v1417_v61  ;;  %v1680_v1 = vld [vmem:[#allocation2 + $0xc0] sm:$0xfe] }
 0x17b   : > { %v1524_v50 = vadd.f32 %v4876_v55, %v1419_v9  ;;  %v1526_v38 = vadd.f32 %v1494_v57, %v1421_v51  ;;  %v1528_v52 = vadd.f32 %v4877_v24, %v1423_v35  ;;  %v1530_v34 = vadd.f32 %v1498_v41, %v1425_v30  ;;  %v4879_v41 = vld [vmem:[#allocation82_spill] sm:$0xff] }
 0x17c   : > { %v1532_v47 = vadd.f32 %v4878_v4, %v1427_v29  ;;  %v1534_v36 = vadd.f32 %v1502_v15, %v1429_v22  ;;  %v1568_v12 = vmul.f32 %v4808_v39, %v3647_v54  ;;  %v1570_v26 = vmul.f32 %v4808_v39, %v3684_v46  ;;  %v2899_v54 = vld [vmem:[%s4599_s2 + $0x18] ss:$0 sm:$0xff] }
 0x17d   : > { %v1572_v23 = vmul.f32 %v4808_v39, %v3698_v21  ;;  %v1574_v31 = vmul.f32 %v4808_v39, %v3705_v20  ;;  %v1576_v7 = vmul.f32 %v4808_v39, %v3712_v56  ;;  %v1578_v18 = vmul.f32 %v4808_v39, %v3714_v5  ;;  %v1684_v5 = vld [vmem:[#allocation2 + $0x1b0] sm:$0xfe] }
 0x17e   : > { %v1704_v6 = vmul.f32 %v2899_v54, %v1664_v2  ;;  %v1600_v10 = vrot.slane %v1568_v12, 1  ;;  %v1602_v46 = vrot.slane %v1570_v26, 1  ;;  %v1708_v16 = vmul.f32 %v2899_v54, %v1668_v33  ;;  %v4891_v12 = vld [vmem:[#allocation74_spill] sm:$0xff] }
 0x17f   : > { %v1604_v19 = vrot.slane %v1572_v23, 1  ;;  %v1606_v21 = vrot.slane %v1574_v31, 1  ;;  %v1608_v63 = vrot.slane %v1576_v7, 1  ;;  %v1610_v0 = vrot.slane %v1578_v18, 1 }
 0x180   : > { %v1712_v53 = vmul.f32 %v2899_v54, %v1672_v8  ;;  %v1632_v20 = vadd.f32 %v1600_v10, %v1512_v13  ;;  %v1634_v14 = vadd.f32 %v1600_v10, %v1514_v59  ;;  %v1636_v3 = vadd.f32 %v1602_v46, %v1516_v40  ;;  %v4881_v13 = vld [vmem:[#allocation64_spill] sm:$0xff] }
 0x181   : > { %v1638_v56 = vadd.f32 %v1602_v46, %v1518_v49  ;;  %v1640_v39 = vadd.f32 %v1604_v19, %v1520_v28  ;;  %v1642_v43 = vadd.f32 %v1604_v19, %v1522_v58  ;;  %v1644_v25 = vadd.f32 %v1606_v21, %v1524_v50  ;;  %v4883_v28 = vld [vmem:[#allocation65_spill] sm:$0xff]  ;;  %v4885_v50 = vld [vmem:[#allocation66_spill] sm:$0xff] }
 0x182   : > { %v1646_v37 = vadd.f32 %v1606_v21, %v1526_v38  ;;  %v1648_v61 = vadd.f32 %v1608_v63, %v1528_v52  ;;  %v1650_v9 = vadd.f32 %v1608_v63, %v1530_v34  ;;  %v1652_v48 = vadd.f32 %v1610_v0, %v1532_v47  ;;  %v4887_v52 = vld [vmem:[#allocation70_spill] sm:$0xff]  ;;  %v4889_v47 = vld [vmem:[#allocation73_spill] sm:$0xff] }
 0x183   : > { %v1654_v51 = vadd.f32 %v1610_v0, %v1534_v36  ;;  %v1716_v35 = vmul.f32 %v2899_v54, %v1676_v17  ;;  %v1720_v30 = vmul.f32 %v2899_v54, %v1680_v1  ;;  %v1724_v29 = vmul.f32 %v2899_v54, %v1684_v5 }
 0x184   : > { %v1768_v22 = vrot.slane %v1704_v6, 2  ;;  %v1774_v27 = vrot.slane %v1708_v16, 2  ;;  %v1780_v57 = vrot.slane %v1712_v53, 2  ;;  %v3966_v15 = vadd.f32 %v4879_v41, %v3856_v62 }
 0x185   : > { %v1951_v44 = vrot.slane %v3858_v45, 7  ;;  %v4882_v59 = vrot.slane %v4881_v13, 2  ;;  %v1786_v40 = vrot.slane %v1716_v35, 2  ;;  %v1792_v49 = vrot.slane %v1720_v30, 2 }
 0x186   : > { %4880 = vst [vmem:[#allocation24_spill] sm:$0xff] %v3966_v15  ;;  %v1798_v60 = vrot.slane %v1724_v29, 2  ;;  %v4884_v58 = vrot.slane %v4883_v28, 2  ;;  %v4886_v2 = vrot.slane %v4885_v50, 2  ;;  %v3978_v24 = vadd.f32 %v1768_v22, %v1632_v20 }
 0x187   : > { %v1772_v32 = vsel %vm885_vm2, %v1768_v22, %v4882_v59  ;;  %v4888_v34 = vrot.slane %v4887_v52, 2  ;;  %v4890_v33 = vrot.slane %v4889_v47, 2  ;;  %v4892_v26 = vrot.slane %v4891_v12, 2 }
 0x188   : > { %v1778_v55 = vsel %vm885_vm2, %v1774_v27, %v4884_v58  ;;  %v1784_v38 = vsel %vm885_vm2, %v1780_v57, %v4886_v2  ;;  %v3980_v62 = vadd.f32 %v1772_v32, %v1634_v14  ;;  %v3991_v8 = vadd.f32 %v1774_v27, %v1636_v3 }
 0x189   : > { %v1790_v4 = vsel %vm885_vm2, %v1786_v40, %v4888_v34  ;;  %v1796_v36 = vsel %vm885_vm2, %v1792_v49, %v4890_v33  ;;  %v1802_v23 = vsel %vm885_vm2, %v1798_v60, %v4892_v26  ;;  %v3993_v31 = vadd.f32 %v1778_v55, %v1638_v56 }
 0x18a   : > { %v3995_v7 = vadd.f32 %v1780_v57, %v1640_v39  ;;  %v3997_v18 = vadd.f32 %v1784_v38, %v1642_v43  ;;  %v3999_v54 = vadd.f32 %v1786_v40, %v1644_v25  ;;  %v4001_v6 = vadd.f32 %v1790_v4, %v1646_v37 }
 0x18b   : > { %v4003_v10 = vadd.f32 %v1792_v49, %v1648_v61  ;;  %v4005_v46 = vadd.f32 %v1796_v36, %v1650_v9  ;;  %v4007_v19 = vadd.f32 %v1798_v60, %v1652_v48  ;;  %v4009_v16 = vadd.f32 %v1802_v23, %v1654_v51 }
 0x18c   : > { %v1915_v21 = vrot.slane %v3978_v24, 7  ;;  %v1916_v63 = vrot.slane %v3980_v62, 7  ;;  %v1921_v0 = vrot.slane %v3991_v8, 7  ;;  %v1922_v53 = vrot.slane %v3993_v31, 7 }
 0x18d   : > { %v1927_v20 = vrot.slane %v3995_v7, 7  ;;  %v1928_v14 = vrot.slane %v3997_v18, 7  ;;  %v1933_v3 = vrot.slane %v3999_v54, 7  ;;  %v1934_v17 = vrot.slane %v4001_v6, 7 }
 0x18e   : > { %v1917_v56 = vsel %vm1911_vm3, %v1915_v21, %v1916_v63  ;;  %v1939_v1 = vrot.slane %v4003_v10, 7  ;;  %v1940_v5 = vrot.slane %v4005_v46, 7  ;;  %v1923_v39 = vsel %vm1911_vm3, %v1921_v0, %v1922_v53 }
 0x18f   : > { %v1929_v43 = vsel %vm1911_vm3, %v1927_v20, %v1928_v14  ;;  %v1945_v25 = vrot.slane %v4007_v19, 7  ;;  %v1946_v37 = vrot.slane %v4009_v16, 7  ;;  %v1935_v61 = vsel %vm1911_vm3, %v1933_v3, %v1934_v17 }
 0x190   : > { %v1941_v9 = vsel %vm1911_vm3, %v1939_v1, %v1940_v5  ;;  %v1952_v48 = vrot.slane %v3862_v42, 7  ;;  %v1957_v51 = vrot.slane %v3866_v11, 7  ;;  %v1958_v30 = vrot.slane %v3966_v15, 7 }
 0x191   : > { %v1947_v35 = vsel %vm1911_vm3, %v1945_v25, %v1946_v37  ;;  %v1989_v29 = vadd.f32 %v1923_v39, %v1917_v56  ;;  %v2005_v22 = vmul.f32 %v3978_v24, %v3978_v24  ;;  %v2007_v57 = vmul.f32 %v3980_v62, %v3980_v62  ;;  %v571_v39 = vld [vmem:[#allocation2 + $0x38] sm:$0x7f] }
 0x192   : > { %v1953_v27 = vsel %vm1911_vm3, %v1951_v44, %v1952_v48  ;;  %v2009_v41 = vmul.f32 %v3991_v8, %v3991_v8  ;;  %v2011_v13 = vmul.f32 %v3993_v31, %v3993_v31  ;;  %v1959_v59 = vsel %vm1911_vm3, %v1957_v51, %v1958_v30  ;;  %v579_v48 = vld [vmem:[#allocation2 + $0x78] sm:$0x7f] }
 0x193   : > { %v1990_v32 = vadd.f32 %v1989_v29, %v1929_v43  ;;  %v2013_v40 = vmul.f32 %v3995_v7, %v3995_v7  ;;  %v2015_v49 = vmul.f32 %v3997_v18, %v3997_v18  ;;  %v2017_v44 = vmul.f32 %v3999_v54, %v3999_v54  ;;  %v575_v43 = vld [vmem:[#allocation2 + $0xd8] sm:$0x7f] }
 0x194   : > { %v2019_v60 = vmul.f32 %v4001_v6, %v4001_v6  ;;  %v2021_v28 = vmul.f32 %v4003_v10, %v4003_v10  ;;  %v2023_v58 = vmul.f32 %v4005_v46, %v4005_v46  ;;  %v2025_v50 = vmul.f32 %v4007_v19, %v4007_v19 }
 0x195   : > { %v1991_v55 = vadd.f32 %v1990_v32, %v1935_v61  ;;  %v2027_v2 = vmul.f32 %v4009_v16, %v4009_v16  ;;  %v2029_v38 = vmul.f32 %v3858_v45, %v3858_v45  ;;  %v2031_v52 = vmul.f32 %v3862_v42, %v3862_v42 }
 0x196   : > { %v2033_v34 = vmul.f32 %v3866_v11, %v3866_v11  ;;  %v2035_v4 = vmul.f32 %v3966_v15, %v3966_v15  ;;  %v2071_v47 = vrot.slane %v2005_v22, 7  ;;  %v2072_v36 = vrot.slane %v2007_v57, 7  ;;  %v4071_v22 = vld [vmem:[#allocation2 + $0x10] sm:$0xff]  ;;  %v4073_v57 = vld [vmem:[#allocation2 + $0x98] sm:$0xff]  ;;  %v1457_v11 = vld [vmem:[#allocation2 + $0x168] sm:$0x7f] }
 0x197   : > { %v1992_v33 = vadd.f32 %v1991_v55, %v1941_v9  ;;  %v2077_v12 = vrot.slane %v2009_v41, 7  ;;  %v2078_v26 = vrot.slane %v2011_v13, 7  ;;  %v2083_v23 = vrot.slane %v2013_v40, 7  ;;  %v4075_v41 = vld [vmem:[#allocation2 + $0x38] sm:$0xff]  ;;  %v4893_v40 = vld [vmem:[#allocation6_spill] sm:$0xff] }
 0x198   : > { %v2084_v21 = vrot.slane %v2015_v49, 7  ;;  %v2089_v63 = vrot.slane %v2017_v44, 7  ;;  %v2090_v0 = vrot.slane %v2019_v60, 7  ;;  %v2073_v20 = vsel %vm1911_vm3, %v2071_v47, %v2072_v36  ;;  %v4080_v44 = vld [vmem:[#allocation2 + $0xd8] sm:$0xff] }
 0x199   : > { %v1993_v53 = vadd.f32 %v1992_v33, %v1947_v35  ;;  %v2079_v14 = vsel %vm1911_vm3, %v2077_v12, %v2078_v26  ;;  %v2095_v3 = vrot.slane %v2021_v28, 7  ;;  %v2096_v1 = vrot.slane %v2023_v58, 7  ;;  %v4082_v60 = vld [vmem:[#allocation2 + $0x78] sm:$0xff]  ;;  %v785_v28 = vld [vmem:[#allocation2 + $0x10] sm:$0xfe]  ;;  %v4895_v26 = vld [vmem:[#allocation7_spill] sm:$0xff] }
 0x19a   : > { %v2085_v56 = vsel %vm1911_vm3, %v2083_v23, %v2084_v21  ;;  %v2091_v17 = vsel %vm1911_vm3, %v2089_v63, %v2090_v0  ;;  %v2101_v5 = vrot.slane %v2025_v50, 7  ;;  %v2102_v37 = vrot.slane %v2027_v2, 7  ;;  %v789_v47 = vld [vmem:[#allocation2 + $0x98] sm:$0xfe] }
 0x19b   : > { %v1994_v25 = vadd.f32 %v1993_v53, %v1953_v27  ;;  %v2107_v61 = vrot.slane %v2029_v38, 7  ;;  %v2108_v9 = vrot.slane %v2031_v52, 7  ;;  %v2097_v51 = vsel %vm1911_vm3, %v2095_v3, %v2096_v1 }
 0x19c   : > { %v2113_v35 = vrot.slane %v2033_v34, 7  ;;  %v2114_v30 = vrot.slane %v2035_v4, 7  ;;  %v2145_v29 = vadd.f32 %v2079_v14, %v2073_v20  ;;  %v2103_v32 = vsel %vm1911_vm3, %v2101_v5, %v2102_v37  ;;  %v4896_v5 = vld [vmem:[#allocation83_spill] sm:$0xff] }
 0x19d   : > { %v1995_v13 = vadd.f32 %v1994_v25, %v1959_v59  ;;  %v2109_v27 = vsel %vm1911_vm3, %v2107_v61, %v2108_v9  ;;  %v611_v49 = vmul.f32 %v4893_v40, %v571_v39  ;;  %v615_v50 = vmul.f32 %v4893_v40, %v575_v43  ;;  %v4894_v59 = vld [vmem:[#allocation9_spill] sm:$0xff]  ;;  %v4898_v25 = vld [vmem:[#allocation84_spill] sm:$0xff] }
 0x19e   : > { %v2115_v58 = vsel %vm1911_vm3, %v2113_v35, %v2114_v30  ;;  %v2146_v55 = vadd.f32 %v2145_v29, %v2085_v56  ;;  %v619_v2 = vmul.f32 %v4893_v40, %v579_v48  ;;  %v687_v52 = vmul.f32 %v4894_v59, %v4071_v22  ;;  %v4897_v39 = vld [vmem:[#allocation89_spill] sm:$0xff]  ;;  %v4899_v35 = vld [vmem:[#allocation90_spill] sm:$0xff] }
 0x19f   : > { %v1996_v38 = vrot.slane %v1995_v13, 4  ;;  %v689_v34 = vmul.f32 %v4894_v59, %v4073_v57  ;;  %v691_v4 = vmul.f32 %v4894_v59, %v4075_v41  ;;  %v693_v36 = vmul.f32 %v4894_v59, %v4080_v44  ;;  %v793_v61 = vld [vmem:[#allocation2 + $0x38] sm:$0xfe] }
 0x1a0   : > { %v2147_v33 = vadd.f32 %v2146_v55, %v2091_v17  ;;  %v695_v12 = vmul.f32 %v4894_v59, %v4082_v60  ;;  %v825_v23 = vmul.f32 %v4895_v26, %v785_v28  ;;  %v719_v63 = vrot.slane %v687_v52, 1  ;;  %v797_v9 = vld [vmem:[#allocation2 + $0xd8] sm:$0xfe]  ;;  %v4901_v55 = vld [vmem:[#allocation86_spill] sm:$0xff]  ;;  %v4902_v52 = vld [vmem:[#allocation87_spill] sm:$0xff] }
 0x1a1   : > { %v1997_v21 = vadd.f32 %v1996_v38, %v1995_v13  ;;  %v721_v0 = vrot.slane %v689_v34, 1  ;;  %v723_v53 = vrot.slane %v691_v4, 1  ;;  %v725_v14 = vrot.slane %v693_v36, 1  ;;  %v4900_v29 = vld [vmem:[#allocation85_spill] sm:$0xff]  ;;  %v1000_v4 = vld [vmem:[#allocation2 + $0x10] sm:$0x7f] }
 0x1a2   : > { %v2148_v20 = vadd.f32 %v2147_v33, %v2097_v51  ;;  %v727_v3 = vrot.slane %v695_v12, 1  ;;  %v829_v56 = vmul.f32 %v4895_v26, %v789_v47  ;;  %v753_v17 = vadd.f32 %v719_v63, %v4896_v5  ;;  %v801_v51 = vld [vmem:[#allocation2 + $0x78] sm:$0xfe] }
 0x1a3   : > { %v1998_v1 = vrot.slane %v1997_v21, 2  ;;  %v755_v43 = vadd.f32 %v719_v63, %v4897_v39  ;;  %v757_v37 = vadd.f32 %v721_v0, %v4898_v25  ;;  %v759_v30 = vadd.f32 %v721_v0, %v4899_v35 }
 0x1a4   : > { %v2149_v48 = vadd.f32 %v2148_v20, %v2103_v32  ;;  %v761_v13 = vadd.f32 %v723_v53, %v4900_v29  ;;  %v763_v40 = vadd.f32 %v723_v53, %v611_v49  ;;  %v765_v38 = vadd.f32 %v725_v14, %v4901_v55 }
 0x1a5   : > { %v1999_v28 = vadd.f32 %v1998_v1, %v1997_v21  ;;  %v767_v59 = vadd.f32 %v725_v14, %v615_v50  ;;  %v769_v34 = vadd.f32 %v727_v3, %v4902_v52  ;;  %v771_v33 = vadd.f32 %v727_v3, %v619_v2  ;;  %v4903_v1 = vld [vmem:[#allocation14_spill] sm:$0xff]  ;;  %v4904_v14 = vld [vmem:[#allocation75_spill] sm:$0xff]  ;;  %v4906_v2 = vld [vmem:[#allocation76_spill] sm:$0xff] }
 0x1a6   : > { %v2150_v47 = vadd.f32 %v2149_v48, %v2109_v27  ;;  %v833_v36 = vmul.f32 %v4895_v26, %v793_v61  ;;  %v837_v12 = vmul.f32 %v4895_v26, %v797_v9  ;;  %v841_v63 = vmul.f32 %v4895_v26, %v801_v51  ;;  %v4908_v48 = vld [vmem:[#allocation79_spill] sm:$0xff] }
 0x1a7   : > { %v2000_v32 = vrot.slane %v1999_v28, 1  ;;  %v892_v0 = vrot.slane %v825_v23, 2  ;;  %v898_v20 = vrot.slane %v829_v56, 2  ;;  %v1040_v5 = vmul.f32 %v4903_v1, %v1000_v4 }
 0x1a8   : > { %v2151_v49 = vadd.f32 %v2150_v47, %v2115_v58  ;;  %v904_v53 = vrot.slane %v833_v36, 2  ;;  %v910_v21 = vrot.slane %v837_v12, 2  ;;  %v4905_v39 = vrot.slane %v4904_v14, 2  ;;  %v4910_v58 = vld [vmem:[#allocation80_spill] sm:$0xff] }
 0x1a9   : > { %v2001_v50 = vadd.f32 %v2000_v32, %v1999_v28  ;;  %v4907_v3 = vrot.slane %v4906_v2, 2  ;;  %v916_v61 = vrot.slane %v841_v63, 2  ;;  %v4909_v26 = vrot.slane %v4908_v48, 2  ;;  %v4912_v28 = vld [vmem:[#allocation81_spill] sm:$0xff] }
 0x1aa   : > { %v895_v27 = vsel %vm885_vm2, %v892_v0, %v4905_v39  ;;  %v2152_v9 = vrot.slane %v2151_v49, 4  ;;  %v4911_v56 = vrot.slane %v4910_v58, 2  ;;  %v970_v29 = vadd.f32 %v892_v0, %v753_v17  ;;  %v1018_v48 = vld [vmem:[#allocation2 + $0x138] sm:$0x80]  ;;  %v4160_v0 = vld [vmem:[#allocation2 + $0x168] sm:$0xff] }
 0x1ab   : > { %v901_v25 = vsel %vm885_vm2, %v898_v20, %v4907_v3  ;;  %v907_v23 = vsel %vm885_vm2, %v904_v53, %v4909_v26  ;;  %v4122_v51 = vmul.f32 0.015625, %v2001_v50  ;;  %v4913_v55 = vrot.slane %v4912_v28, 2  ;;  %v1004_v50 = vld [vmem:[#allocation2 + $0x98] sm:$0x7f]  ;;  %v1020_v26 = vld [vmem:[#allocation2 + $0x168] sm:$0x7f] }
 0x1ac   : > { %v913_v35 = vsel %vm885_vm2, %v910_v21, %v4911_v56  ;;  %v972_v4 = vadd.f32 %v895_v27, %v755_v43  ;;  %v974_v47 = vadd.f32 %v898_v20, %v757_v37  ;;  %v2153_v36 = vadd.f32 %v2152_v9, %v2151_v49  ;;  %v1010_v43 = vld [vmem:[#allocation2 + $0x148] sm:$0x80]  ;;  %v1014_v37 = vld [vmem:[#allocation2 + $0x90] sm:$0x80]  ;;  %v1008_v49 = vld [vmem:[#allocation2 + $0x38] sm:$0x7f] }
 0x1ad   : > { %v919_v52 = vsel %vm885_vm2, %v916_v61, %v4913_v55  ;;  %v976_v12 = vadd.f32 %v901_v25, %v759_v30  ;;  %v978_v32 = vadd.f32 %v904_v53, %v761_v13  ;;  %v980_v63 = vadd.f32 %v907_v23, %v763_v40  ;;  %v1012_v53 = vld [vmem:[#allocation2 + $0xd8] sm:$0x7f] }
 0x1ae   : > { %v4129_v14 = vmul.f32 %v4122_v51, %v4122_v51  ;;  %v2154_v20 = vrot.slane %v2153_v36, 2  ;;  %v982_v3 = vadd.f32 %v910_v21, %v765_v38  ;;  %v984_v25 = vadd.f32 %v913_v35, %v767_v59  ;;  %v1016_v9 = vld [vmem:[#allocation2 + $0x78] sm:$0x7f] }
 0x1af   : > { %v986_v58 = vadd.f32 %v916_v61, %v769_v34  ;;  %v988_v56 = vadd.f32 %v919_v52, %v771_v33  ;;  %v1044_v28 = vmul.f32 %v4903_v1, %v1004_v50  ;;  %v1048_v55 = vmul.f32 %v4903_v1, %v1008_v49  ;;  %v4914_v35 = vld [vmem:[#allocation77_spill] sm:$0xff]  ;;  %v4915_v34 = vld [vmem:[#allocation88_spill] sm:$0xff]  ;;  %v4916_v61 = vld [vmem:[#allocation78_spill] sm:$0xff] }
 0x1b0   : > { %v2155_v23 = vadd.f32 %v2154_v20, %v2153_v36  ;;  %v1050_v40 = vmul.f32 %v4903_v1, %v1010_v43  ;;  %v1052_v13 = vmul.f32 %v4903_v1, %v1012_v53  ;;  %v1054_v27 = vmul.f32 %v4903_v1, %v1014_v37  ;;  %v4917_v36 = vld [vmem:[#allocation91_spill] sm:$0xff]  ;;  %v4918_v49 = vld [vmem:[#allocation92_spill] sm:$0xff] }
 0x1b1   : > { %v1056_v38 = vmul.f32 %v4903_v1, %v1016_v9  ;;  %v1058_v59 = vmul.f32 %v4903_v1, %v1018_v48  ;;  %v1060_v21 = vmul.f32 %v4903_v1, %v1020_v26  ;;  %v1070_v33 = vadd.f32 %v4915_v34, %v4914_v35  ;;  %v1222_v1 = vld [vmem:[#allocation2 + $0x10] sm:$0xfe]  ;;  %v1232_v34 = vld [vmem:[#allocation2 + $0x178] sm:$0x1] }
 0x1b2   : > { %v2156_v30 = vrot.slane %v2155_v23, 1  ;;  %v1072_v52 = vadd.f32 %v1040_v5, %v4916_v61  ;;  %v1074_v50 = vadd.f32 %v4917_v36, %v970_v29  ;;  %v1076_v20 = vadd.f32 %v1044_v28, %v972_v4  ;;  %v4919_v35 = vld [vmem:[#allocation12_spill] sm:$0xff] }
 0x1b3   : > { %v1078_v53 = vadd.f32 %v4918_v49, %v974_v47  ;;  %v1080_v2 = vadd.f32 %v1048_v55, %v976_v12  ;;  %v1082_v37 = vadd.f32 %v1050_v40, %v978_v32  ;;  %v1084_v9 = vadd.f32 %v1052_v13, %v980_v63  ;;  %v4920_v40 = vld [vmem:[#allocation10_spill] sm:$0xff]  ;;  %v1230_v49 = vld [vmem:[#allocation2 + $0x38] sm:$0xfe] }
 0x1b4   : > { %v2157_v43 = vadd.f32 %v2156_v30, %v2155_v23  ;;  %v1086_v17 = vadd.f32 %v1054_v27, %v982_v3  ;;  %v1088_v48 = vadd.f32 %v1056_v38, %v984_v25  ;;  %v1090_v39 = vadd.f32 %v1058_v59, %v986_v58 }
 0x1b5   : > { %v1092_v15 = vadd.f32 %v1060_v21, %v988_v56  ;;  %v1126_v5 = vmul.f32 %v4919_v35, %v4071_v22  ;;  %v1128_v29 = vmul.f32 %v4919_v35, %v4073_v57  ;;  %v1130_v4 = vmul.f32 %v4919_v35, %v4075_v41  ;;  %v1224_v22 = vld [vmem:[#allocation2 + $0x8] sm:$0x1]  ;;  %v1228_v56 = vld [vmem:[#allocation2 + $0x150] sm:$0x1]  ;;  %v1226_v21 = vld [vmem:[#allocation2 + $0x98] sm:$0xfe] }
 0x1b6   : > { %v2159_v26 = vmul.f32 0.015625, %v2157_v43  ;;  %v1132_v47 = vmul.f32 %v4919_v35, %v4080_v44  ;;  %v1134_v12 = vmul.f32 %v4919_v35, %v4082_v60  ;;  %v1136_v32 = vmul.f32 %v4919_v35, %v4160_v0  ;;  %v1240_v35 = vld [vmem:[#allocation2 + $0x1c0] sm:$0x1] }
 0x1b7   : > { %v1158_v30 = vrot.slane %v1126_v5, 1  ;;  %v1160_v13 = vrot.slane %v1128_v29, 1  ;;  %v1262_v27 = vmul.f32 %v4920_v40, %v1222_v1  ;;  %v1162_v3 = vrot.slane %v1130_v4, 1 }
 0x1b8   : > { %v2163_v63 = vsub.f32 %v2159_v26, %v4129_v14  ;;  %v1164_v25 = vrot.slane %v1132_v47, 1  ;;  %v1166_v23 = vrot.slane %v1134_v12, 1  ;;  %v1168_v58 = vrot.slane %v1136_v32, 1  ;;  %v1236_v26 = vld [vmem:[#allocation2 + $0xb0] sm:$0x1] }
 0x1b9   : > { %v1190_v55 = vadd.f32 %v1158_v30, %v1070_v33  ;;  %v1192_v38 = vadd.f32 %v1158_v30, %v1072_v52  ;;  %v1194_v59 = vadd.f32 %v1160_v13, %v1074_v50  ;;  %v1196_v61 = vadd.f32 %v1160_v13, %v1076_v20  ;;  %v1234_v47 = vld [vmem:[#allocation2 + $0xd8] sm:$0xfe]  ;;  %v1242_v33 = vld [vmem:[#allocation2 + $0x168] sm:$0xfe]  ;;  %v1244_v52 = vld [vmem:[#allocation2 + $0xd0] sm:$0x1] }
 0x1ba   : > { %v2165_v28 = vmax.f32 %v2163_v63, 0.0  ;;  %v1198_v36 = vadd.f32 %v1162_v3, %v1078_v53  ;;  %v1200_v43 = vadd.f32 %v1162_v3, %v1080_v2  ;;  %v1202_v14 = vadd.f32 %v1164_v25, %v1082_v37  ;;  %v1238_v12 = vld [vmem:[#allocation2 + $0x78] sm:$0xfe] }
 0x1bb   : > { %v1204_v1 = vadd.f32 %v1164_v25, %v1084_v9  ;;  %v1206_v29 = vadd.f32 %v1166_v23, %v1086_v17  ;;  %v1208_v4 = vadd.f32 %v1166_v23, %v1088_v48  ;;  %v1210_v32 = vadd.f32 %v1168_v58, %v1090_v39 }
 0x1bc   : > { %v2199_v5 = vadd.f32 1e-05, %v2165_v28  ;;  %v1212_v63 = vadd.f32 %v1168_v58, %v1092_v15  ;;  %v1264_v50 = vmul.f32 %v4920_v40, %v1224_v22  ;;  %v1266_v20 = vmul.f32 %v4920_v40, %v1226_v21 }
 0x1bd   : > { %v1268_v2 = vmul.f32 %v4920_v40, %v1228_v56  ;;  %v1270_v53 = vmul.f32 %v4920_v40, %v1230_v49  ;;  %v1272_v37 = vmul.f32 %v4920_v40, %v1232_v34  ;;  %v1274_v17 = vmul.f32 %v4920_v40, %v1234_v47  ;;  %v1439_v47 = vld [vmem:[#allocation2 + $0xb8] sm:$0x80] }
 0x1be   : > { %2893 = vrsqrt.f32 %v2199_v5  ;;  %v1276_v9 = vmul.f32 %v4920_v40, %v1236_v26  ;;  %v1278_v39 = vmul.f32 %v4920_v40, %v1238_v12  ;;  %v1280_v15 = vmul.f32 %v4920_v40, %v1240_v35 }
 0x1bf   : > { %v1282_v48 = vmul.f32 %v4920_v40, %v1242_v33  ;;  %v1284_v30 = vmul.f32 %v4920_v40, %v1244_v52  ;;  %v1326_v13 = vrot.slane %v1262_v27, 2  ;;  %v1328_v22 = vrot.slane %v1264_v50, 2  ;;  %v1441_v52 = vld [vmem:[#allocation2 + $0x98] sm:$0x7f]  ;;  %v1443_v50 = vld [vmem:[#allocation2 + $0x50] sm:$0x80] }
 0x1c0   : > { %v1332_v3 = vrot.slane %v1266_v20, 2  ;;  %v1334_v25 = vrot.slane %v1268_v2, 2  ;;  %v1338_v23 = vrot.slane %v1270_v53, 2  ;;  %v1340_v58 = vrot.slane %v1272_v37, 2 }
 0x1c1   : > { %v1329_v56 = vsel %vm885_vm2, %v1326_v13, %v1328_v22  ;;  %v1344_v28 = vrot.slane %v1274_v17, 2  ;;  %v1346_v21 = vrot.slane %v1276_v9, 2  ;;  %v1350_v34 = vrot.slane %v1278_v39, 2  ;;  %v1445_v17 = vld [vmem:[#allocation2 + $0x38] sm:$0x7f] }
 0x1c2   : > { %v1335_v49 = vsel %vm885_vm2, %v1332_v3, %v1334_v25  ;;  %v1341_v26 = vsel %vm885_vm2, %v1338_v23, %v1340_v58  ;;  %v1352_v35 = vrot.slane %v1280_v15, 2  ;;  %v1356_v5 = vrot.slane %v1282_v48, 2  ;;  %v1447_v9 = vld [vmem:[#allocation2 + $0x148] sm:$0x80]  ;;  %v1449_v39 = vld [vmem:[#allocation2 + $0xd8] sm:$0x7f] }
 0x1c3   : > { %v1347_v40 = vsel %vm885_vm2, %v1344_v28, %v1346_v21  ;;  %v1358_v27 = vrot.slane %v1284_v30, 2  ;;  %v1406_v12 = vadd.f32 %v1326_v13, %v1190_v55  ;;  %v1408_v33 = vadd.f32 %v1329_v56, %v1192_v38  ;;  %v1451_v58 = vld [vmem:[#allocation2 + $0x90] sm:$0x80]  ;;  %v1453_v21 = vld [vmem:[#allocation2 + $0x78] sm:$0x7f] }
 0x1c4   : > { %v1353_v20 = vsel %vm885_vm2, %v1350_v34, %v1352_v35  ;;  %v1410_v2 = vadd.f32 %v1332_v3, %v1194_v59  ;;  %v1412_v53 = vadd.f32 %v1335_v49, %v1196_v61  ;;  %v1414_v37 = vadd.f32 %v1338_v23, %v1198_v36  ;;  %v1455_v30 = vld [vmem:[#allocation2 + $0x138] sm:$0x80]  ;;  %v1459_v35 = vld [vmem:[#allocation2 + $0x80] sm:$0x80]  ;;  %v1461_v59 = vld [vmem:[#allocation2 + $0x40] sm:$0x7f] }
 0x1c5   : > { %v1359_v22 = vsel %vm885_vm2, %v1356_v5, %v1358_v27  ;;  %v1416_v15 = vadd.f32 %v1341_v26, %v1200_v43  ;;  %v1418_v48 = vadd.f32 %v1344_v28, %v1202_v14  ;;  %v1420_v25 = vadd.f32 %v1347_v40, %v1204_v1  ;;  %v4921_v61 = vld [vmem:[#allocation21_spill] sm:$0xff] }
 0x1c6   : > { %v1422_v55 = vadd.f32 %v1350_v34, %v1206_v29  ;;  %v1424_v38 = vadd.f32 %v1353_v20, %v1208_v4  ;;  %v1426_v13 = vadd.f32 %v1356_v5, %v1210_v32  ;;  %v1428_v56 = vadd.f32 %v1359_v22, %v1212_v63 }
 0x1c7   : > { %v1479_v36 = vmul.f32 %v4921_v61, %v1439_v47  ;;  %v1481_v3 = vmul.f32 %v4921_v61, %v1441_v52  ;;  %v1483_v23 = vmul.f32 %v4921_v61, %v1443_v50  ;;  %v1485_v43 = vmul.f32 %v4921_v61, %v1445_v17 }
 0x1c8   : > { %v1487_v14 = vmul.f32 %v4921_v61, %v1447_v9  ;;  %v1489_v1 = vmul.f32 %v4921_v61, %v1449_v39  ;;  %v1491_v29 = vmul.f32 %v4921_v61, %v1451_v58  ;;  %v1493_v4 = vmul.f32 %v4921_v61, %v1453_v21 }
 0x1c9   : > { %v1495_v32 = vmul.f32 %v4921_v61, %v1455_v30  ;;  %v1497_v63 = vmul.f32 %v4921_v61, %v1457_v11  ;;  %v1499_v28 = vmul.f32 %v4921_v61, %v1459_v35  ;;  %v1501_v34 = vmul.f32 %v4921_v61, %v1461_v59 }
 0x1ca   : > { %v4207_v26 = vadd.f32 %v1479_v36, %v1406_v12  ;;  %v4209_v5 = vadd.f32 %v1481_v3, %v1408_v33  ;;  %v4211_v47 = vadd.f32 %v1483_v23, %v1410_v2  ;;  %v4213_v40 = vadd.f32 %v1485_v43, %v1412_v53 }
 0x1cb   : > { %v4205_v49 = vpop.eup %2893  ;;  %v4922_v27 = vsub.f32 %v3978_v24, %v4122_v51  ;;  %v4923_v11 = vsub.f32 %v3980_v62, %v4122_v51  ;;  %v4924_v12 = vsub.f32 %v3991_v8, %v4122_v51  ;;  %v4925_v20 = vsub.f32 %v3993_v31, %v4122_v51 }
 0x1cc   : > { %v4926_v24 = vsub.f32 %v3995_v7, %v4122_v51  ;;  %v4927_v62 = vsub.f32 %v3997_v18, %v4122_v51  ;;  %v4928_v8 = vsub.f32 %v3999_v54, %v4122_v51  ;;  %v4929_v31 = vsub.f32 %v4001_v6, %v4122_v51 }
 0x1cd   : > { %v2203_v52 = vmul.f32 %v4205_v49, %v4922_v27  ;;  %v2205_v50 = vmul.f32 %v4205_v49, %v4923_v11  ;;  %v2207_v33 = vmul.f32 %v4205_v49, %v4924_v12  ;;  %v2209_v2 = vmul.f32 %v4205_v49, %v4925_v20 }
 0x1ce   : > { %v2211_v53 = vmul.f32 %v4205_v49, %v4926_v24  ;;  %v2213_v17 = vmul.f32 %v4205_v49, %v4927_v62  ;;  %v2215_v9 = vmul.f32 %v4205_v49, %v4928_v8  ;;  %v2217_v39 = vmul.f32 %v4205_v49, %v4929_v31  ;;  %v1663_v31 = vld [vmem:[#allocation2 + $0x98] sm:$0xfe] }
 0x1cf   : > { %v2235_v22 = vmax.f32 %v2203_v52, 0.0  ;;  %v2237_v58 = vmax.f32 %v2205_v50, 0.0  ;;  %v2239_v7 = vmax.f32 %v2207_v33, 0.0  ;;  %v2241_v21 = vmax.f32 %v2209_v2, 0.0 }
 0x1d0   : > { %v2243_v30 = vmax.f32 %v2211_v53, 0.0  ;;  %v2245_v35 = vmax.f32 %v2213_v17, 0.0  ;;  %v2247_v59 = vmax.f32 %v2215_v9, 0.0  ;;  %v2249_v18 = vmax.f32 %v2217_v39, 0.0  ;;  %v1553_v53 = vld [vmem:[#allocation2 + $0x40] sm:$0xff] }
 0x1d1   : > { %v2301_v61 = vrot.slane %v2235_v22, 7  ;;  %v2302_v36 = vrot.slane %v2237_v58, 7  ;;  %v2307_v3 = vrot.slane %v2239_v7, 7  ;;  %v2308_v23 = vrot.slane %v2241_v21, 7  ;;  %v1665_v39 = vld [vmem:[#allocation2 + $0x150] sm:$0x1] }
 0x1d2   : > { %v2313_v54 = vrot.slane %v2243_v30, 7  ;;  %v2314_v43 = vrot.slane %v2245_v35, 7  ;;  %v2319_v27 = vrot.slane %v2247_v59, 7  ;;  %v2320_v11 = vrot.slane %v2249_v18, 7  ;;  %v4930_v7 = vld [vmem:[#allocation13_spill] sm:$0xff] }
 0x1d3   : > { %v2303_v6 = vsel %vm1911_vm3, %v2301_v61, %v2302_v36  ;;  %v2309_v12 = vsel %vm1911_vm3, %v2307_v3, %v2308_v23  ;;  %v1519_v52 = vadd.f32 %v1487_v14, %v1414_v37  ;;  %v1521_v50 = vadd.f32 %v1489_v1, %v1416_v15  ;;  %v1667_v14 = vld [vmem:[#allocation2 + $0x38] sm:$0xfe]  ;;  %v1673_v30 = vld [vmem:[#allocation2 + $0xb0] sm:$0x1]  ;;  %v1677_v3 = vld [vmem:[#allocation2 + $0x1c0] sm:$0x1] }
 0x1d4   : > { %v2363_v33 = vpack.c.bf16 %v2309_v12, %v2303_v6  ;;  %v2315_v20 = vsel %vm1911_vm3, %v2313_v54, %v2314_v43  ;;  %v2321_v2 = vsel %vm1911_vm3, %v2319_v27, %v2320_v11  ;;  %v1523_v24 = vadd.f32 %v1491_v29, %v1418_v48  ;;  %v1671_v21 = vld [vmem:[#allocation2 + $0xd8] sm:$0xfe]  ;;  %v1679_v23 = vld [vmem:[#allocation2 + $0x168] sm:$0xfe]  ;;  %v1681_v54 = vld [vmem:[#allocation2 + $0xd0] sm:$0x1] }
 0x1d5   : > { %v2365_v62 = vpack.c.bf16 %v2321_v2, %v2315_v20  ;;  %v1525_v17 = vadd.f32 %v1493_v4, %v1420_v25  ;;  %v1527_v8 = vadd.f32 %v1495_v32, %v1422_v55  ;;  %v1529_v9 = vadd.f32 %v1497_v63, %v1424_v38  ;;  %v1669_v63 = vld [vmem:[#allocation2 + $0x178] sm:$0x1]  ;;  %v1675_v35 = vld [vmem:[#allocation2 + $0x78] sm:$0xfe]  ;;  %v1683_v6 = vld [vmem:[#allocation2 + $0x40] sm:$0xfe] }
 0x1d6   : > { %2530 = vmatprep.mubr.bf16.mxu0 %v2363_v33  ;;  %v1531_v22 = vadd.f32 %v1499_v28, %v1426_v13  ;;  %v1533_v58 = vadd.f32 %v1501_v34, %v1428_v56  ;;  %v1567_v37 = vmul.f32 %v4930_v7, %v4073_v57  ;;  %v1569_v15 = vmul.f32 %v4930_v7, %v4075_v41  ;;  %v2900_v57 = vld [vmem:[%s4599_s2 + $0x10] ss:$0 sm:$0xff] }
 0x1d7   : > { %2538 = vmatprep.mubr.bf16.mxu1 %v2365_v62  ;;  %v1571_v48 = vmul.f32 %v4930_v7, %v4080_v44  ;;  %v1573_v25 = vmul.f32 %v4930_v7, %v4082_v60  ;;  %v1575_v55 = vmul.f32 %v4930_v7, %v4160_v0  ;;  %v1577_v38 = vmul.f32 %v4930_v7, %v1553_v53 }
 0x1d8   : > { %v1599_v13 = vrot.slane %v1567_v37, 1  ;;  %v1601_v56 = vrot.slane %v1569_v15, 1  ;;  %v1703_v41 = vmul.f32 %v2900_v57, %v1663_v31  ;;  %v1705_v1 = vmul.f32 %v2900_v57, %v1665_v39 }
 0x1d9   : > { %v1603_v29 = vrot.slane %v1571_v48, 1  ;;  %v1605_v4 = vrot.slane %v1573_v25, 1  ;;  %v1607_v44 = vrot.slane %v1575_v55, 1  ;;  %v1609_v32 = vrot.slane %v1577_v38, 1 }
 0x1da   : > { %v1631_v60 = vadd.f32 %v1599_v13, %v4207_v26  ;;  %v1633_v0 = vadd.f32 %v1599_v13, %v4209_v5  ;;  %v1635_v28 = vadd.f32 %v1601_v56, %v4211_v47  ;;  %v1637_v34 = vadd.f32 %v1601_v56, %v4213_v40  ;;  %v1685_v5 = vld [vmem:[#allocation2 + $0x128] sm:$0x1] }
 0x1db   : > { %v1639_v59 = vadd.f32 %v1603_v29, %v1519_v52  ;;  %v1641_v18 = vadd.f32 %v1603_v29, %v1521_v50  ;;  %v1643_v61 = vadd.f32 %v1605_v4, %v1523_v24  ;;  %v1645_v36 = vadd.f32 %v1605_v4, %v1525_v17 }
 0x1dc   : > { %v1647_v43 = vadd.f32 %v1607_v44, %v1527_v8  ;;  %v1649_v27 = vadd.f32 %v1607_v44, %v1529_v9  ;;  %v1651_v11 = vadd.f32 %v1609_v32, %v1531_v22  ;;  %v1653_v26 = vadd.f32 %v1609_v32, %v1533_v58 }
 0x1dd   : > { %v1707_v12 = vmul.f32 %v2900_v57, %v1667_v14  ;;  %v1709_v47 = vmul.f32 %v2900_v57, %v1669_v63  ;;  %v1711_v33 = vmul.f32 %v2900_v57, %v1671_v21  ;;  %v1713_v40 = vmul.f32 %v2900_v57, %v1673_v30 }
 0x1de   : > { %v1715_v20 = vmul.f32 %v2900_v57, %v1675_v35  ;;  %v1717_v2 = vmul.f32 %v2900_v57, %v1677_v3  ;;  %v1719_v53 = vmul.f32 %v2900_v57, %v1679_v23  ;;  %v1721_v52 = vmul.f32 %v2900_v57, %v1681_v54 }
 0x1df   : > { %v1723_v50 = vmul.f32 %v2900_v57, %v1683_v6  ;;  %v1725_v24 = vmul.f32 %v2900_v57, %v1685_v5  ;;  %v1767_v62 = vrot.slane %v1703_v41, 2  ;;  %v1769_v17 = vrot.slane %v1705_v1, 2 }
 0x1e0   : > { %v1773_v31 = vrot.slane %v1707_v12, 2  ;;  %v1775_v39 = vrot.slane %v1709_v47, 2  ;;  %v1779_v8 = vrot.slane %v1711_v33, 2  ;;  %v1781_v9 = vrot.slane %v1713_v40, 2  ;;  %v4931_v47 = vld [vmem:[#allocation8_spill] sm:$0xff]  ;;  %v4933_v40 = vld [vmem:[#allocation15_spill] sm:$0xff] }
 0x1e1   : > { %v1770_v22 = vsel %vm885_vm2, %v1767_v62, %v1769_v17  ;;  %v1785_v58 = vrot.slane %v1715_v20, 2  ;;  %v1787_v7 = vrot.slane %v1717_v2, 2  ;;  %v1791_v37 = vrot.slane %v1719_v53, 2  ;;  %v4935_v53 = vld [vmem:[#allocation16_spill] sm:$0xff] }
 0x1e2   : > { %v1776_v15 = vsel %vm885_vm2, %v1773_v31, %v1775_v39  ;;  %v1782_v48 = vsel %vm885_vm2, %v1779_v8, %v1781_v9  ;;  %v1793_v25 = vrot.slane %v1721_v52, 2  ;;  %v1797_v55 = vrot.slane %v1723_v50, 2  ;;  %v4936_v39 = vld [vmem:[#allocation11_spill] sm:$0xff] }
 0x1e3   : > { %v1788_v38 = vsel %vm885_vm2, %v1785_v58, %v1787_v7  ;;  %v1799_v13 = vrot.slane %v1725_v24, 2  ;;  %v4273_v56 = vadd.f32 %v1767_v62, %v1631_v60  ;;  %v4275_v14 = vadd.f32 %v1770_v22, %v1633_v0 }
 0x1e4   : > { %v1794_v57 = vsel %vm885_vm2, %v1791_v37, %v1793_v25  ;;  %v4278_v41 = vadd.f32 %v1773_v31, %v1635_v28  ;;  %v4280_v1 = vadd.f32 %v1776_v15, %v1637_v34  ;;  %v4282_v29 = vadd.f32 %v1779_v8, %v1639_v59 }
 0x1e5   : > { %v1800_v4 = vsel %vm885_vm2, %v1797_v55, %v1799_v13  ;;  %v4285_v44 = vadd.f32 %v1782_v48, %v1641_v18  ;;  %v4287_v32 = vadd.f32 %v1785_v58, %v1643_v61  ;;  %v4289_v63 = vadd.f32 %v1788_v38, %v1645_v36 }
 0x1e6   : > { %v4291_v60 = vadd.f32 %v1791_v37, %v1647_v43  ;;  %v4293_v0 = vadd.f32 %v1794_v57, %v1649_v27  ;;  %v4295_v21 = vadd.f32 %v1797_v55, %v1651_v11  ;;  %v4297_v28 = vadd.f32 %v1800_v4, %v1653_v26 }
 0x1e7   : > { %v1912_v34 = vrot.slane %v4273_v56, 7  ;;  %v1913_v30 = vrot.slane %v4275_v14, 7  ;;  %v1918_v35 = vrot.slane %v4278_v41, 7  ;;  %v1919_v59 = vrot.slane %v4280_v1, 7 }
 0x1e8   : > { %v1924_v18 = vrot.slane %v4282_v29, 7  ;;  %v1925_v61 = vrot.slane %v4285_v44, 7  ;;  %v1930_v36 = vrot.slane %v4287_v32, 7  ;;  %v1931_v3 = vrot.slane %v4289_v63, 7 }
 0x1e9   : > { %v1914_v23 = vsel %vm1911_vm3, %v1912_v34, %v1913_v30  ;;  %v1920_v54 = vsel %vm1911_vm3, %v1918_v35, %v1919_v59  ;;  %v1936_v43 = vrot.slane %v4291_v60, 7  ;;  %v1937_v27 = vrot.slane %v4293_v0, 7 }
 0x1ea   : > { %v1926_v11 = vsel %vm1911_vm3, %v1924_v18, %v1925_v61  ;;  %v1932_v26 = vsel %vm1911_vm3, %v1930_v36, %v1931_v3  ;;  %v1942_v6 = vrot.slane %v4295_v21, 7  ;;  %v1943_v5 = vrot.slane %v4297_v28, 7 }
 0x1eb   : > { %v1938_v12 = vsel %vm1911_vm3, %v1936_v43, %v1937_v27  ;;  %v4932_v33 = vrot.slane %v4931_v47, 7  ;;  %v4934_v20 = vrot.slane %v4933_v40, 7  ;;  %v1955_v52 = vrot.slane %v4935_v53, 7 }
 0x1ec   : > { %v1976_v50 = vadd.f32 %v1920_v54, %v1914_v23  ;;  %v1944_v24 = vsel %vm1911_vm3, %v1942_v6, %v1943_v5  ;;  %v2004_v62 = vmul.f32 %v4273_v56, %v4273_v56  ;;  %v2006_v17 = vmul.f32 %v4275_v14, %v4275_v14 }
 0x1ed   : > { %v1950_v2 = vsel %vm1911_vm3, %v4934_v20, %v4932_v33  ;;  %v2008_v31 = vmul.f32 %v4278_v41, %v4278_v41  ;;  %v4937_v8 = vrot.slane %v4936_v39, 7  ;;  %v2010_v58 = vmul.f32 %v4280_v1, %v4280_v1 }
 0x1ee   : > { %v1977_v22 = vadd.f32 %v1976_v50, %v1926_v11  ;;  %v2012_v7 = vmul.f32 %v4282_v29, %v4282_v29  ;;  %v2014_v37 = vmul.f32 %v4285_v44, %v4285_v44  ;;  %v2016_v15 = vmul.f32 %v4287_v32, %v4287_v32  ;;  %v4940_v50 = vld [vmem:[#allocation22_spill] sm:$0xff] }
 0x1ef   : > { %v1956_v9 = vsel %vm1911_vm3, %v4937_v8, %v1955_v52  ;;  %v2018_v48 = vmul.f32 %v4289_v63, %v4289_v63  ;;  %v2020_v25 = vmul.f32 %v4291_v60, %v4291_v60  ;;  %v2022_v38 = vmul.f32 %v4293_v0, %v4293_v0  ;;  %v4938_v52 = vld [vmem:[#allocation19_spill] sm:$0xff] }
 0x1f0   : > { %v1978_v55 = vadd.f32 %v1977_v22, %v1932_v26  ;;  %v2024_v13 = vmul.f32 %v4295_v21, %v4295_v21  ;;  %v2026_v57 = vmul.f32 %v4297_v28, %v4297_v28  ;;  %v2034_v4 = vmul.f32 %v4935_v53, %v4935_v53 }
 0x1f1   : > { %v2068_v34 = vrot.slane %v2004_v62, 7  ;;  %v2069_v30 = vrot.slane %v2006_v17, 7  ;;  %v2074_v35 = vrot.slane %v2008_v31, 7  ;;  %v2075_v18 = vrot.slane %v2010_v58, 7 }
 0x1f2   : > { %v1979_v59 = vadd.f32 %v1978_v55, %v1938_v12  ;;  %v2080_v61 = vrot.slane %v2012_v7, 7  ;;  %v2081_v36 = vrot.slane %v2014_v37, 7  ;;  %v2086_v23 = vrot.slane %v2016_v15, 7  ;;  %v4942_v37 = vld [vmem:[#allocation23_spill] sm:$0xff] }
 0x1f3   : > { %v2070_v3 = vsel %vm1911_vm3, %v2068_v34, %v2069_v30  ;;  %v2087_v54 = vrot.slane %v2018_v48, 7  ;;  %v2092_v43 = vrot.slane %v2020_v25, 7  ;;  %v2076_v11 = vsel %vm1911_vm3, %v2074_v35, %v2075_v18 }
 0x1f4   : > { %v1980_v27 = vadd.f32 %v1979_v59, %v1944_v24  ;;  %v2082_v26 = vsel %vm1911_vm3, %v2080_v61, %v2081_v36  ;;  %v2093_v6 = vrot.slane %v2022_v38, 7  ;;  %v2098_v33 = vrot.slane %v2024_v13, 7 }
 0x1f5   : > { %v2088_v5 = vsel %vm1911_vm3, %v2086_v23, %v2087_v54  ;;  %v2099_v20 = vrot.slane %v2026_v57, 7  ;;  %v4939_v12 = vrot.slane %v4938_v52, 7  ;;  %v4941_v62 = vrot.slane %v4940_v50, 7 }
 0x1f6   : > { %v1981_v31 = vadd.f32 %v1980_v27, %v1950_v2  ;;  %v2094_v8 = vsel %vm1911_vm3, %v2092_v43, %v2093_v6  ;;  %v2111_v22 = vrot.slane %v2034_v4, 7  ;;  %v2132_v24 = vadd.f32 %v2076_v11, %v2070_v3 }
 0x1f7   : > { %v2106_v17 = vsel %vm1911_vm3, %v4941_v62, %v4939_v12  ;;  %v2100_v58 = vsel %vm1911_vm3, %v2098_v33, %v2099_v20  ;;  %v4943_v15 = vrot.slane %v4942_v37, 7 }
 0x1f8   : > { %v1982_v7 = vadd.f32 %v1981_v31, %v1956_v9  ;;  %v2133_v25 = vadd.f32 %v2132_v24, %v2082_v26  ;;  %v2185_v31 = vsub.f32 %v4005_v46, %v4122_v51 }
 0x1f9   : > { %v2112_v48 = vsel %vm1911_vm3, %v4943_v15, %v2111_v22  ;;  %v2189_v22 = vsub.f32 %v4009_v16, %v4122_v51  ;;  %v2193_v16 = vsub.f32 %v3862_v42, %v4122_v51 }
 0x1fa   : > { %v1983_v55 = vrot.slane %v1982_v7, 4  ;;  %v2134_v38 = vadd.f32 %v2133_v25, %v2088_v5 }
 0x1fb   : > { %v2225_v15 = vmul.f32 %v4205_v49, %v2189_v22 }
 0x1fc   : > { %v1984_v13 = vadd.f32 %v1983_v55, %v1982_v7  ;;  %v2135_v57 = vadd.f32 %v2134_v38, %v2094_v8  ;;  %v2187_v8 = vsub.f32 %v4007_v19, %v4122_v51  ;;  %v2221_v7 = vmul.f32 %v4205_v49, %v2185_v31  ;;  %v4944_v38 = vld [vmem:[#allocation20_spill] sm:$0xff] }
 0x1fd   : > { %v2257_v55 = vmax.f32 %v2225_v15, 0.0  ;;  %v2191_v19 = vsub.f32 %v3858_v45, %v4122_v51 }
 0x1fe   : > { %v1985_v34 = vrot.slane %v1984_v13, 2  ;;  %v2136_v30 = vadd.f32 %v2135_v57, %v2100_v58  ;;  %v2223_v37 = vmul.f32 %v4205_v49, %v2187_v8  ;;  %v2253_v25 = vmax.f32 %v2221_v7, 0.0  ;;  %v4945_v57 = vld [vmem:[#allocation24_spill] sm:$0xff] }
 0x200   : > { %v1986_v35 = vadd.f32 %v1985_v34, %v1984_v13  ;;  %v2137_v2 = vadd.f32 %v2136_v30, %v2106_v17  ;;  %v2183_v17 = vsub.f32 %v4003_v10, %v4122_v51  ;;  %v2255_v46 = vmax.f32 %v2223_v37, 0.0 }
 0x201   : > { %v2195_v13 = vsub.f32 %v4944_v38, %v4122_v51  ;;  %v2197_v34 = vsub.f32 %v4945_v57, %v4122_v51 }
 0x202   : > { %v1987_v59 = vrot.slane %v1986_v35, 1  ;;  %v2138_v18 = vadd.f32 %v2137_v2, %v2112_v48  ;;  %v2219_v58 = vmul.f32 %v4205_v49, %v2183_v17  ;;  %v2331_v2 = vrot.slane %v2255_v46, 7 }
 0x203   : > { %v2233_v45 = vmul.f32 %v4205_v49, %v2197_v34 }
 0x204   : > { %v1988_v4 = vadd.f32 %v1987_v59, %v1986_v35  ;;  %v2139_v61 = vrot.slane %v2138_v18, 4  ;;  %v2251_v10 = vmax.f32 %v2219_v58, 0.0  ;;  %v2326_v35 = vrot.slane %v2253_v25, 7 }
 0x205   : > { %v2227_v59 = vmul.f32 %v4205_v49, %v2191_v19  ;;  %v2265_v51 = vmax.f32 %v2233_v45, 0.0 }
 0x206   : > { %v4366_v36 = vmul.f32 0.015625, %v1988_v4  ;;  %v2140_v9 = vadd.f32 %v2139_v61, %v2138_v18  ;;  %v2325_v30 = vrot.slane %v2251_v10, 7  ;;  %v2332_v18 = vrot.slane %v2257_v55, 7 }
 0x207   : > { %v2229_v4 = vmul.f32 %v4205_v49, %v2193_v16  ;;  %v2231_v61 = vmul.f32 %v4205_v49, %v2195_v13  ;;  %v2344_v31 = vrot.slane %v2265_v51, 7 }
 0x208   : > { %v2141_v3 = vrot.slane %v2140_v9, 2  ;;  %v2166_v23 = vsub.f32 %v4273_v56, %v4366_v36  ;;  %v2168_v54 = vsub.f32 %v4275_v14, %v4366_v36  ;;  %v2170_v43 = vsub.f32 %v4278_v41, %v4366_v36 }
 0x209   : > { %v2172_v27 = vsub.f32 %v4280_v1, %v4366_v36  ;;  %v2174_v11 = vsub.f32 %v4282_v29, %v4366_v36  ;;  %v2176_v26 = vsub.f32 %v4285_v44, %v4366_v36  ;;  %v2178_v5 = vsub.f32 %v4287_v32, %v4366_v36 }
 0x20a   : > { %v2142_v6 = vadd.f32 %v2141_v3, %v2140_v9  ;;  %v2180_v56 = vsub.f32 %v4289_v63, %v4366_v36  ;;  %v2182_v14 = vsub.f32 %v4291_v60, %v4366_v36  ;;  %v2184_v41 = vsub.f32 %v4293_v0, %v4366_v36 }
 0x20b   : > { %v2186_v1 = vsub.f32 %v4295_v21, %v4366_v36  ;;  %v2188_v29 = vsub.f32 %v4297_v28, %v4366_v36  ;;  %v2190_v44 = vsub.f32 %v4933_v40, %v4366_v36  ;;  %v2192_v32 = vsub.f32 %v4931_v47, %v4366_v36 }
 0x20c   : > { %v2143_v33 = vrot.slane %v2142_v6, 1  ;;  %v2194_v63 = vsub.f32 %v4936_v39, %v4366_v36  ;;  %v2196_v20 = vsub.f32 %v4935_v53, %v4366_v36  ;;  %v2160_v12 = vmul.f32 %v4366_v36, %v4366_v36 }
 0x20d   : > { %v2327_v42 = vsel %vm1911_vm3, %v2325_v30, %v2326_v35  ;;  %v2259_v9 = vmax.f32 %v2227_v59, 0.0  ;;  %v2333_v3 = vsel %vm1911_vm3, %v2331_v2, %v2332_v18 }
 0x20e   : > { %v2144_v52 = vadd.f32 %v2143_v33, %v2142_v6  ;;  %v2261_v6 = vmax.f32 %v2229_v4, 0.0  ;;  %v2263_v33 = vmax.f32 %v2231_v61, 0.0 }
 0x210   : > { %v2158_v50 = vmul.f32 0.015625, %v2144_v52  ;;  %v2367_v52 = vpack.c.bf16 %v2333_v3, %v2327_v42  ;;  %v2343_v17 = vrot.slane %v2263_v33, 7 }
 0x212   : > { %v2162_v62 = vsub.f32 %v2158_v50, %v2160_v12  ;;  %v4428_v50 = vrot.slane %v2259_v9, 7  ;;  %v2345_v53 = vsel %vm1911_vm3, %v2343_v17, %v2344_v31 }
 0x214   : > { %v2164_v24 = vmax.f32 %v2162_v62, 0.0  ;;  %v2338_v62 = vrot.slane %v2261_v6, 7 }
 0x216   : > { %v2198_v48 = vadd.f32 1e-05, %v2164_v24 }
 0x218   : > { %2895 = vrsqrt.f32 %v2198_v48 }
 0x225   : > { %v2896_v12 = vpop.eup %2895 }
 0x226   : > { %v2202_v8 = vmul.f32 %v2896_v12, %v2166_v23  ;;  %v2204_v22 = vmul.f32 %v2896_v12, %v2168_v54  ;;  %v2206_v24 = vmul.f32 %v2896_v12, %v2170_v43  ;;  %v2208_v58 = vmul.f32 %v2896_v12, %v2172_v27 }
 0x227   : > { %v2210_v49 = vmul.f32 %v2896_v12, %v2174_v11  ;;  %v2212_v7 = vmul.f32 %v2896_v12, %v2176_v26  ;;  %v2214_v37 = vmul.f32 %v2896_v12, %v2178_v5  ;;  %v2216_v15 = vmul.f32 %v2896_v12, %v2180_v56 }
 0x228   : > { %v2234_v48 = vmax.f32 %v2202_v8, 0.0  ;;  %v2236_v10 = vmax.f32 %v2204_v22, 0.0  ;;  %v2238_v25 = vmax.f32 %v2206_v24, 0.0  ;;  %v2240_v46 = vmax.f32 %v2208_v58, 0.0 }
 0x229   : > { %v2242_v55 = vmax.f32 %v2210_v49, 0.0  ;;  %v2244_v19 = vmax.f32 %v2212_v7, 0.0  ;;  %v2246_v16 = vmax.f32 %v2214_v37, 0.0  ;;  %v2248_v38 = vmax.f32 %v2216_v15, 0.0 }
 0x22a   : > { %v2298_v13 = vrot.slane %v2234_v48, 7  ;;  %v2299_v57 = vrot.slane %v2236_v10, 7  ;;  %v2304_v34 = vrot.slane %v2238_v25, 7  ;;  %v2305_v30 = vrot.slane %v2240_v46, 7 }
 0x22b   : > { %v2310_v23 = vrot.slane %v2242_v55, 7  ;;  %v2311_v54 = vrot.slane %v2244_v19, 7  ;;  %v2316_v43 = vrot.slane %v2246_v16, 7  ;;  %v2317_v27 = vrot.slane %v2248_v38, 7 }
 0x22c   : > { %v2300_v11 = vsel %vm1911_vm3, %v2298_v13, %v2299_v57  ;;  %v2306_v26 = vsel %vm1911_vm3, %v2304_v34, %v2305_v30  ;;  %v2218_v5 = vmul.f32 %v2896_v12, %v2182_v14  ;;  %v2220_v56 = vmul.f32 %v2896_v12, %v2184_v41 }
 0x22d   : > { %v2362_v35 = vpack.c.bf16 %v2306_v26, %v2300_v11  ;;  %v2312_v2 = vsel %vm1911_vm3, %v2310_v23, %v2311_v54  ;;  %v2318_v59 = vsel %vm1911_vm3, %v2316_v43, %v2317_v27  ;;  %v2222_v18 = vmul.f32 %v2896_v12, %v2186_v1 }
 0x22e   : > { %v2364_v4 = vpack.c.bf16 %v2318_v59, %v2312_v2  ;;  %v2224_v61 = vmul.f32 %v2896_v12, %v2188_v29  ;;  %v2250_v60 = vmax.f32 %v2218_v5, 0.0  ;;  %v2252_v14 = vmax.f32 %v2220_v56, 0.0 }
 0x22f   : > { %2531 = vmatmul.mubr.bf16.vlgmr.msra.gmra.mxu0 %v2362_v35  ;;  %v2254_v45 = vmax.f32 %v2222_v18, 0.0  ;;  %v2226_v0 = vmul.f32 %v2896_v12, %v2190_v44  ;;  %v2228_v41 = vmul.f32 %v2896_v12, %v2192_v32  ;;  %v2230_v21 = vmul.f32 %v2896_v12, %v2194_v63 }
 0x230   : > { %2539 = vmatmul.mubr.bf16.vlgmr.msra.gmra.mxu1 %v2364_v4  ;;  %v2256_v1 = vmax.f32 %v2224_v61, 0.0  ;;  %v2322_v28 = vrot.slane %v2250_v60, 7  ;;  %v2323_v29 = vrot.slane %v2252_v14, 7  ;;  %v2232_v42 = vmul.f32 %v2896_v12, %v2196_v20 }
 0x231   : > { %2546 = vmatprep.mubr.bf16.mxu1 %v2367_v52  ;;  %v2328_v9 = vrot.slane %v2254_v45, 7  ;;  %v2258_v40 = vmax.f32 %v2226_v0, 0.0  ;;  %v2260_v44 = vmax.f32 %v2228_v41, 0.0  ;;  %v2262_v3 = vmax.f32 %v2230_v21, 0.0 }
 0x232   : > { %v2324_v47 = vsel %vm1911_vm3, %v2322_v28, %v2323_v29  ;;  %v2329_v32 = vrot.slane %v2256_v1, 7  ;;  %v2264_v6 = vmax.f32 %v2232_v42, 0.0  ;;  %v2339_v8 = vsel %vm1911_vm3, %v4428_v50, %v2338_v62 }
 0x233   : > { %v2334_v33 = vrot.slane %v2258_v40, 7  ;;  %v2335_v39 = vrot.slane %v2260_v44, 7  ;;  %v2340_v63 = vrot.slane %v2262_v3, 7  ;;  %v2369_v22 = vpack.c.bf16 %v2345_v53, %v2339_v8 }
 0x234   : > { %v2330_v51 = vsel %vm1911_vm3, %v2328_v9, %v2329_v32  ;;  %v2341_v36 = vrot.slane %v2264_v6, 7 }
 0x235   : > { %v2366_v20 = vpack.c.bf16 %v2330_v51, %v2324_v47  ;;  %v2336_v52 = vsel %vm1911_vm3, %v2334_v33, %v2335_v39 }
 0x236   : > { %v2342_v12 = vsel %vm1911_vm3, %v2340_v63, %v2341_v36 }
 0x237   : > { %v2368_v24 = vpack.c.bf16 %v2342_v12, %v2336_v52 }
 0x238   : > { %2547 = vmatmul.mubr.bf16.gmra.mxu1 %v2366_v20 }
 0x239   : > { %2554 = vmatprep.mubr.bf16.mxu1 %v2369_v22 }
 0x240   : > { %2555 = vmatmul.mubr.bf16.gmra.mxu1 %v2368_v24 }
 0x2ef   : > { %v2785_v58 = vpop.f32.mrf.mxu0 }
 0x2f0   : > { %v2791_v49 = vpop.f32.mrf.mxu1 }
 0x2f1   : > { %v2786_v7 = vpop.f32.mrf.mxu0 }
 0x2f2   : > { %v4465_v37 = vadd.f32 %v2786_v7, %v2785_v58  ;;  %v2792_v15 = vpop.f32.mrf.mxu1 }
 0x2f3   : > { %v2788_v50 = vpop.f32.mrf.mxu0  ;;  %v4467_v62 = vadd.f32 %v2792_v15, %v2791_v49 }
 0x2f4   : > { %v2794_v17 = vpop.f32.mrf.mxu1  ;;  %v2585_v48 = vmul.f32 %v4465_v37, %v4465_v37  ;;  %v2563_v55 = vsel %vm273_vm1, %v4465_v37, 0.0 }
 0x2f5   : > { %v2789_v31 = vpop.f32.mrf.mxu0  ;;  %v2587_v19 = vmul.f32 %v4467_v62, %v4467_v62  ;;  %v2566_v30 = vsel %vm273_vm1, %v4467_v62, 0.0 }
 0x2f6   : > { %v4471_v10 = vadd.f32 %v2789_v31, %v2788_v50  ;;  %v2795_v25 = vpop.f32.mrf.mxu1  ;;  %v2593_v34 = vsel %vm273_vm1, %v2585_v48, 0.0 }
 0x2f7   : > { %v4473_v46 = vadd.f32 %v2795_v25, %v2794_v17  ;;  %v2596_v5 = vsel %vm273_vm1, %v2587_v19, 0.0 }
 0x2f8   : > { %v2564_v16 = vsel %vm273_vm1, %v4471_v10, 0.0  ;;  %v2586_v38 = vmul.f32 %v4471_v10, %v4471_v10  ;;  %v2797_v13 = vpop.f32.mrf.mxu1 }
 0x2f9   : > { %v2565_v57 = vadd.f32 %v2564_v16, %v2563_v55  ;;  %v2588_v11 = vmul.f32 %v4473_v46, %v4473_v46  ;;  %v2568_v35 = vsel %vm273_vm1, %v4473_v46, 0.0 }
 0x2fa   : > { %v2594_v23 = vsel %vm273_vm1, %v2586_v38, 0.0  ;;  %v2798_v54 = vpop.f32.mrf.mxu1 }
 0x2fb   : > { %v2595_v43 = vadd.f32 %v2594_v23, %v2593_v34  ;;  %v2567_v27 = vadd.f32 %v2566_v30, %v2565_v57  ;;  %v4489_v26 = vadd.f32 %v2798_v54, %v2797_v13  ;;  %v2598_v4 = vsel %vm273_vm1, %v2588_v11, 0.0 }
 0x2fc   : > { %v2800_v56 = vpop.f32.mrf.mxu1 }
 0x2fd   : > { %v2597_v2 = vadd.f32 %v2596_v5, %v2595_v43  ;;  %v2569_v59 = vadd.f32 %v2568_v35, %v2567_v27  ;;  %v2589_v61 = vmul.f32 %v4489_v26, %v4489_v26  ;;  %v2570_v0 = vsel %vm273_vm1, %v4489_v26, 0.0 }
 0x2fe   : > { %v2801_v18 = vpop.f32.mrf.mxu1 }
 0x2ff   : > { %v4497_v60 = vadd.f32 %v2801_v18, %v2800_v56  ;;  %v2599_v14 = vadd.f32 %v2598_v4, %v2597_v2  ;;  %v2571_v21 = vadd.f32 %v2570_v0, %v2569_v59  ;;  %v2600_v28 = vsel %vm273_vm1, %v2589_v61, 0.0  ;;  %v2901_v4 = vld [vmem:[%s3063_s11 + $0x38] sm:$0xff] }
 0x300   : > { %v2803_v45 = vpop.f32.mrf.mxu1 }
 0x301   : > { %v2590_v41 = vmul.f32 %v4497_v60, %v4497_v60  ;;  %v2572_v29 = vsel %vm273_vm1, %v4497_v60, 0.0  ;;  %v2601_v9 = vadd.f32 %v2600_v28, %v2599_v14 }
 0x302   : > { %v2804_v1 = vpop.f32.mrf.mxu1  ;;  %v2573_v32 = vadd.f32 %v2572_v29, %v2571_v21  ;;  %v2906_v29 = vld [vmem:[%s3063_s11 + $0x20] sm:$0xff] }
 0x303   : > { %v2805_v42 = vadd.f32 %v2804_v1, %v2803_v45  ;;  %v2602_v44 = vsel %vm273_vm1, %v2590_v41, 0.0  ;;  %v2903_v45 = vld [vmem:[%s3063_s11 + $0x8] sm:$0xff]  ;;  %v2904_v41 = vld [vmem:[%s3063_s11 + $0x10] sm:$0xff]  ;;  %v2905_v1 = vld [vmem:[%s3063_s11 + $0x18] sm:$0xff] }
 0x304   : > { %v2806_v40 = vpop.f32.mrf.mxu1  ;;  %v2603_v63 = vadd.f32 %v2602_v44, %v2601_v9  ;;  %v2907_v9 = vld [vmem:[%s3063_s11 + $0x28] sm:$0xff]  ;;  %v2908_v44 = vld [vmem:[%s3063_s11 + $0x30] sm:$0xff] }
 0x305   : > { %v2574_v3 = vsel %vm273_vm1, %v2805_v42, 0.0  ;;  %v2591_v47 = vmul.f32 %v2805_v42, %v2805_v42 }
 0x306   : > { %v2807_v6 = vpop.f32.mrf.mxu1  ;;  %v2575_v51 = vadd.f32 %v2574_v3, %v2573_v32 }
 0x307   : > { %v2604_v33 = vsel %vm273_vm1, %v2591_v47, 0.0  ;;  %v2808_v39 = vadd.f32 %v2807_v6, %v2806_v40 }
 0x308   : > { %v2605_v36 = vadd.f32 %v2604_v33, %v2603_v63 }
 0x309   : > { %v2576_v8 = vsel %vm273_vm1, %v2808_v39, 0.0  ;;  %v2592_v53 = vmul.f32 %v2808_v39, %v2808_v39 }
 0x30a   : > { %v2577_v20 = vadd.f32 %v2576_v8, %v2575_v51 }
 0x30b   : > { %v2606_v52 = vsel %vm273_vm1, %v2592_v53, 0.0 }
 0x30c   : > { %v2578_v12 = vrot.slane %v2577_v20, 4  ;;  %v2607_v22 = vadd.f32 %v2606_v52, %v2605_v36 }
 0x30e   : > { %v2579_v24 = vadd.f32 %v2578_v12, %v2577_v20  ;;  %v2608_v58 = vrot.slane %v2607_v22, 4 }
 0x310   : > { %v2580_v49 = vrot.slane %v2579_v24, 2  ;;  %v2609_v7 = vadd.f32 %v2608_v58, %v2607_v22 }
 0x312   : > { %v2581_v15 = vadd.f32 %v2580_v49, %v2579_v24  ;;  %v2610_v50 = vrot.slane %v2609_v7, 2 }
 0x314   : > { %v2582_v17 = vrot.slane %v2581_v15, 1  ;;  %v2611_v31 = vadd.f32 %v2610_v50, %v2609_v7 }
 0x316   : > { %v2583_v48 = vadd.f32 %v2582_v17, %v2581_v15  ;;  %v2612_v25 = vrot.slane %v2611_v31, 1 }
 0x318   : > { %v2584_v55 = vmul.f32 0.015625, %v2583_v48  ;;  %v2613_v19 = vadd.f32 %v2612_v25, %v2611_v31 }
 0x31a   : > { %v2614_v16 = vmul.f32 0.015625, %v2613_v19  ;;  %v2615_v38 = vmul.f32 %v2584_v55, %v2584_v55  ;;  %v2625_v30 = vsub.f32 %v2808_v39, %v2584_v55  ;;  %v2618_v23 = vsub.f32 %v4465_v37, %v2584_v55 }
 0x31b   : > { %v2619_v54 = vsub.f32 %v4471_v10, %v2584_v55  ;;  %v2620_v43 = vsub.f32 %v4467_v62, %v2584_v55  ;;  %v2621_v11 = vsub.f32 %v4473_v46, %v2584_v55  ;;  %v2622_v5 = vsub.f32 %v4489_v26, %v2584_v55 }
 0x31c   : > { %v2616_v13 = vsub.f32 %v2614_v16, %v2615_v38  ;;  %v2623_v56 = vsub.f32 %v4497_v60, %v2584_v55  ;;  %v2624_v35 = vsub.f32 %v2805_v42, %v2584_v55  ;;  %v2902_v60 = vld [vmem:[%s3063_s11] sm:$0xff]  ;;  %s4557_s11 = scalar_lea.sflag [#allocation4], %s188_s7 }
 0x31e   : > { %v2617_v57 = vmax.f32 %v2616_v13, 0.0 }
 0x320   : > { %v2626_v34 = vadd.f32 1e-05, %v2617_v57 }
 0x322   : > { %2897 = vrsqrt.f32 %v2626_v34 }
 0x32f   : > { %v2898_v27 = vpop.eup %2897 }
 0x330   : > { %v2635_v37 = vmul.f32 %v2898_v27, %v2625_v30  ;;  %v2628_v10 = vmul.f32 %v2898_v27, %v2618_v23  ;;  %v2629_v62 = vmul.f32 %v2898_v27, %v2619_v54  ;;  %v2630_v2 = vmul.f32 %v2898_v27, %v2620_v43 }
 0x331   : > { %v2631_v59 = vmul.f32 %v2898_v27, %v2621_v11  ;;  %v2632_v46 = vmul.f32 %v2898_v27, %v2622_v5  ;;  %v2633_v26 = vmul.f32 %v2898_v27, %v2623_v56  ;;  %v2634_v18 = vmul.f32 %v2898_v27, %v2624_v35 }
 0x332   : > { %v2643_v61 = vadd.f32 %v2901_v4, %v2635_v37  ;;  %v2636_v14 = vadd.f32 %v2902_v60, %v2628_v10  ;;  %v2637_v0 = vadd.f32 %v2903_v45, %v2629_v62  ;;  %v2638_v21 = vadd.f32 %v2904_v41, %v2630_v2 }
 0x333   : > { %v2639_v28 = vadd.f32 %v2905_v1, %v2631_v59  ;;  %v2640_v42 = vadd.f32 %v2906_v29, %v2632_v46  ;;  %v2641_v40 = vadd.f32 %v2907_v9, %v2633_v26  ;;  %v2642_v3 = vadd.f32 %v2908_v44, %v2634_v18 }
 0x334   : > { %2651 = vst.msk [vmem:[%s4521_s10 + $0x38] sm:$0xff] %vm273_vm1, %v2643_v61  ;;  %2644 = vst.msk [vmem:[%s4521_s10] sm:$0xff] %vm273_vm1, %v2636_v14 }
 0x335   : > { %2645 = vst.msk [vmem:[%s4521_s10 + $0x8] sm:$0xff] %vm273_vm1, %v2637_v0  ;;  %2646 = vst.msk [vmem:[%s4521_s10 + $0x10] sm:$0xff] %vm273_vm1, %v2638_v21 }
 0x336   : > { %2647 = vst.msk [vmem:[%s4521_s10 + $0x18] sm:$0xff] %vm273_vm1, %v2639_v28  ;;  %2648 = vst.msk [vmem:[%s4521_s10 + $0x20] sm:$0xff] %vm273_vm1, %v2640_v42 }
 0x337   : > { %2649 = vst.msk [vmem:[%s4521_s10 + $0x28] sm:$0xff] %vm273_vm1, %v2641_v40  ;;  %2650 = vst.msk [vmem:[%s4521_s10 + $0x30] sm:$0xff] %vm273_vm1, %v2642_v3 }
 0x338   : > { %2922 = shalt.err (!%p2919_p3)
}
 0x339   : > { %s2923_s28 = scalar_lea.hbm %s4531_s14, 1024  ;;  %s2927_s5 = scalar_lea.hbm %s4601_s4, 2048 }
 0x33a   : > { %p2924_p4 = scmp.ne.s32.totalorder %s4531_s14, %s2923_s28  ;;  %p2928_p9 = scmp.lt.s32.totalorder %s4531_s14, %s4601_s4 }
 0x33b   : > { %p2929_p10 = scmp.lt.s32.totalorder %s2927_s5, %s2923_s28 }
 0x33c   : > { %p2925_p7 = pnand %p2924_p4, %p3039_p5 }
 0x33d   : > { %p2930_p11 = por %p2929_p10, %p2928_p9 }
 0x33e   : > { %p2926_p8 = pneg %p2925_p7 }
 0x340   : > { %p2931_p12 = pnand %p2930_p11, %p2926_p8 }
 0x342   : > { %2934 = shalt.err (!%p2931_p12)
}
 0x343   : > { %s2974_s8 = smov 128   ;;  %s2975_s9 = smov 8  }
 0x344   : > { %2825 = dma.vmem_to_hbm [thread:$0]  (%p3039_p5), %s4533_s12, 1024, %s4531_s14, %s4557_s11, %s2974_s8, %s2974_s8, %s2975_s9  }
 0x345 PF: > { %p2831_p13 = scmp.ge.s32.totalorder %s2969_s18, 2  ;;  %s2681_s10 = sand.u32 1, %s2957_s15  }
 0x346   : > { %s2682_s19 = scalar_lea.sflag [#allocation4], %s2681_s10 }
 0x347   : > { %p2828_p0 = pnand %p2831_p13, %p3043_p6 }
 0x349   : > { %p2829_p1 = pneg %p2828_p0 }
 0x34b   : > { %2952 = dma.done.wait (%p2829_p1), %s2682_s19, 1024  }
 0x34c   : > { %2954 = vsyncadd (%p2829_p1), %s2682_s19, 4294966272  ;;  %p14_p2 = scmp.ge.s32.totalorder %s3026_s21, 4   ;;  %s4946_s15 = smov %s2961_s16 }
 0x34d   : > { %s4947_s16 = smov %s2965_s17  ;;  %s4948_s17 = smov %s3037_s24 }
 0x34e   : > { %s4949_s18 = smov %s3026_s21  ;;  %16 = sbr.rel (!%p14_p2) target bundleno = 3 (0x3), region = 74 }
 0x353   :  { %2687 = vsyncpa [#allocation4], 1 }
 0x354   :  { %2689 = vsyncpa [#allocation4 + $0x1], 1 }

</bundles_post_ra>
